<compile_context>
chip_gen: v7x
topology: tpu7x:2x2x1
jax: 0.10.0
libtpu: 0.0.40
codegen_flags: <defaults>
</compile_context>

<pallas_src>
from collections import namedtuple

import jax
import jax.numpy as jnp
from jax import lax
from jax.experimental import pallas as pl
from jax.experimental.pallas import tpu as pltpu

# ----------------------------- configuration -------------------------------
INITRANGE = 0.04

Genotype = namedtuple("Genotype", ["recurrent", "concat"])
# A small DARTS-style recurrent genotype (4 intermediate steps).
GENOTYPE = Genotype(
    recurrent=[("tanh", 0), ("relu", 1), ("sigmoid", 1), ("identity", 2)],
    concat=list(range(1, 5)),
)
STEPS = len(GENOTYPE.recurrent)

T = 8           # sequence length
B = 8           # batch size
NINP = 64       # embedding size
NHID = 64       # hidden size (ninp == nhid == nhidlast asserted in torch model)
NTOKEN = 128    # vocabulary size
NTAG = 8        # number of IBO tags
NTAG_PAD = 128  # lane-dense padded IBO head width
NEG_BIG = -1e30  # pad-column bias: exp() underflows to exactly 0 in f32

_ACT = {
    "tanh": jnp.tanh,
    "relu": lambda x: jnp.maximum(x, 0.0),
    "sigmoid": jax.nn.sigmoid,
    "identity": lambda x: x,
}


def _build_groups(recurrent):
    """Group consecutive genotype steps that share a predecessor so their
    (NHID, 2*NHID) matmuls fuse into one wider MXU pass."""
    groups = []
    for i, (_, pred) in enumerate(recurrent):
        if groups and groups[-1][0] == pred:
            groups[-1][1].append(i)
        else:
            groups.append((pred, [i]))
    return tuple((p, tuple(ix)) for p, ix in groups)


GROUPS = _build_groups(GENOTYPE.recurrent)   # [(0,(0,)), (1,(1,2)), (2,(3,))]

# ------------------------------ Pallas kernel -------------------------------


def rnn_fused_kernel(tok_ref, h0_ref, xtab_ref, w0h_ref, ws_ref,
                     heads_w_ref, heads_b_ref,
                     logp_ref, ibo_ref, hlast_ref,
                     xproj_scr, hid_scr):
    """Fused embedding-gather + DARTS recurrence + tied decoder + IBO classifier."""
    h2 = 2 * NHID
    tb = tok_ref.shape[0]

    # ---- fused embedding + x-projection for ALL timesteps (one MXU pass) ----
    # one-hot(tokens) @ (encoder_weight @ W0x) == emb @ W0x, exactly (0/1 rows).
    tok = tok_ref[...]                                            # (T*B, 1) int32
    cols = lax.broadcasted_iota(jnp.int32, (tb, NTOKEN), 1)
    onehot = (cols == tok).astype(jnp.float32)                    # (T*B, NTOKEN)
    xproj_scr[...] = jnp.dot(onehot, xtab_ref[...],
                             preferred_element_type=jnp.float32)

    def cell(t, h_prev):
        r = pl.multiple_of(t * B, B)              # sublane-aligned row window
        ch0 = xproj_scr[pl.ds(r, B), :] + jnp.dot(
            h_prev, w0h_ref[...], preferred_element_type=jnp.float32)
        # TODO(synk): verify 64-lane c/h half-vreg slices lower to XLU (not VPU
        # relayout copies) in a bundle dump; NHID=64 states are inherently half-wide.
        c0 = jax.nn.sigmoid(ch0[:, :NHID])
        h0v = jnp.tanh(ch0[:, NHID:])
        states = [h_prev + c0 * (h0v - h_prev)]   # states[0] = s0
        for pred, idxs in GROUPS:
            s_prev = states[pred]
            lo, hi = idxs[0] * h2, (idxs[-1] + 1) * h2
            # one matmul per group (256-wide when two steps share a predecessor)
            ch = jnp.dot(s_prev, ws_ref[:, lo:hi],
                         preferred_element_type=jnp.float32)
            for j, i in enumerate(idxs):
                name = GENOTYPE.recurrent[i][0]
                c = jax.nn.sigmoid(ch[:, j * h2:j * h2 + NHID])
                hv = _ACT[name](ch[:, j * h2 + NHID:(j + 1) * h2])
                states.append(s_prev + c * (hv - s_prev))
        out = states[GENOTYPE.concat[0]]
        for idx in GENOTYPE.concat[1:]:
            out = out + states[idx]
        out = out * jnp.float32(1.0 / len(GENOTYPE.concat))
        hid_scr[pl.ds(r, B), :] = out             # stays VMEM-resident for the heads
        return out

    # ---- sequential recurrence: fori_loop bounds live ranges, unroll=True keeps
    # ---- the short fixed trip-count visible to the LLO scheduler ----
    h_last = lax.fori_loop(0, T, cell, h0_ref[...], unroll=True)
    hlast_ref[...] = h_last

    # ---- fused decoder + IBO heads: one (T*B, H) @ (H, NTOKEN+NTAG_PAD) matmul ----
    hiddens = hid_scr[...]
    logits = jnp.dot(hiddens, heads_w_ref[...],
                     preferred_element_type=jnp.float32) + heads_b_ref[...]

    def log_softmax(z):
        m = jnp.max(z, axis=-1, keepdims=True)
        sh = z - m
        return sh - jnp.log(jnp.sum(jnp.exp(sh), axis=-1, keepdims=True))

    logp_ref[...] = log_softmax(logits[:, :NTOKEN])
    ibo_ref[...] = log_softmax(logits[:, NTOKEN:])   # lane-dense padded IBO output


# ------------------------------- wrappers -----------------------------------


def _vmem_spec():
    return pl.BlockSpec(memory_space=pltpu.MemorySpace.VMEM)


def fused_forward(tok_flat, h0, kp):
    tb = tok_flat.shape[0]
    return pl.pallas_call(
        rnn_fused_kernel,
        out_shape=(
            jax.ShapeDtypeStruct((tb, NTOKEN), jnp.float32),
            jax.ShapeDtypeStruct((tb, NTAG_PAD), jnp.float32),
            jax.ShapeDtypeStruct((B, NHID), jnp.float32),
        ),
        in_specs=[_vmem_spec() for _ in range(7)],
        out_specs=(_vmem_spec(), _vmem_spec(), _vmem_spec()),
        scratch_shapes=[
            pltpu.VMEM((tb, 2 * NHID), jnp.float32),   # token->xproj for all timesteps
            pltpu.VMEM((tb, NHID), jnp.float32),       # hidden states, all timesteps
        ],
    )(tok_flat, h0, kp["xproj_table"], kp["w0h"], kp["ws_cat"],
      kp["heads_w"], kp["heads_b"])


def prepare_params(params):
    """One-time re-layout of torch-style params into kernel-friendly buffers."""
    enc_w = params["encoder_weight"]                     # (NTOKEN, NINP), tied decoder
    w0 = params["W0"]                                    # (NINP+NHID, 2H)
    ws_cat = jnp.concatenate([params["Ws"][i] for i in range(STEPS)], axis=1)
    # token -> x-projection table: folds the embedding gather into the kernel.
    xproj_table = jnp.dot(enc_w, w0[:NINP],
                          preferred_element_type=jnp.float32)   # (NTOKEN, 2H)
    dec_wt = enc_w.T                                     # (NINP, NTOKEN), pre-transposed
    dec_b = params["decoder_bias"].reshape(1, NTOKEN)
    ibo_wt = jnp.zeros((NHID, NTAG_PAD), jnp.float32).at[:, :NTAG].set(
        params["ibo_weight"].T)
    ibo_b = jnp.full((1, NTAG_PAD), NEG_BIG, jnp.float32).at[0, :NTAG].set(
        params["ibo_bias"])
    return {
        "xproj_table": xproj_table,                      # (NTOKEN, 2H)
        "w0h": w0[NINP:],                                # h-projection weights
        "ws_cat": ws_cat,                                # (NHID, STEPS*2*NHID)
        "heads_w": jnp.concatenate([dec_wt, ibo_wt], axis=1),   # (NHID, NTOKEN+NTAG_PAD)
        "heads_b": jnp.concatenate([dec_b, ibo_b], axis=1),     # (1, NTOKEN+NTAG_PAD)
    }


@jax.jit
def rnn_model_forward(kparams, tokens, hidden):
    """Eval-mode forward of RNNModel (all dropouts are identity at eval)."""
    t, b = tokens.shape
    # Tokens go straight into the kernel; the embedding gather happens on the MXU.
    tok_flat = tokens.reshape(t * b, 1).astype(jnp.int32)
    logp, ibo_pad, h_last = fused_forward(tok_flat, hidden[0][0], kparams)
    model_output = logp.reshape(t, b, NTOKEN)
    ibo_log_prob = ibo_pad[:, :NTAG].reshape(t, b, NTAG)
    return model_output, ibo_log_prob, [h_last[None]]


# ----------------------------- reference (JAX) -------------------------------


def _ref_cell(x, h_prev, w0, ws):
    xh = jnp.concatenate([x, h_prev], axis=-1)
    ch0 = xh @ w0
    c0 = jax.nn.sigmoid(ch0[:, :NHID])
    h0v = jnp.tanh(ch0[:, NHID:])
    states = [h_prev + c0 * (h0v - h_prev)]
    for i, (name, pred) in enumerate(GENOTYPE.recurrent):
        s_prev = states[pred]
        ch = s_prev @ ws[i]
        c = jax.nn.sigmoid(ch[:, :NHID])
        h = _ACT[name](ch[:, NHID:])
        states.append(s_prev + c * (h - s_prev))
    stacked = jnp.stack([states[i] for i in GENOTYPE.concat], -1)
    return jnp.mean(stacked, -1)


def _ref_forward(params, tokens, hidden):
    enc_w = params["encoder_weight"]
    emb = jnp.take(enc_w, tokens, axis=0)
    h = hidden[0][0]
    outs = []
    for step in range(tokens.shape[0]):
        h = _ref_cell(emb[step], h, params["W0"], params["Ws"])
        outs.append(h)
    hiddens = jnp.stack(outs)
    flat = hiddens.reshape(-1, NHID)

    def lsm(z):
        z = z - jnp.max(z, -1, keepdims=True)
        return z - jnp.log(jnp.sum(jnp.exp(z), -1, keepdims=True))

    lp = lsm(flat @ enc_w.T + params["decoder_bias"]).reshape(-1, tokens.shape[1], NTOKEN)
    ibo = lsm(flat @ params["ibo_weight"].T + params["ibo_bias"]).reshape(-1, tokens.shape[1], NTAG)
    return lp, ibo, [hiddens[-1][None]]


# --------------------------------- main --------------------------------------

if __name__ == "__main__":
    key = jax.random.PRNGKey(0)
    k_enc, k_w0, k_ws, k_ibo_w, k_ibo_b, k_tok = jax.random.split(key, 6)

    params = {
        # encoder/decoder weights are tied in the torch model.
        "encoder_weight": jax.random.uniform(
            k_enc, (NTOKEN, NINP), jnp.float32, -INITRANGE, INITRANGE),
        "decoder_bias": jnp.zeros((NTOKEN,), jnp.float32),
        "W0": jax.random.uniform(
            k_w0, (NINP + NHID, 2 * NHID), jnp.float32, -INITRANGE, INITRANGE),
        "Ws": jax.random.uniform(
            k_ws, (STEPS, NHID, 2 * NHID), jnp.float32, -INITRANGE, INITRANGE),
        # nn.Linear default init: U(-1/sqrt(fan_in), 1/sqrt(fan_in))
        "ibo_weight": jax.random.uniform(
            k_ibo_w, (NTAG, NHID), jnp.float32, -1.0 / NHID ** 0.5, 1.0 / NHID ** 0.5),
        "ibo_bias": jax.random.uniform(
            k_ibo_b, (NTAG,), jnp.float32, -1.0 / NHID ** 0.5, 1.0 / NHID ** 0.5),
    }

    tokens = jax.random.randint(k_tok, (T, B), 0, NTOKEN, dtype=jnp.int32)
    hidden0 = [jnp.zeros((1, B, NHID), jnp.float32)]   # init_hidden

    kparams = prepare_params(params)                   # one-time weight re-layout
    model_output, ibo_log_prob, new_hidden = rnn_model_forward(kparams, tokens, hidden0)
    jax.block_until_ready((model_output, ibo_log_prob, new_hidden[0]))

    # Sanity-check against a pure-JAX reference of the same eval-mode forward.
    ref_lp, ref_ibo, ref_hid = _ref_forward(params, tokens, hidden0)
    assert model_output.shape == (T, B, NTOKEN)
    assert ibo_log_prob.shape == (T, B, NTAG)
    assert new_hidden[0].shape == (1, B, NHID)
    assert jnp.allclose(model_output, ref_lp, atol=5e-3, rtol=5e-3)
    assert jnp.allclose(ibo_log_prob, ref_ibo, atol=5e-3, rtol=5e-3)
    assert jnp.allclose(new_hidden[0], ref_hid[0], atol=5e-3, rtol=5e-3)

    print("KERNEL_OK")
</pallas_src>

<mosaic_0001>
module attributes {stable_mosaic.version = 11 : i64} {
  func.func @rnn_fused_kernel(%arg0: memref<64x1xi32, #tpu.memory_space<vmem>>, %arg1: memref<8x64xf32, #tpu.memory_space<vmem>>, %arg2: memref<128x128xf32, #tpu.memory_space<vmem>>, %arg3: memref<64x128xf32, #tpu.memory_space<vmem>>, %arg4: memref<64x512xf32, #tpu.memory_space<vmem>>, %arg5: memref<64x256xf32, #tpu.memory_space<vmem>>, %arg6: memref<1x256xf32, #tpu.memory_space<vmem>>, %arg7: memref<64x128xf32, #tpu.memory_space<vmem>>, %arg8: memref<64x128xf32, #tpu.memory_space<vmem>>, %arg9: memref<8x64xf32, #tpu.memory_space<vmem>>, %arg10: memref<64x128xf32, #tpu.memory_space<vmem>>, %arg11: memref<64x64xf32, #tpu.memory_space<vmem>>) attributes {dimension_semantics = [], scalar_prefetch = 0 : i64, scratch_operands = 2 : i64, tpu.core_type = #tpu.core_type<tc>} {
    %c0 = arith.constant 0 : index
    %c0_0 = arith.constant 0 : index
    %0 = vector.load %arg0[%c0, %c0_0] : memref<64x1xi32, #tpu.memory_space<vmem>>, vector<64x1xi32>
    %1 = tpu.iota {dimensions = array<i32: 1>} : vector<64x128xi32>
    %2 = vector.broadcast %0 : vector<64x1xi32> to vector<64x128xi32>
    %3 = arith.cmpi eq, %1, %2 : vector<64x128xi32>
    %4 = arith.extui %3 : vector<64x128xi1> to vector<64x128xi32>
    %5 = arith.sitofp %4 : vector<64x128xi32> to vector<64x128xf32>
    %c0_1 = arith.constant 0 : index
    %c0_2 = arith.constant 0 : index
    %6 = vector.load %arg2[%c0_1, %c0_2] : memref<128x128xf32, #tpu.memory_space<vmem>>, vector<128x128xf32>
    %cst = arith.constant dense<0.000000e+00> : vector<64x128xf32>
    %7 = tpu.matmul %5, %6, %cst {dimension_numbers = #tpu.dot_dimension_numbers<[1], [0], [0], [1], [0, 0, 1, 1], [], []>} : vector<64x128xf32>, vector<128x128xf32>, vector<64x128xf32> -> vector<64x128xf32>
    %c0_3 = arith.constant 0 : index
    %c0_4 = arith.constant 0 : index
    %8 = vector.load %arg10[%c0_3, %c0_4] : memref<64x128xf32, #tpu.memory_space<vmem>>, vector<64x128xf32>
    tpu.vector_store %arg10[%c0_3, %c0_4], %7 {strides = array<i32>} : memref<64x128xf32, #tpu.memory_space<vmem>>, vector<64x128xf32>,
    %c0_5 = arith.constant 0 : index
    %c0_6 = arith.constant 0 : index
    %9 = vector.load %arg1[%c0_5, %c0_6] : memref<8x64xf32, #tpu.memory_space<vmem>>, vector<8x64xf32>
    %c0_i32 = arith.constant 0 : i32
    %c8_i32 = arith.constant 8 : i32
    %10 = arith.muli %c0_i32, %c8_i32 : i32
    %11 = tpu.assume_multiple %10, 8 : i32
    %12 = arith.index_cast %11 : i32 to index
    %c0_7 = arith.constant 0 : index
    %13 = vector.load %arg10[%12, %c0_7] : memref<64x128xf32, #tpu.memory_space<vmem>>, vector<8x128xf32>
    %c0_8 = arith.constant 0 : index
    %c0_9 = arith.constant 0 : index
    %14 = vector.load %arg3[%c0_8, %c0_9] : memref<64x128xf32, #tpu.memory_space<vmem>>, vector<64x128xf32>
    %cst_10 = arith.constant dense<0.000000e+00> : vector<8x128xf32>
    %15 = tpu.matmul %9, %14, %cst_10 {dimension_numbers = #tpu.dot_dimension_numbers<[1], [0], [0], [1], [0, 0, 1, 1], [], []>} : vector<8x64xf32>, vector<64x128xf32>, vector<8x128xf32> -> vector<8x128xf32>
    %16 = arith.addf %13, %15 : vector<8x128xf32>
    %17 = vector.extract_strided_slice %16 {offsets = [0, 0], sizes = [8, 64], strides = [1, 1]} : vector<8x128xf32> to vector<8x64xf32>
    %18 = arith.negf %17 : vector<8x64xf32>
    %19 = math.exp %18 : vector<8x64xf32>
    %cst_11 = arith.constant 1.000000e+00 : f32
    %20 = vector.broadcast %cst_11 : f32 to vector<8x64xf32>
    %21 = arith.addf %20, %19 : vector<8x64xf32>
    %22 = arith.divf %20, %21 : vector<8x64xf32>
    %23 = vector.extract_strided_slice %16 {offsets = [0, 64], sizes = [8, 64], strides = [1, 1]} : vector<8x128xf32> to vector<8x64xf32>
    %24 = math.tanh %23 : vector<8x64xf32>
    %25 = arith.subf %24, %9 : vector<8x64xf32>
    %26 = arith.mulf %22, %25 : vector<8x64xf32>
    %27 = arith.addf %9, %26 : vector<8x64xf32>
    %c0_12 = arith.constant 0 : index
    %c0_13 = arith.constant 0 : index
    %28 = vector.load %arg4[%c0_12, %c0_13] : memref<64x512xf32, #tpu.memory_space<vmem>>, vector<64x128xf32>
    %cst_14 = arith.constant dense<0.000000e+00> : vector<8x128xf32>
    %29 = tpu.matmul %27, %28, %cst_14 {dimension_numbers = #tpu.dot_dimension_numbers<[1], [0], [0], [1], [0, 0, 1, 1], [], []>} : vector<8x64xf32>, vector<64x128xf32>, vector<8x128xf32> -> vector<8x128xf32>
    %30 = vector.extract_strided_slice %29 {offsets = [0, 0], sizes = [8, 64], strides = [1, 1]} : vector<8x128xf32> to vector<8x64xf32>
    %31 = arith.negf %30 : vector<8x64xf32>
    %32 = math.exp %31 : vector<8x64xf32>
    %cst_15 = arith.constant 1.000000e+00 : f32
    %33 = vector.broadcast %cst_15 : f32 to vector<8x64xf32>
    %34 = arith.addf %33, %32 : vector<8x64xf32>
    %35 = arith.divf %33, %34 : vector<8x64xf32>
    %36 = vector.extract_strided_slice %29 {offsets = [0, 64], sizes = [8, 64], strides = [1, 1]} : vector<8x128xf32> to vector<8x64xf32>
    %37 = math.tanh %36 : vector<8x64xf32>
    %38 = arith.subf %37, %27 : vector<8x64xf32>
    %39 = arith.mulf %35, %38 : vector<8x64xf32>
    %40 = arith.addf %27, %39 : vector<8x64xf32>
    %c0_16 = arith.constant 0 : index
    %c128 = arith.constant 128 : index
    %41 = vector.load %arg4[%c0_16, %c128] : memref<64x512xf32, #tpu.memory_space<vmem>>, vector<64x256xf32>
    %cst_17 = arith.constant dense<0.000000e+00> : vector<8x256xf32>
    %42 = tpu.matmul %40, %41, %cst_17 {dimension_numbers = #tpu.dot_dimension_numbers<[1], [0], [0], [1], [0, 0, 1, 1], [], []>} : vector<8x64xf32>, vector<64x256xf32>, vector<8x256xf32> -> vector<8x256xf32>
    %43 = vector.extract_strided_slice %42 {offsets = [0, 0], sizes = [8, 64], strides = [1, 1]} : vector<8x256xf32> to vector<8x64xf32>
    %44 = arith.negf %43 : vector<8x64xf32>
    %45 = math.exp %44 : vector<8x64xf32>
    %cst_18 = arith.constant 1.000000e+00 : f32
    %46 = vector.broadcast %cst_18 : f32 to vector<8x64xf32>
    %47 = arith.addf %46, %45 : vector<8x64xf32>
    %48 = arith.divf %46, %47 : vector<8x64xf32>
    %49 = vector.extract_strided_slice %42 {offsets = [0, 64], sizes = [8, 64], strides = [1, 1]} : vector<8x256xf32> to vector<8x64xf32>
    %cst_19 = arith.constant 0.000000e+00 : f32
    %50 = vector.broadcast %cst_19 : f32 to vector<8x64xf32>
    %51 = arith.maximumf %49, %50 : vector<8x64xf32>
    %52 = arith.subf %51, %40 : vector<8x64xf32>
    %53 = arith.mulf %48, %52 : vector<8x64xf32>
    %54 = arith.addf %40, %53 : vector<8x64xf32>
    %55 = vector.extract_strided_slice %42 {offsets = [0, 128], sizes = [8, 64], strides = [1, 1]} : vector<8x256xf32> to vector<8x64xf32>
    %56 = arith.negf %55 : vector<8x64xf32>
    %57 = math.exp %56 : vector<8x64xf32>
    %cst_20 = arith.constant 1.000000e+00 : f32
    %58 = vector.broadcast %cst_20 : f32 to vector<8x64xf32>
    %59 = arith.addf %58, %57 : vector<8x64xf32>
    %60 = arith.divf %58, %59 : vector<8x64xf32>
    %61 = vector.extract_strided_slice %42 {offsets = [0, 192], sizes = [8, 64], strides = [1, 1]} : vector<8x256xf32> to vector<8x64xf32>
    %62 = arith.negf %61 : vector<8x64xf32>
    %63 = math.exp %62 : vector<8x64xf32>
    %cst_21 = arith.constant 1.000000e+00 : f32
    %64 = vector.broadcast %cst_21 : f32 to vector<8x64xf32>
    %65 = arith.addf %64, %63 : vector<8x64xf32>
    %66 = arith.divf %64, %65 : vector<8x64xf32>
    %67 = arith.subf %66, %40 : vector<8x64xf32>
    %68 = arith.mulf %60, %67 : vector<8x64xf32>
    %69 = arith.addf %40, %68 : vector<8x64xf32>
    %c0_22 = arith.constant 0 : index
    %c384 = arith.constant 384 : index
    %70 = vector.load %arg4[%c0_22, %c384] : memref<64x512xf32, #tpu.memory_space<vmem>>, vector<64x128xf32>
    %cst_23 = arith.constant dense<0.000000e+00> : vector<8x128xf32>
    %71 = tpu.matmul %54, %70, %cst_23 {dimension_numbers = #tpu.dot_dimension_numbers<[1], [0], [0], [1], [0, 0, 1, 1], [], []>} : vector<8x64xf32>, vector<64x128xf32>, vector<8x128xf32> -> vector<8x128xf32>
    %72 = vector.extract_strided_slice %71 {offsets = [0, 0], sizes = [8, 64], strides = [1, 1]} : vector<8x128xf32> to vector<8x64xf32>
    %73 = arith.negf %72 : vector<8x64xf32>
    %74 = math.exp %73 : vector<8x64xf32>
    %cst_24 = arith.constant 1.000000e+00 : f32
    %75 = vector.broadcast %cst_24 : f32 to vector<8x64xf32>
    %76 = arith.addf %75, %74 : vector<8x64xf32>
    %77 = arith.divf %75, %76 : vector<8x64xf32>
    %78 = vector.extract_strided_slice %71 {offsets = [0, 64], sizes = [8, 64], strides = [1, 1]} : vector<8x128xf32> to vector<8x64xf32>
    %79 = arith.subf %78, %54 : vector<8x64xf32>
    %80 = arith.mulf %77, %79 : vector<8x64xf32>
    %81 = arith.addf %54, %80 : vector<8x64xf32>
    %82 = arith.addf %40, %54 : vector<8x64xf32>
    %83 = arith.addf %82, %69 : vector<8x64xf32>
    %84 = arith.addf %83, %81 : vector<8x64xf32>
    %cst_25 = arith.constant 2.500000e-01 : f32
    %85 = vector.broadcast %cst_25 : f32 to vector<8x64xf32>
    %86 = arith.mulf %84, %85 : vector<8x64xf32>
    %87 = arith.index_cast %11 : i32 to index
    %c0_26 = arith.constant 0 : index
    %88 = vector.load %arg11[%87, %c0_26] : memref<64x64xf32, #tpu.memory_space<vmem>>, vector<8x64xf32>
    tpu.vector_store %arg11[%87, %c0_26], %86 {strides = array<i32>} : memref<64x64xf32, #tpu.memory_space<vmem>>, vector<8x64xf32>,
    %c1_i32 = arith.constant 1 : i32
    %c8_i32_27 = arith.constant 8 : i32
    %89 = arith.muli %c1_i32, %c8_i32_27 : i32
    %90 = tpu.assume_multiple %89, 8 : i32
    %91 = arith.index_cast %90 : i32 to index
    %c0_28 = arith.constant 0 : index
    %92 = vector.load %arg10[%91, %c0_28] : memref<64x128xf32, #tpu.memory_space<vmem>>, vector<8x128xf32>
    %c0_29 = arith.constant 0 : index
    %c0_30 = arith.constant 0 : index
    %93 = vector.load %arg3[%c0_29, %c0_30] : memref<64x128xf32, #tpu.memory_space<vmem>>, vector<64x128xf32>
    %cst_31 = arith.constant dense<0.000000e+00> : vector<8x128xf32>
    %94 = tpu.matmul %86, %93, %cst_31 {dimension_numbers = #tpu.dot_dimension_numbers<[1], [0], [0], [1], [0, 0, 1, 1], [], []>} : vector<8x64xf32>, vector<64x128xf32>, vector<8x128xf32> -> vector<8x128xf32>
    %95 = arith.addf %92, %94 : vector<8x128xf32>
    %96 = vector.extract_strided_slice %95 {offsets = [0, 0], sizes = [8, 64], strides = [1, 1]} : vector<8x128xf32> to vector<8x64xf32>
    %97 = arith.negf %96 : vector<8x64xf32>
    %98 = math.exp %97 : vector<8x64xf32>
    %cst_32 = arith.constant 1.000000e+00 : f32
    %99 = vector.broadcast %cst_32 : f32 to vector<8x64xf32>
    %100 = arith.addf %99, %98 : vector<8x64xf32>
    %101 = arith.divf %99, %100 : vector<8x64xf32>
    %102 = vector.extract_strided_slice %95 {offsets = [0, 64], sizes = [8, 64], strides = [1, 1]} : vector<8x128xf32> to vector<8x64xf32>
    %103 = math.tanh %102 : vector<8x64xf32>
    %104 = arith.subf %103, %86 : vector<8x64xf32>
    %105 = arith.mulf %101, %104 : vector<8x64xf32>
    %106 = arith.addf %86, %105 : vector<8x64xf32>
    %c0_33 = arith.constant 0 : index
    %c0_34 = arith.constant 0 : index
    %107 = vector.load %arg4[%c0_33, %c0_34] : memref<64x512xf32, #tpu.memory_space<vmem>>, vector<64x128xf32>
    %cst_35 = arith.constant dense<0.000000e+00> : vector<8x128xf32>
    %108 = tpu.matmul %106, %107, %cst_35 {dimension_numbers = #tpu.dot_dimension_numbers<[1], [0], [0], [1], [0, 0, 1, 1], [], []>} : vector<8x64xf32>, vector<64x128xf32>, vector<8x128xf32> -> vector<8x128xf32>
    %109 = vector.extract_strided_slice %108 {offsets = [0, 0], sizes = [8, 64], strides = [1, 1]} : vector<8x128xf32> to vector<8x64xf32>
    %110 = arith.negf %109 : vector<8x64xf32>
    %111 = math.exp %110 : vector<8x64xf32>
    %cst_36 = arith.constant 1.000000e+00 : f32
    %112 = vector.broadcast %cst_36 : f32 to vector<8x64xf32>
    %113 = arith.addf %112, %111 : vector<8x64xf32>
    %114 = arith.divf %112, %113 : vector<8x64xf32>
    %115 = vector.extract_strided_slice %108 {offsets = [0, 64], sizes = [8, 64], strides = [1, 1]} : vector<8x128xf32> to vector<8x64xf32>
    %116 = math.tanh %115 : vector<8x64xf32>
    %117 = arith.subf %116, %106 : vector<8x64xf32>
    %118 = arith.mulf %114, %117 : vector<8x64xf32>
    %119 = arith.addf %106, %118 : vector<8x64xf32>
    %c0_37 = arith.constant 0 : index
    %c128_38 = arith.constant 128 : index
    %120 = vector.load %arg4[%c0_37, %c128_38] : memref<64x512xf32, #tpu.memory_space<vmem>>, vector<64x256xf32>
    %cst_39 = arith.constant dense<0.000000e+00> : vector<8x256xf32>
    %121 = tpu.matmul %119, %120, %cst_39 {dimension_numbers = #tpu.dot_dimension_numbers<[1], [0], [0], [1], [0, 0, 1, 1], [], []>} : vector<8x64xf32>, vector<64x256xf32>, vector<8x256xf32> -> vector<8x256xf32>
    %122 = vector.extract_strided_slice %121 {offsets = [0, 0], sizes = [8, 64], strides = [1, 1]} : vector<8x256xf32> to vector<8x64xf32>
    %123 = arith.negf %122 : vector<8x64xf32>
    %124 = math.exp %123 : vector<8x64xf32>
    %cst_40 = arith.constant 1.000000e+00 : f32
    %125 = vector.broadcast %cst_40 : f32 to vector<8x64xf32>
    %126 = arith.addf %125, %124 : vector<8x64xf32>
    %127 = arith.divf %125, %126 : vector<8x64xf32>
    %128 = vector.extract_strided_slice %121 {offsets = [0, 64], sizes = [8, 64], strides = [1, 1]} : vector<8x256xf32> to vector<8x64xf32>
    %cst_41 = arith.constant 0.000000e+00 : f32
    %129 = vector.broadcast %cst_41 : f32 to vector<8x64xf32>
    %130 = arith.maximumf %128, %129 : vector<8x64xf32>
    %131 = arith.subf %130, %119 : vector<8x64xf32>
    %132 = arith.mulf %127, %131 : vector<8x64xf32>
    %133 = arith.addf %119, %132 : vector<8x64xf32>
    %134 = vector.extract_strided_slice %121 {offsets = [0, 128], sizes = [8, 64], strides = [1, 1]} : vector<8x256xf32> to vector<8x64xf32>
    %135 = arith.negf %134 : vector<8x64xf32>
    %136 = math.exp %135 : vector<8x64xf32>
    %cst_42 = arith.constant 1.000000e+00 : f32
    %137 = vector.broadcast %cst_42 : f32 to vector<8x64xf32>
    %138 = arith.addf %137, %136 : vector<8x64xf32>
    %139 = arith.divf %137, %138 : vector<8x64xf32>
    %140 = vector.extract_strided_slice %121 {offsets = [0, 192], sizes = [8, 64], strides = [1, 1]} : vector<8x256xf32> to vector<8x64xf32>
    %141 = arith.negf %140 : vector<8x64xf32>
    %142 = math.exp %141 : vector<8x64xf32>
    %cst_43 = arith.constant 1.000000e+00 : f32
    %143 = vector.broadcast %cst_43 : f32 to vector<8x64xf32>
    %144 = arith.addf %143, %142 : vector<8x64xf32>
    %145 = arith.divf %143, %144 : vector<8x64xf32>
    %146 = arith.subf %145, %119 : vector<8x64xf32>
    %147 = arith.mulf %139, %146 : vector<8x64xf32>
    %148 = arith.addf %119, %147 : vector<8x64xf32>
    %c0_44 = arith.constant 0 : index
    %c384_45 = arith.constant 384 : index
    %149 = vector.load %arg4[%c0_44, %c384_45] : memref<64x512xf32, #tpu.memory_space<vmem>>, vector<64x128xf32>
    %cst_46 = arith.constant dense<0.000000e+00> : vector<8x128xf32>
    %150 = tpu.matmul %133, %149, %cst_46 {dimension_numbers = #tpu.dot_dimension_numbers<[1], [0], [0], [1], [0, 0, 1, 1], [], []>} : vector<8x64xf32>, vector<64x128xf32>, vector<8x128xf32> -> vector<8x128xf32>
    %151 = vector.extract_strided_slice %150 {offsets = [0, 0], sizes = [8, 64], strides = [1, 1]} : vector<8x128xf32> to vector<8x64xf32>
    %152 = arith.negf %151 : vector<8x64xf32>
    %153 = math.exp %152 : vector<8x64xf32>
    %cst_47 = arith.constant 1.000000e+00 : f32
    %154 = vector.broadcast %cst_47 : f32 to vector<8x64xf32>
    %155 = arith.addf %154, %153 : vector<8x64xf32>
    %156 = arith.divf %154, %155 : vector<8x64xf32>
    %157 = vector.extract_strided_slice %150 {offsets = [0, 64], sizes = [8, 64], strides = [1, 1]} : vector<8x128xf32> to vector<8x64xf32>
    %158 = arith.subf %157, %133 : vector<8x64xf32>
    %159 = arith.mulf %156, %158 : vector<8x64xf32>
    %160 = arith.addf %133, %159 : vector<8x64xf32>
    %161 = arith.addf %119, %133 : vector<8x64xf32>
    %162 = arith.addf %161, %148 : vector<8x64xf32>
    %163 = arith.addf %162, %160 : vector<8x64xf32>
    %cst_48 = arith.constant 2.500000e-01 : f32
    %164 = vector.broadcast %cst_48 : f32 to vector<8x64xf32>
    %165 = arith.mulf %163, %164 : vector<8x64xf32>
    %166 = arith.index_cast %90 : i32 to index
    %c0_49 = arith.constant 0 : index
    %167 = vector.load %arg11[%166, %c0_49] : memref<64x64xf32, #tpu.memory_space<vmem>>, vector<8x64xf32>
    tpu.vector_store %arg11[%166, %c0_49], %165 {strides = array<i32>} : memref<64x64xf32, #tpu.memory_space<vmem>>, vector<8x64xf32>,
    %c2_i32 = arith.constant 2 : i32
    %c8_i32_50 = arith.constant 8 : i32
    %168 = arith.muli %c2_i32, %c8_i32_50 : i32
    %169 = tpu.assume_multiple %168, 8 : i32
    %170 = arith.index_cast %169 : i32 to index
    %c0_51 = arith.constant 0 : index
    %171 = vector.load %arg10[%170, %c0_51] : memref<64x128xf32, #tpu.memory_space<vmem>>, vector<8x128xf32>
    %c0_52 = arith.constant 0 : index
    %c0_53 = arith.constant 0 : index
    %172 = vector.load %arg3[%c0_52, %c0_53] : memref<64x128xf32, #tpu.memory_space<vmem>>, vector<64x128xf32>
    %cst_54 = arith.constant dense<0.000000e+00> : vector<8x128xf32>
    %173 = tpu.matmul %165, %172, %cst_54 {dimension_numbers = #tpu.dot_dimension_numbers<[1], [0], [0], [1], [0, 0, 1, 1], [], []>} : vector<8x64xf32>, vector<64x128xf32>, vector<8x128xf32> -> vector<8x128xf32>
    %174 = arith.addf %171, %173 : vector<8x128xf32>
    %175 = vector.extract_strided_slice %174 {offsets = [0, 0], sizes = [8, 64], strides = [1, 1]} : vector<8x128xf32> to vector<8x64xf32>
    %176 = arith.negf %175 : vector<8x64xf32>
    %177 = math.exp %176 : vector<8x64xf32>
    %cst_55 = arith.constant 1.000000e+00 : f32
    %178 = vector.broadcast %cst_55 : f32 to vector<8x64xf32>
    %179 = arith.addf %178, %177 : vector<8x64xf32>
    %180 = arith.divf %178, %179 : vector<8x64xf32>
    %181 = vector.extract_strided_slice %174 {offsets = [0, 64], sizes = [8, 64], strides = [1, 1]} : vector<8x128xf32> to vector<8x64xf32>
    %182 = math.tanh %181 : vector<8x64xf32>
    %183 = arith.subf %182, %165 : vector<8x64xf32>
    %184 = arith.mulf %180, %183 : vector<8x64xf32>
    %185 = arith.addf %165, %184 : vector<8x64xf32>
    %c0_56 = arith.constant 0 : index
    %c0_57 = arith.constant 0 : index
    %186 = vector.load %arg4[%c0_56, %c0_57] : memref<64x512xf32, #tpu.memory_space<vmem>>, vector<64x128xf32>
    %cst_58 = arith.constant dense<0.000000e+00> : vector<8x128xf32>
    %187 = tpu.matmul %185, %186, %cst_58 {dimension_numbers = #tpu.dot_dimension_numbers<[1], [0], [0], [1], [0, 0, 1, 1], [], []>} : vector<8x64xf32>, vector<64x128xf32>, vector<8x128xf32> -> vector<8x128xf32>
    %188 = vector.extract_strided_slice %187 {offsets = [0, 0], sizes = [8, 64], strides = [1, 1]} : vector<8x128xf32> to vector<8x64xf32>
    %189 = arith.negf %188 : vector<8x64xf32>
    %190 = math.exp %189 : vector<8x64xf32>
    %cst_59 = arith.constant 1.000000e+00 : f32
    %191 = vector.broadcast %cst_59 : f32 to vector<8x64xf32>
    %192 = arith.addf %191, %190 : vector<8x64xf32>
    %193 = arith.divf %191, %192 : vector<8x64xf32>
    %194 = vector.extract_strided_slice %187 {offsets = [0, 64], sizes = [8, 64], strides = [1, 1]} : vector<8x128xf32> to vector<8x64xf32>
    %195 = math.tanh %194 : vector<8x64xf32>
    %196 = arith.subf %195, %185 : vector<8x64xf32>
    %197 = arith.mulf %193, %196 : vector<8x64xf32>
    %198 = arith.addf %185, %197 : vector<8x64xf32>
    %c0_60 = arith.constant 0 : index
    %c128_61 = arith.constant 128 : index
    %199 = vector.load %arg4[%c0_60, %c128_61] : memref<64x512xf32, #tpu.memory_space<vmem>>, vector<64x256xf32>
    %cst_62 = arith.constant dense<0.000000e+00> : vector<8x256xf32>
    %200 = tpu.matmul %198, %199, %cst_62 {dimension_numbers = #tpu.dot_dimension_numbers<[1], [0], [0], [1], [0, 0, 1, 1], [], []>} : vector<8x64xf32>, vector<64x256xf32>, vector<8x256xf32> -> vector<8x256xf32>
    %201 = vector.extract_strided_slice %200 {offsets = [0, 0], sizes = [8, 64], strides = [1, 1]} : vector<8x256xf32> to vector<8x64xf32>
    %202 = arith.negf %201 : vector<8x64xf32>
    %203 = math.exp %202 : vector<8x64xf32>
    %cst_63 = arith.constant 1.000000e+00 : f32
    %204 = vector.broadcast %cst_63 : f32 to vector<8x64xf32>
    %205 = arith.addf %204, %203 : vector<8x64xf32>
    %206 = arith.divf %204, %205 : vector<8x64xf32>
    %207 = vector.extract_strided_slice %200 {offsets = [0, 64], sizes = [8, 64], strides = [1, 1]} : vector<8x256xf32> to vector<8x64xf32>
    %cst_64 = arith.constant 0.000000e+00 : f32
    %208 = vector.broadcast %cst_64 : f32 to vector<8x64xf32>
    %209 = arith.maximumf %207, %208 : vector<8x64xf32>
    %210 = arith.subf %209, %198 : vector<8x64xf32>
    %211 = arith.mulf %206, %210 : vector<8x64xf32>
    %212 = arith.addf %198, %211 : vector<8x64xf32>
    %213 = vector.extract_strided_slice %200 {offsets = [0, 128], sizes = [8, 64], strides = [1, 1]} : vector<8x256xf32> to vector<8x64xf32>
    %214 = arith.negf %213 : vector<8x64xf32>
    %215 = math.exp %214 : vector<8x64xf32>
    %cst_65 = arith.constant 1.000000e+00 : f32
    %216 = vector.broadcast %cst_65 : f32 to vector<8x64xf32>
    %217 = arith.addf %216, %215 : vector<8x64xf32>
    %218 = arith.divf %216, %217 : vector<8x64xf32>
    %219 = vector.extract_strided_slice %200 {offsets = [0, 192], sizes = [8, 64], strides = [1, 1]} : vector<8x256xf32> to vector<8x64xf32>
    %220 = arith.negf %219 : vector<8x64xf32>
    %221 = math.exp %220 : vector<8x64xf32>
    %cst_66 = arith.constant 1.000000e+00 : f32
    %222 = vector.broadcast %cst_66 : f32 to vector<8x64xf32>
    %223 = arith.addf %222, %221 : vector<8x64xf32>
    %224 = arith.divf %222, %223 : vector<8x64xf32>
    %225 = arith.subf %224, %198 : vector<8x64xf32>
    %226 = arith.mulf %218, %225 : vector<8x64xf32>
    %227 = arith.addf %198, %226 : vector<8x64xf32>
    %c0_67 = arith.constant 0 : index
    %c384_68 = arith.constant 384 : index
    %228 = vector.load %arg4[%c0_67, %c384_68] : memref<64x512xf32, #tpu.memory_space<vmem>>, vector<64x128xf32>
    %cst_69 = arith.constant dense<0.000000e+00> : vector<8x128xf32>
    %229 = tpu.matmul %212, %228, %cst_69 {dimension_numbers = #tpu.dot_dimension_numbers<[1], [0], [0], [1], [0, 0, 1, 1], [], []>} : vector<8x64xf32>, vector<64x128xf32>, vector<8x128xf32> -> vector<8x128xf32>
    %230 = vector.extract_strided_slice %229 {offsets = [0, 0], sizes = [8, 64], strides = [1, 1]} : vector<8x128xf32> to vector<8x64xf32>
    %231 = arith.negf %230 : vector<8x64xf32>
    %232 = math.exp %231 : vector<8x64xf32>
    %cst_70 = arith.constant 1.000000e+00 : f32
    %233 = vector.broadcast %cst_70 : f32 to vector<8x64xf32>
    %234 = arith.addf %233, %232 : vector<8x64xf32>
    %235 = arith.divf %233, %234 : vector<8x64xf32>
    %236 = vector.extract_strided_slice %229 {offsets = [0, 64], sizes = [8, 64], strides = [1, 1]} : vector<8x128xf32> to vector<8x64xf32>
    %237 = arith.subf %236, %212 : vector<8x64xf32>
    %238 = arith.mulf %235, %237 : vector<8x64xf32>
    %239 = arith.addf %212, %238 : vector<8x64xf32>
    %240 = arith.addf %198, %212 : vector<8x64xf32>
    %241 = arith.addf %240, %227 : vector<8x64xf32>
    %242 = arith.addf %241, %239 : vector<8x64xf32>
    %cst_71 = arith.constant 2.500000e-01 : f32
    %243 = vector.broadcast %cst_71 : f32 to vector<8x64xf32>
    %244 = arith.mulf %242, %243 : vector<8x64xf32>
    %245 = arith.index_cast %169 : i32 to index
    %c0_72 = arith.constant 0 : index
    %246 = vector.load %arg11[%245, %c0_72] : memref<64x64xf32, #tpu.memory_space<vmem>>, vector<8x64xf32>
    tpu.vector_store %arg11[%245, %c0_72], %244 {strides = array<i32>} : memref<64x64xf32, #tpu.memory_space<vmem>>, vector<8x64xf32>,
    %c3_i32 = arith.constant 3 : i32
    %c8_i32_73 = arith.constant 8 : i32
    %247 = arith.muli %c3_i32, %c8_i32_73 : i32
    %248 = tpu.assume_multiple %247, 8 : i32
    %249 = arith.index_cast %248 : i32 to index
    %c0_74 = arith.constant 0 : index
    %250 = vector.load %arg10[%249, %c0_74] : memref<64x128xf32, #tpu.memory_space<vmem>>, vector<8x128xf32>
    %c0_75 = arith.constant 0 : index
    %c0_76 = arith.constant 0 : index
    %251 = vector.load %arg3[%c0_75, %c0_76] : memref<64x128xf32, #tpu.memory_space<vmem>>, vector<64x128xf32>
    %cst_77 = arith.constant dense<0.000000e+00> : vector<8x128xf32>
    %252 = tpu.matmul %244, %251, %cst_77 {dimension_numbers = #tpu.dot_dimension_numbers<[1], [0], [0], [1], [0, 0, 1, 1], [], []>} : vector<8x64xf32>, vector<64x128xf32>, vector<8x128xf32> -> vector<8x128xf32>
    %253 = arith.addf %250, %252 : vector<8x128xf32>
    %254 = vector.extract_strided_slice %253 {offsets = [0, 0], sizes = [8, 64], strides = [1, 1]} : vector<8x128xf32> to vector<8x64xf32>
    %255 = arith.negf %254 : vector<8x64xf32>
    %256 = math.exp %255 : vector<8x64xf32>
    %cst_78 = arith.constant 1.000000e+00 : f32
    %257 = vector.broadcast %cst_78 : f32 to vector<8x64xf32>
    %258 = arith.addf %257, %256 : vector<8x64xf32>
    %259 = arith.divf %257, %258 : vector<8x64xf32>
    %260 = vector.extract_strided_slice %253 {offsets = [0, 64], sizes = [8, 64], strides = [1, 1]} : vector<8x128xf32> to vector<8x64xf32>
    %261 = math.tanh %260 : vector<8x64xf32>
    %262 = arith.subf %261, %244 : vector<8x64xf32>
    %263 = arith.mulf %259, %262 : vector<8x64xf32>
    %264 = arith.addf %244, %263 : vector<8x64xf32>
    %c0_79 = arith.constant 0 : index
    %c0_80 = arith.constant 0 : index
    %265 = vector.load %arg4[%c0_79, %c0_80] : memref<64x512xf32, #tpu.memory_space<vmem>>, vector<64x128xf32>
    %cst_81 = arith.constant dense<0.000000e+00> : vector<8x128xf32>
    %266 = tpu.matmul %264, %265, %cst_81 {dimension_numbers = #tpu.dot_dimension_numbers<[1], [0], [0], [1], [0, 0, 1, 1], [], []>} : vector<8x64xf32>, vector<64x128xf32>, vector<8x128xf32> -> vector<8x128xf32>
    %267 = vector.extract_strided_slice %266 {offsets = [0, 0], sizes = [8, 64], strides = [1, 1]} : vector<8x128xf32> to vector<8x64xf32>
    %268 = arith.negf %267 : vector<8x64xf32>
    %269 = math.exp %268 : vector<8x64xf32>
    %cst_82 = arith.constant 1.000000e+00 : f32
    %270 = vector.broadcast %cst_82 : f32 to vector<8x64xf32>
    %271 = arith.addf %270, %269 : vector<8x64xf32>
    %272 = arith.divf %270, %271 : vector<8x64xf32>
    %273 = vector.extract_strided_slice %266 {offsets = [0, 64], sizes = [8, 64], strides = [1, 1]} : vector<8x128xf32> to vector<8x64xf32>
    %274 = math.tanh %273 : vector<8x64xf32>
    %275 = arith.subf %274, %264 : vector<8x64xf32>
    %276 = arith.mulf %272, %275 : vector<8x64xf32>
    %277 = arith.addf %264, %276 : vector<8x64xf32>
    %c0_83 = arith.constant 0 : index
    %c128_84 = arith.constant 128 : index
    %278 = vector.load %arg4[%c0_83, %c128_84] : memref<64x512xf32, #tpu.memory_space<vmem>>, vector<64x256xf32>
    %cst_85 = arith.constant dense<0.000000e+00> : vector<8x256xf32>
    %279 = tpu.matmul %277, %278, %cst_85 {dimension_numbers = #tpu.dot_dimension_numbers<[1], [0], [0], [1], [0, 0, 1, 1], [], []>} : vector<8x64xf32>, vector<64x256xf32>, vector<8x256xf32> -> vector<8x256xf32>
    %280 = vector.extract_strided_slice %279 {offsets = [0, 0], sizes = [8, 64], strides = [1, 1]} : vector<8x256xf32> to vector<8x64xf32>
    %281 = arith.negf %280 : vector<8x64xf32>
    %282 = math.exp %281 : vector<8x64xf32>
    %cst_86 = arith.constant 1.000000e+00 : f32
    %283 = vector.broadcast %cst_86 : f32 to vector<8x64xf32>
    %284 = arith.addf %283, %282 : vector<8x64xf32>
    %285 = arith.divf %283, %284 : vector<8x64xf32>
    %286 = vector.extract_strided_slice %279 {offsets = [0, 64], sizes = [8, 64], strides = [1, 1]} : vector<8x256xf32> to vector<8x64xf32>
    %cst_87 = arith.constant 0.000000e+00 : f32
    %287 = vector.broadcast %cst_87 : f32 to vector<8x64xf32>
    %288 = arith.maximumf %286, %287 : vector<8x64xf32>
    %289 = arith.subf %288, %277 : vector<8x64xf32>
    %290 = arith.mulf %285, %289 : vector<8x64xf32>
    %291 = arith.addf %277, %290 : vector<8x64xf32>
    %292 = vector.extract_strided_slice %279 {offsets = [0, 128], sizes = [8, 64], strides = [1, 1]} : vector<8x256xf32> to vector<8x64xf32>
    %293 = arith.negf %292 : vector<8x64xf32>
    %294 = math.exp %293 : vector<8x64xf32>
    %cst_88 = arith.constant 1.000000e+00 : f32
    %295 = vector.broadcast %cst_88 : f32 to vector<8x64xf32>
    %296 = arith.addf %295, %294 : vector<8x64xf32>
    %297 = arith.divf %295, %296 : vector<8x64xf32>
    %298 = vector.extract_strided_slice %279 {offsets = [0, 192], sizes = [8, 64], strides = [1, 1]} : vector<8x256xf32> to vector<8x64xf32>
    %299 = arith.negf %298 : vector<8x64xf32>
    %300 = math.exp %299 : vector<8x64xf32>
    %cst_89 = arith.constant 1.000000e+00 : f32
    %301 = vector.broadcast %cst_89 : f32 to vector<8x64xf32>
    %302 = arith.addf %301, %300 : vector<8x64xf32>
    %303 = arith.divf %301, %302 : vector<8x64xf32>
    %304 = arith.subf %303, %277 : vector<8x64xf32>
    %305 = arith.mulf %297, %304 : vector<8x64xf32>
    %306 = arith.addf %277, %305 : vector<8x64xf32>
    %c0_90 = arith.constant 0 : index
    %c384_91 = arith.constant 384 : index
    %307 = vector.load %arg4[%c0_90, %c384_91] : memref<64x512xf32, #tpu.memory_space<vmem>>, vector<64x128xf32>
    %cst_92 = arith.constant dense<0.000000e+00> : vector<8x128xf32>
    %308 = tpu.matmul %291, %307, %cst_92 {dimension_numbers = #tpu.dot_dimension_numbers<[1], [0], [0], [1], [0, 0, 1, 1], [], []>} : vector<8x64xf32>, vector<64x128xf32>, vector<8x128xf32> -> vector<8x128xf32>
    %309 = vector.extract_strided_slice %308 {offsets = [0, 0], sizes = [8, 64], strides = [1, 1]} : vector<8x128xf32> to vector<8x64xf32>
    %310 = arith.negf %309 : vector<8x64xf32>
    %311 = math.exp %310 : vector<8x64xf32>
    %cst_93 = arith.constant 1.000000e+00 : f32
    %312 = vector.broadcast %cst_93 : f32 to vector<8x64xf32>
    %313 = arith.addf %312, %311 : vector<8x64xf32>
    %314 = arith.divf %312, %313 : vector<8x64xf32>
    %315 = vector.extract_strided_slice %308 {offsets = [0, 64], sizes = [8, 64], strides = [1, 1]} : vector<8x128xf32> to vector<8x64xf32>
    %316 = arith.subf %315, %291 : vector<8x64xf32>
    %317 = arith.mulf %314, %316 : vector<8x64xf32>
    %318 = arith.addf %291, %317 : vector<8x64xf32>
    %319 = arith.addf %277, %291 : vector<8x64xf32>
    %320 = arith.addf %319, %306 : vector<8x64xf32>
    %321 = arith.addf %320, %318 : vector<8x64xf32>
    %cst_94 = arith.constant 2.500000e-01 : f32
    %322 = vector.broadcast %cst_94 : f32 to vector<8x64xf32>
    %323 = arith.mulf %321, %322 : vector<8x64xf32>
    %324 = arith.index_cast %248 : i32 to index
    %c0_95 = arith.constant 0 : index
    %325 = vector.load %arg11[%324, %c0_95] : memref<64x64xf32, #tpu.memory_space<vmem>>, vector<8x64xf32>
    tpu.vector_store %arg11[%324, %c0_95], %323 {strides = array<i32>} : memref<64x64xf32, #tpu.memory_space<vmem>>, vector<8x64xf32>,
    %c4_i32 = arith.constant 4 : i32
    %c8_i32_96 = arith.constant 8 : i32
    %326 = arith.muli %c4_i32, %c8_i32_96 : i32
    %327 = tpu.assume_multiple %326, 8 : i32
    %328 = arith.index_cast %327 : i32 to index
    %c0_97 = arith.constant 0 : index
    %329 = vector.load %arg10[%328, %c0_97] : memref<64x128xf32, #tpu.memory_space<vmem>>, vector<8x128xf32>
    %c0_98 = arith.constant 0 : index
    %c0_99 = arith.constant 0 : index
    %330 = vector.load %arg3[%c0_98, %c0_99] : memref<64x128xf32, #tpu.memory_space<vmem>>, vector<64x128xf32>
    %cst_100 = arith.constant dense<0.000000e+00> : vector<8x128xf32>
    %331 = tpu.matmul %323, %330, %cst_100 {dimension_numbers = #tpu.dot_dimension_numbers<[1], [0], [0], [1], [0, 0, 1, 1], [], []>} : vector<8x64xf32>, vector<64x128xf32>, vector<8x128xf32> -> vector<8x128xf32>
    %332 = arith.addf %329, %331 : vector<8x128xf32>
    %333 = vector.extract_strided_slice %332 {offsets = [0, 0], sizes = [8, 64], strides = [1, 1]} : vector<8x128xf32> to vector<8x64xf32>
    %334 = arith.negf %333 : vector<8x64xf32>
    %335 = math.exp %334 : vector<8x64xf32>
    %cst_101 = arith.constant 1.000000e+00 : f32
    %336 = vector.broadcast %cst_101 : f32 to vector<8x64xf32>
    %337 = arith.addf %336, %335 : vector<8x64xf32>
    %338 = arith.divf %336, %337 : vector<8x64xf32>
    %339 = vector.extract_strided_slice %332 {offsets = [0, 64], sizes = [8, 64], strides = [1, 1]} : vector<8x128xf32> to vector<8x64xf32>
    %340 = math.tanh %339 : vector<8x64xf32>
    %341 = arith.subf %340, %323 : vector<8x64xf32>
    %342 = arith.mulf %338, %341 : vector<8x64xf32>
    %343 = arith.addf %323, %342 : vector<8x64xf32>
    %c0_102 = arith.constant 0 : index
    %c0_103 = arith.constant 0 : index
    %344 = vector.load %arg4[%c0_102, %c0_103] : memref<64x512xf32, #tpu.memory_space<vmem>>, vector<64x128xf32>
    %cst_104 = arith.constant dense<0.000000e+00> : vector<8x128xf32>
    %345 = tpu.matmul %343, %344, %cst_104 {dimension_numbers = #tpu.dot_dimension_numbers<[1], [0], [0], [1], [0, 0, 1, 1], [], []>} : vector<8x64xf32>, vector<64x128xf32>, vector<8x128xf32> -> vector<8x128xf32>
    %346 = vector.extract_strided_slice %345 {offsets = [0, 0], sizes = [8, 64], strides = [1, 1]} : vector<8x128xf32> to vector<8x64xf32>
    %347 = arith.negf %346 : vector<8x64xf32>
    %348 = math.exp %347 : vector<8x64xf32>
    %cst_105 = arith.constant 1.000000e+00 : f32
    %349 = vector.broadcast %cst_105 : f32 to vector<8x64xf32>
    %350 = arith.addf %349, %348 : vector<8x64xf32>
    %351 = arith.divf %349, %350 : vector<8x64xf32>
    %352 = vector.extract_strided_slice %345 {offsets = [0, 64], sizes = [8, 64], strides = [1, 1]} : vector<8x128xf32> to vector<8x64xf32>
    %353 = math.tanh %352 : vector<8x64xf32>
    %354 = arith.subf %353, %343 : vector<8x64xf32>
    %355 = arith.mulf %351, %354 : vector<8x64xf32>
    %356 = arith.addf %343, %355 : vector<8x64xf32>
    %c0_106 = arith.constant 0 : index
    %c128_107 = arith.constant 128 : index
    %357 = vector.load %arg4[%c0_106, %c128_107] : memref<64x512xf32, #tpu.memory_space<vmem>>, vector<64x256xf32>
    %cst_108 = arith.constant dense<0.000000e+00> : vector<8x256xf32>
    %358 = tpu.matmul %356, %357, %cst_108 {dimension_numbers = #tpu.dot_dimension_numbers<[1], [0], [0], [1], [0, 0, 1, 1], [], []>} : vector<8x64xf32>, vector<64x256xf32>, vector<8x256xf32> -> vector<8x256xf32>
    %359 = vector.extract_strided_slice %358 {offsets = [0, 0], sizes = [8, 64], strides = [1, 1]} : vector<8x256xf32> to vector<8x64xf32>
    %360 = arith.negf %359 : vector<8x64xf32>
    %361 = math.exp %360 : vector<8x64xf32>
    %cst_109 = arith.constant 1.000000e+00 : f32
    %362 = vector.broadcast %cst_109 : f32 to vector<8x64xf32>
    %363 = arith.addf %362, %361 : vector<8x64xf32>
    %364 = arith.divf %362, %363 : vector<8x64xf32>
    %365 = vector.extract_strided_slice %358 {offsets = [0, 64], sizes = [8, 64], strides = [1, 1]} : vector<8x256xf32> to vector<8x64xf32>
    %cst_110 = arith.constant 0.000000e+00 : f32
    %366 = vector.broadcast %cst_110 : f32 to vector<8x64xf32>
    %367 = arith.maximumf %365, %366 : vector<8x64xf32>
    %368 = arith.subf %367, %356 : vector<8x64xf32>
    %369 = arith.mulf %364, %368 : vector<8x64xf32>
    %370 = arith.addf %356, %369 : vector<8x64xf32>
    %371 = vector.extract_strided_slice %358 {offsets = [0, 128], sizes = [8, 64], strides = [1, 1]} : vector<8x256xf32> to vector<8x64xf32>
    %372 = arith.negf %371 : vector<8x64xf32>
    %373 = math.exp %372 : vector<8x64xf32>
    %cst_111 = arith.constant 1.000000e+00 : f32
    %374 = vector.broadcast %cst_111 : f32 to vector<8x64xf32>
    %375 = arith.addf %374, %373 : vector<8x64xf32>
    %376 = arith.divf %374, %375 : vector<8x64xf32>
    %377 = vector.extract_strided_slice %358 {offsets = [0, 192], sizes = [8, 64], strides = [1, 1]} : vector<8x256xf32> to vector<8x64xf32>
    %378 = arith.negf %377 : vector<8x64xf32>
    %379 = math.exp %378 : vector<8x64xf32>
    %cst_112 = arith.constant 1.000000e+00 : f32
    %380 = vector.broadcast %cst_112 : f32 to vector<8x64xf32>
    %381 = arith.addf %380, %379 : vector<8x64xf32>
    %382 = arith.divf %380, %381 : vector<8x64xf32>
    %383 = arith.subf %382, %356 : vector<8x64xf32>
    %384 = arith.mulf %376, %383 : vector<8x64xf32>
    %385 = arith.addf %356, %384 : vector<8x64xf32>
    %c0_113 = arith.constant 0 : index
    %c384_114 = arith.constant 384 : index
    %386 = vector.load %arg4[%c0_113, %c384_114] : memref<64x512xf32, #tpu.memory_space<vmem>>, vector<64x128xf32>
    %cst_115 = arith.constant dense<0.000000e+00> : vector<8x128xf32>
    %387 = tpu.matmul %370, %386, %cst_115 {dimension_numbers = #tpu.dot_dimension_numbers<[1], [0], [0], [1], [0, 0, 1, 1], [], []>} : vector<8x64xf32>, vector<64x128xf32>, vector<8x128xf32> -> vector<8x128xf32>
    %388 = vector.extract_strided_slice %387 {offsets = [0, 0], sizes = [8, 64], strides = [1, 1]} : vector<8x128xf32> to vector<8x64xf32>
    %389 = arith.negf %388 : vector<8x64xf32>
    %390 = math.exp %389 : vector<8x64xf32>
    %cst_116 = arith.constant 1.000000e+00 : f32
    %391 = vector.broadcast %cst_116 : f32 to vector<8x64xf32>
    %392 = arith.addf %391, %390 : vector<8x64xf32>
    %393 = arith.divf %391, %392 : vector<8x64xf32>
    %394 = vector.extract_strided_slice %387 {offsets = [0, 64], sizes = [8, 64], strides = [1, 1]} : vector<8x128xf32> to vector<8x64xf32>
    %395 = arith.subf %394, %370 : vector<8x64xf32>
    %396 = arith.mulf %393, %395 : vector<8x64xf32>
    %397 = arith.addf %370, %396 : vector<8x64xf32>
    %398 = arith.addf %356, %370 : vector<8x64xf32>
    %399 = arith.addf %398, %385 : vector<8x64xf32>
    %400 = arith.addf %399, %397 : vector<8x64xf32>
    %cst_117 = arith.constant 2.500000e-01 : f32
    %401 = vector.broadcast %cst_117 : f32 to vector<8x64xf32>
    %402 = arith.mulf %400, %401 : vector<8x64xf32>
    %403 = arith.index_cast %327 : i32 to index
    %c0_118 = arith.constant 0 : index
    %404 = vector.load %arg11[%403, %c0_118] : memref<64x64xf32, #tpu.memory_space<vmem>>, vector<8x64xf32>
    tpu.vector_store %arg11[%403, %c0_118], %402 {strides = array<i32>} : memref<64x64xf32, #tpu.memory_space<vmem>>, vector<8x64xf32>,
    %c5_i32 = arith.constant 5 : i32
    %c8_i32_119 = arith.constant 8 : i32
    %405 = arith.muli %c5_i32, %c8_i32_119 : i32
    %406 = tpu.assume_multiple %405, 8 : i32
    %407 = arith.index_cast %406 : i32 to index
    %c0_120 = arith.constant 0 : index
    %408 = vector.load %arg10[%407, %c0_120] : memref<64x128xf32, #tpu.memory_space<vmem>>, vector<8x128xf32>
    %c0_121 = arith.constant 0 : index
    %c0_122 = arith.constant 0 : index
    %409 = vector.load %arg3[%c0_121, %c0_122] : memref<64x128xf32, #tpu.memory_space<vmem>>, vector<64x128xf32>
    %cst_123 = arith.constant dense<0.000000e+00> : vector<8x128xf32>
    %410 = tpu.matmul %402, %409, %cst_123 {dimension_numbers = #tpu.dot_dimension_numbers<[1], [0], [0], [1], [0, 0, 1, 1], [], []>} : vector<8x64xf32>, vector<64x128xf32>, vector<8x128xf32> -> vector<8x128xf32>
    %411 = arith.addf %408, %410 : vector<8x128xf32>
    %412 = vector.extract_strided_slice %411 {offsets = [0, 0], sizes = [8, 64], strides = [1, 1]} : vector<8x128xf32> to vector<8x64xf32>
    %413 = arith.negf %412 : vector<8x64xf32>
    %414 = math.exp %413 : vector<8x64xf32>
    %cst_124 = arith.constant 1.000000e+00 : f32
    %415 = vector.broadcast %cst_124 : f32 to vector<8x64xf32>
    %416 = arith.addf %415, %414 : vector<8x64xf32>
    %417 = arith.divf %415, %416 : vector<8x64xf32>
    %418 = vector.extract_strided_slice %411 {offsets = [0, 64], sizes = [8, 64], strides = [1, 1]} : vector<8x128xf32> to vector<8x64xf32>
    %419 = math.tanh %418 : vector<8x64xf32>
    %420 = arith.subf %419, %402 : vector<8x64xf32>
    %421 = arith.mulf %417, %420 : vector<8x64xf32>
    %422 = arith.addf %402, %421 : vector<8x64xf32>
    %c0_125 = arith.constant 0 : index
    %c0_126 = arith.constant 0 : index
    %423 = vector.load %arg4[%c0_125, %c0_126] : memref<64x512xf32, #tpu.memory_space<vmem>>, vector<64x128xf32>
    %cst_127 = arith.constant dense<0.000000e+00> : vector<8x128xf32>
    %424 = tpu.matmul %422, %423, %cst_127 {dimension_numbers = #tpu.dot_dimension_numbers<[1], [0], [0], [1], [0, 0, 1, 1], [], []>} : vector<8x64xf32>, vector<64x128xf32>, vector<8x128xf32> -> vector<8x128xf32>
    %425 = vector.extract_strided_slice %424 {offsets = [0, 0], sizes = [8, 64], strides = [1, 1]} : vector<8x128xf32> to vector<8x64xf32>
    %426 = arith.negf %425 : vector<8x64xf32>
    %427 = math.exp %426 : vector<8x64xf32>
    %cst_128 = arith.constant 1.000000e+00 : f32
    %428 = vector.broadcast %cst_128 : f32 to vector<8x64xf32>
    %429 = arith.addf %428, %427 : vector<8x64xf32>
    %430 = arith.divf %428, %429 : vector<8x64xf32>
    %431 = vector.extract_strided_slice %424 {offsets = [0, 64], sizes = [8, 64], strides = [1, 1]} : vector<8x128xf32> to vector<8x64xf32>
    %432 = math.tanh %431 : vector<8x64xf32>
    %433 = arith.subf %432, %422 : vector<8x64xf32>
    %434 = arith.mulf %430, %433 : vector<8x64xf32>
    %435 = arith.addf %422, %434 : vector<8x64xf32>
    %c0_129 = arith.constant 0 : index
    %c128_130 = arith.constant 128 : index
    %436 = vector.load %arg4[%c0_129, %c128_130] : memref<64x512xf32, #tpu.memory_space<vmem>>, vector<64x256xf32>
    %cst_131 = arith.constant dense<0.000000e+00> : vector<8x256xf32>
    %437 = tpu.matmul %435, %436, %cst_131 {dimension_numbers = #tpu.dot_dimension_numbers<[1], [0], [0], [1], [0, 0, 1, 1], [], []>} : vector<8x64xf32>, vector<64x256xf32>, vector<8x256xf32> -> vector<8x256xf32>
    %438 = vector.extract_strided_slice %437 {offsets = [0, 0], sizes = [8, 64], strides = [1, 1]} : vector<8x256xf32> to vector<8x64xf32>
    %439 = arith.negf %438 : vector<8x64xf32>
    %440 = math.exp %439 : vector<8x64xf32>
    %cst_132 = arith.constant 1.000000e+00 : f32
    %441 = vector.broadcast %cst_132 : f32 to vector<8x64xf32>
    %442 = arith.addf %441, %440 : vector<8x64xf32>
    %443 = arith.divf %441, %442 : vector<8x64xf32>
    %444 = vector.extract_strided_slice %437 {offsets = [0, 64], sizes = [8, 64], strides = [1, 1]} : vector<8x256xf32> to vector<8x64xf32>
    %cst_133 = arith.constant 0.000000e+00 : f32
    %445 = vector.broadcast %cst_133 : f32 to vector<8x64xf32>
    %446 = arith.maximumf %444, %445 : vector<8x64xf32>
    %447 = arith.subf %446, %435 : vector<8x64xf32>
    %448 = arith.mulf %443, %447 : vector<8x64xf32>
    %449 = arith.addf %435, %448 : vector<8x64xf32>
    %450 = vector.extract_strided_slice %437 {offsets = [0, 128], sizes = [8, 64], strides = [1, 1]} : vector<8x256xf32> to vector<8x64xf32>
    %451 = arith.negf %450 : vector<8x64xf32>
    %452 = math.exp %451 : vector<8x64xf32>
    %cst_134 = arith.constant 1.000000e+00 : f32
    %453 = vector.broadcast %cst_134 : f32 to vector<8x64xf32>
    %454 = arith.addf %453, %452 : vector<8x64xf32>
    %455 = arith.divf %453, %454 : vector<8x64xf32>
    %456 = vector.extract_strided_slice %437 {offsets = [0, 192], sizes = [8, 64], strides = [1, 1]} : vector<8x256xf32> to vector<8x64xf32>
    %457 = arith.negf %456 : vector<8x64xf32>
    %458 = math.exp %457 : vector<8x64xf32>
    %cst_135 = arith.constant 1.000000e+00 : f32
    %459 = vector.broadcast %cst_135 : f32 to vector<8x64xf32>
    %460 = arith.addf %459, %458 : vector<8x64xf32>
    %461 = arith.divf %459, %460 : vector<8x64xf32>
    %462 = arith.subf %461, %435 : vector<8x64xf32>
    %463 = arith.mulf %455, %462 : vector<8x64xf32>
    %464 = arith.addf %435, %463 : vector<8x64xf32>
    %c0_136 = arith.constant 0 : index
    %c384_137 = arith.constant 384 : index
    %465 = vector.load %arg4[%c0_136, %c384_137] : memref<64x512xf32, #tpu.memory_space<vmem>>, vector<64x128xf32>
    %cst_138 = arith.constant dense<0.000000e+00> : vector<8x128xf32>
    %466 = tpu.matmul %449, %465, %cst_138 {dimension_numbers = #tpu.dot_dimension_numbers<[1], [0], [0], [1], [0, 0, 1, 1], [], []>} : vector<8x64xf32>, vector<64x128xf32>, vector<8x128xf32> -> vector<8x128xf32>
    %467 = vector.extract_strided_slice %466 {offsets = [0, 0], sizes = [8, 64], strides = [1, 1]} : vector<8x128xf32> to vector<8x64xf32>
    %468 = arith.negf %467 : vector<8x64xf32>
    %469 = math.exp %468 : vector<8x64xf32>
    %cst_139 = arith.constant 1.000000e+00 : f32
    %470 = vector.broadcast %cst_139 : f32 to vector<8x64xf32>
    %471 = arith.addf %470, %469 : vector<8x64xf32>
    %472 = arith.divf %470, %471 : vector<8x64xf32>
    %473 = vector.extract_strided_slice %466 {offsets = [0, 64], sizes = [8, 64], strides = [1, 1]} : vector<8x128xf32> to vector<8x64xf32>
    %474 = arith.subf %473, %449 : vector<8x64xf32>
    %475 = arith.mulf %472, %474 : vector<8x64xf32>
    %476 = arith.addf %449, %475 : vector<8x64xf32>
    %477 = arith.addf %435, %449 : vector<8x64xf32>
    %478 = arith.addf %477, %464 : vector<8x64xf32>
    %479 = arith.addf %478, %476 : vector<8x64xf32>
    %cst_140 = arith.constant 2.500000e-01 : f32
    %480 = vector.broadcast %cst_140 : f32 to vector<8x64xf32>
    %481 = arith.mulf %479, %480 : vector<8x64xf32>
    %482 = arith.index_cast %406 : i32 to index
    %c0_141 = arith.constant 0 : index
    %483 = vector.load %arg11[%482, %c0_141] : memref<64x64xf32, #tpu.memory_space<vmem>>, vector<8x64xf32>
    tpu.vector_store %arg11[%482, %c0_141], %481 {strides = array<i32>} : memref<64x64xf32, #tpu.memory_space<vmem>>, vector<8x64xf32>,
    %c6_i32 = arith.constant 6 : i32
    %c8_i32_142 = arith.constant 8 : i32
    %484 = arith.muli %c6_i32, %c8_i32_142 : i32
    %485 = tpu.assume_multiple %484, 8 : i32
    %486 = arith.index_cast %485 : i32 to index
    %c0_143 = arith.constant 0 : index
    %487 = vector.load %arg10[%486, %c0_143] : memref<64x128xf32, #tpu.memory_space<vmem>>, vector<8x128xf32>
    %c0_144 = arith.constant 0 : index
    %c0_145 = arith.constant 0 : index
    %488 = vector.load %arg3[%c0_144, %c0_145] : memref<64x128xf32, #tpu.memory_space<vmem>>, vector<64x128xf32>
    %cst_146 = arith.constant dense<0.000000e+00> : vector<8x128xf32>
    %489 = tpu.matmul %481, %488, %cst_146 {dimension_numbers = #tpu.dot_dimension_numbers<[1], [0], [0], [1], [0, 0, 1, 1], [], []>} : vector<8x64xf32>, vector<64x128xf32>, vector<8x128xf32> -> vector<8x128xf32>
    %490 = arith.addf %487, %489 : vector<8x128xf32>
    %491 = vector.extract_strided_slice %490 {offsets = [0, 0], sizes = [8, 64], strides = [1, 1]} : vector<8x128xf32> to vector<8x64xf32>
    %492 = arith.negf %491 : vector<8x64xf32>
    %493 = math.exp %492 : vector<8x64xf32>
    %cst_147 = arith.constant 1.000000e+00 : f32
    %494 = vector.broadcast %cst_147 : f32 to vector<8x64xf32>
    %495 = arith.addf %494, %493 : vector<8x64xf32>
    %496 = arith.divf %494, %495 : vector<8x64xf32>
    %497 = vector.extract_strided_slice %490 {offsets = [0, 64], sizes = [8, 64], strides = [1, 1]} : vector<8x128xf32> to vector<8x64xf32>
    %498 = math.tanh %497 : vector<8x64xf32>
    %499 = arith.subf %498, %481 : vector<8x64xf32>
    %500 = arith.mulf %496, %499 : vector<8x64xf32>
    %501 = arith.addf %481, %500 : vector<8x64xf32>
    %c0_148 = arith.constant 0 : index
    %c0_149 = arith.constant 0 : index
    %502 = vector.load %arg4[%c0_148, %c0_149] : memref<64x512xf32, #tpu.memory_space<vmem>>, vector<64x128xf32>
    %cst_150 = arith.constant dense<0.000000e+00> : vector<8x128xf32>
    %503 = tpu.matmul %501, %502, %cst_150 {dimension_numbers = #tpu.dot_dimension_numbers<[1], [0], [0], [1], [0, 0, 1, 1], [], []>} : vector<8x64xf32>, vector<64x128xf32>, vector<8x128xf32> -> vector<8x128xf32>
    %504 = vector.extract_strided_slice %503 {offsets = [0, 0], sizes = [8, 64], strides = [1, 1]} : vector<8x128xf32> to vector<8x64xf32>
    %505 = arith.negf %504 : vector<8x64xf32>
    %506 = math.exp %505 : vector<8x64xf32>
    %cst_151 = arith.constant 1.000000e+00 : f32
    %507 = vector.broadcast %cst_151 : f32 to vector<8x64xf32>
    %508 = arith.addf %507, %506 : vector<8x64xf32>
    %509 = arith.divf %507, %508 : vector<8x64xf32>
    %510 = vector.extract_strided_slice %503 {offsets = [0, 64], sizes = [8, 64], strides = [1, 1]} : vector<8x128xf32> to vector<8x64xf32>
    %511 = math.tanh %510 : vector<8x64xf32>
    %512 = arith.subf %511, %501 : vector<8x64xf32>
    %513 = arith.mulf %509, %512 : vector<8x64xf32>
    %514 = arith.addf %501, %513 : vector<8x64xf32>
    %c0_152 = arith.constant 0 : index
    %c128_153 = arith.constant 128 : index
    %515 = vector.load %arg4[%c0_152, %c128_153] : memref<64x512xf32, #tpu.memory_space<vmem>>, vector<64x256xf32>
    %cst_154 = arith.constant dense<0.000000e+00> : vector<8x256xf32>
    %516 = tpu.matmul %514, %515, %cst_154 {dimension_numbers = #tpu.dot_dimension_numbers<[1], [0], [0], [1], [0, 0, 1, 1], [], []>} : vector<8x64xf32>, vector<64x256xf32>, vector<8x256xf32> -> vector<8x256xf32>
    %517 = vector.extract_strided_slice %516 {offsets = [0, 0], sizes = [8, 64], strides = [1, 1]} : vector<8x256xf32> to vector<8x64xf32>
    %518 = arith.negf %517 : vector<8x64xf32>
    %519 = math.exp %518 : vector<8x64xf32>
    %cst_155 = arith.constant 1.000000e+00 : f32
    %520 = vector.broadcast %cst_155 : f32 to vector<8x64xf32>
    %521 = arith.addf %520, %519 : vector<8x64xf32>
    %522 = arith.divf %520, %521 : vector<8x64xf32>
    %523 = vector.extract_strided_slice %516 {offsets = [0, 64], sizes = [8, 64], strides = [1, 1]} : vector<8x256xf32> to vector<8x64xf32>
    %cst_156 = arith.constant 0.000000e+00 : f32
    %524 = vector.broadcast %cst_156 : f32 to vector<8x64xf32>
    %525 = arith.maximumf %523, %524 : vector<8x64xf32>
    %526 = arith.subf %525, %514 : vector<8x64xf32>
    %527 = arith.mulf %522, %526 : vector<8x64xf32>
    %528 = arith.addf %514, %527 : vector<8x64xf32>
    %529 = vector.extract_strided_slice %516 {offsets = [0, 128], sizes = [8, 64], strides = [1, 1]} : vector<8x256xf32> to vector<8x64xf32>
    %530 = arith.negf %529 : vector<8x64xf32>
    %531 = math.exp %530 : vector<8x64xf32>
    %cst_157 = arith.constant 1.000000e+00 : f32
    %532 = vector.broadcast %cst_157 : f32 to vector<8x64xf32>
    %533 = arith.addf %532, %531 : vector<8x64xf32>
    %534 = arith.divf %532, %533 : vector<8x64xf32>
    %535 = vector.extract_strided_slice %516 {offsets = [0, 192], sizes = [8, 64], strides = [1, 1]} : vector<8x256xf32> to vector<8x64xf32>
    %536 = arith.negf %535 : vector<8x64xf32>
    %537 = math.exp %536 : vector<8x64xf32>
    %cst_158 = arith.constant 1.000000e+00 : f32
    %538 = vector.broadcast %cst_158 : f32 to vector<8x64xf32>
    %539 = arith.addf %538, %537 : vector<8x64xf32>
    %540 = arith.divf %538, %539 : vector<8x64xf32>
    %541 = arith.subf %540, %514 : vector<8x64xf32>
    %542 = arith.mulf %534, %541 : vector<8x64xf32>
    %543 = arith.addf %514, %542 : vector<8x64xf32>
    %c0_159 = arith.constant 0 : index
    %c384_160 = arith.constant 384 : index
    %544 = vector.load %arg4[%c0_159, %c384_160] : memref<64x512xf32, #tpu.memory_space<vmem>>, vector<64x128xf32>
    %cst_161 = arith.constant dense<0.000000e+00> : vector<8x128xf32>
    %545 = tpu.matmul %528, %544, %cst_161 {dimension_numbers = #tpu.dot_dimension_numbers<[1], [0], [0], [1], [0, 0, 1, 1], [], []>} : vector<8x64xf32>, vector<64x128xf32>, vector<8x128xf32> -> vector<8x128xf32>
    %546 = vector.extract_strided_slice %545 {offsets = [0, 0], sizes = [8, 64], strides = [1, 1]} : vector<8x128xf32> to vector<8x64xf32>
    %547 = arith.negf %546 : vector<8x64xf32>
    %548 = math.exp %547 : vector<8x64xf32>
    %cst_162 = arith.constant 1.000000e+00 : f32
    %549 = vector.broadcast %cst_162 : f32 to vector<8x64xf32>
    %550 = arith.addf %549, %548 : vector<8x64xf32>
    %551 = arith.divf %549, %550 : vector<8x64xf32>
    %552 = vector.extract_strided_slice %545 {offsets = [0, 64], sizes = [8, 64], strides = [1, 1]} : vector<8x128xf32> to vector<8x64xf32>
    %553 = arith.subf %552, %528 : vector<8x64xf32>
    %554 = arith.mulf %551, %553 : vector<8x64xf32>
    %555 = arith.addf %528, %554 : vector<8x64xf32>
    %556 = arith.addf %514, %528 : vector<8x64xf32>
    %557 = arith.addf %556, %543 : vector<8x64xf32>
    %558 = arith.addf %557, %555 : vector<8x64xf32>
    %cst_163 = arith.constant 2.500000e-01 : f32
    %559 = vector.broadcast %cst_163 : f32 to vector<8x64xf32>
    %560 = arith.mulf %558, %559 : vector<8x64xf32>
    %561 = arith.index_cast %485 : i32 to index
    %c0_164 = arith.constant 0 : index
    %562 = vector.load %arg11[%561, %c0_164] : memref<64x64xf32, #tpu.memory_space<vmem>>, vector<8x64xf32>
    tpu.vector_store %arg11[%561, %c0_164], %560 {strides = array<i32>} : memref<64x64xf32, #tpu.memory_space<vmem>>, vector<8x64xf32>,
    %c7_i32 = arith.constant 7 : i32
    %c8_i32_165 = arith.constant 8 : i32
    %563 = arith.muli %c7_i32, %c8_i32_165 : i32
    %564 = tpu.assume_multiple %563, 8 : i32
    %565 = arith.index_cast %564 : i32 to index
    %c0_166 = arith.constant 0 : index
    %566 = vector.load %arg10[%565, %c0_166] : memref<64x128xf32, #tpu.memory_space<vmem>>, vector<8x128xf32>
    %c0_167 = arith.constant 0 : index
    %c0_168 = arith.constant 0 : index
    %567 = vector.load %arg3[%c0_167, %c0_168] : memref<64x128xf32, #tpu.memory_space<vmem>>, vector<64x128xf32>
    %cst_169 = arith.constant dense<0.000000e+00> : vector<8x128xf32>
    %568 = tpu.matmul %560, %567, %cst_169 {dimension_numbers = #tpu.dot_dimension_numbers<[1], [0], [0], [1], [0, 0, 1, 1], [], []>} : vector<8x64xf32>, vector<64x128xf32>, vector<8x128xf32> -> vector<8x128xf32>
    %569 = arith.addf %566, %568 : vector<8x128xf32>
    %570 = vector.extract_strided_slice %569 {offsets = [0, 0], sizes = [8, 64], strides = [1, 1]} : vector<8x128xf32> to vector<8x64xf32>
    %571 = arith.negf %570 : vector<8x64xf32>
    %572 = math.exp %571 : vector<8x64xf32>
    %cst_170 = arith.constant 1.000000e+00 : f32
    %573 = vector.broadcast %cst_170 : f32 to vector<8x64xf32>
    %574 = arith.addf %573, %572 : vector<8x64xf32>
    %575 = arith.divf %573, %574 : vector<8x64xf32>
    %576 = vector.extract_strided_slice %569 {offsets = [0, 64], sizes = [8, 64], strides = [1, 1]} : vector<8x128xf32> to vector<8x64xf32>
    %577 = math.tanh %576 : vector<8x64xf32>
    %578 = arith.subf %577, %560 : vector<8x64xf32>
    %579 = arith.mulf %575, %578 : vector<8x64xf32>
    %580 = arith.addf %560, %579 : vector<8x64xf32>
    %c0_171 = arith.constant 0 : index
    %c0_172 = arith.constant 0 : index
    %581 = vector.load %arg4[%c0_171, %c0_172] : memref<64x512xf32, #tpu.memory_space<vmem>>, vector<64x128xf32>
    %cst_173 = arith.constant dense<0.000000e+00> : vector<8x128xf32>
    %582 = tpu.matmul %580, %581, %cst_173 {dimension_numbers = #tpu.dot_dimension_numbers<[1], [0], [0], [1], [0, 0, 1, 1], [], []>} : vector<8x64xf32>, vector<64x128xf32>, vector<8x128xf32> -> vector<8x128xf32>
    %583 = vector.extract_strided_slice %582 {offsets = [0, 0], sizes = [8, 64], strides = [1, 1]} : vector<8x128xf32> to vector<8x64xf32>
    %584 = arith.negf %583 : vector<8x64xf32>
    %585 = math.exp %584 : vector<8x64xf32>
    %cst_174 = arith.constant 1.000000e+00 : f32
    %586 = vector.broadcast %cst_174 : f32 to vector<8x64xf32>
    %587 = arith.addf %586, %585 : vector<8x64xf32>
    %588 = arith.divf %586, %587 : vector<8x64xf32>
    %589 = vector.extract_strided_slice %582 {offsets = [0, 64], sizes = [8, 64], strides = [1, 1]} : vector<8x128xf32> to vector<8x64xf32>
    %590 = math.tanh %589 : vector<8x64xf32>
    %591 = arith.subf %590, %580 : vector<8x64xf32>
    %592 = arith.mulf %588, %591 : vector<8x64xf32>
    %593 = arith.addf %580, %592 : vector<8x64xf32>
    %c0_175 = arith.constant 0 : index
    %c128_176 = arith.constant 128 : index
    %594 = vector.load %arg4[%c0_175, %c128_176] : memref<64x512xf32, #tpu.memory_space<vmem>>, vector<64x256xf32>
    %cst_177 = arith.constant dense<0.000000e+00> : vector<8x256xf32>
    %595 = tpu.matmul %593, %594, %cst_177 {dimension_numbers = #tpu.dot_dimension_numbers<[1], [0], [0], [1], [0, 0, 1, 1], [], []>} : vector<8x64xf32>, vector<64x256xf32>, vector<8x256xf32> -> vector<8x256xf32>
    %596 = vector.extract_strided_slice %595 {offsets = [0, 0], sizes = [8, 64], strides = [1, 1]} : vector<8x256xf32> to vector<8x64xf32>
    %597 = arith.negf %596 : vector<8x64xf32>
    %598 = math.exp %597 : vector<8x64xf32>
    %cst_178 = arith.constant 1.000000e+00 : f32
    %599 = vector.broadcast %cst_178 : f32 to vector<8x64xf32>
    %600 = arith.addf %599, %598 : vector<8x64xf32>
    %601 = arith.divf %599, %600 : vector<8x64xf32>
    %602 = vector.extract_strided_slice %595 {offsets = [0, 64], sizes = [8, 64], strides = [1, 1]} : vector<8x256xf32> to vector<8x64xf32>
    %cst_179 = arith.constant 0.000000e+00 : f32
    %603 = vector.broadcast %cst_179 : f32 to vector<8x64xf32>
    %604 = arith.maximumf %602, %603 : vector<8x64xf32>
    %605 = arith.subf %604, %593 : vector<8x64xf32>
    %606 = arith.mulf %601, %605 : vector<8x64xf32>
    %607 = arith.addf %593, %606 : vector<8x64xf32>
    %608 = vector.extract_strided_slice %595 {offsets = [0, 128], sizes = [8, 64], strides = [1, 1]} : vector<8x256xf32> to vector<8x64xf32>
    %609 = arith.negf %608 : vector<8x64xf32>
    %610 = math.exp %609 : vector<8x64xf32>
    %cst_180 = arith.constant 1.000000e+00 : f32
    %611 = vector.broadcast %cst_180 : f32 to vector<8x64xf32>
    %612 = arith.addf %611, %610 : vector<8x64xf32>
    %613 = arith.divf %611, %612 : vector<8x64xf32>
    %614 = vector.extract_strided_slice %595 {offsets = [0, 192], sizes = [8, 64], strides = [1, 1]} : vector<8x256xf32> to vector<8x64xf32>
    %615 = arith.negf %614 : vector<8x64xf32>
    %616 = math.exp %615 : vector<8x64xf32>
    %cst_181 = arith.constant 1.000000e+00 : f32
    %617 = vector.broadcast %cst_181 : f32 to vector<8x64xf32>
    %618 = arith.addf %617, %616 : vector<8x64xf32>
    %619 = arith.divf %617, %618 : vector<8x64xf32>
    %620 = arith.subf %619, %593 : vector<8x64xf32>
    %621 = arith.mulf %613, %620 : vector<8x64xf32>
    %622 = arith.addf %593, %621 : vector<8x64xf32>
    %c0_182 = arith.constant 0 : index
    %c384_183 = arith.constant 384 : index
    %623 = vector.load %arg4[%c0_182, %c384_183] : memref<64x512xf32, #tpu.memory_space<vmem>>, vector<64x128xf32>
    %cst_184 = arith.constant dense<0.000000e+00> : vector<8x128xf32>
    %624 = tpu.matmul %607, %623, %cst_184 {dimension_numbers = #tpu.dot_dimension_numbers<[1], [0], [0], [1], [0, 0, 1, 1], [], []>} : vector<8x64xf32>, vector<64x128xf32>, vector<8x128xf32> -> vector<8x128xf32>
    %625 = vector.extract_strided_slice %624 {offsets = [0, 0], sizes = [8, 64], strides = [1, 1]} : vector<8x128xf32> to vector<8x64xf32>
    %626 = arith.negf %625 : vector<8x64xf32>
    %627 = math.exp %626 : vector<8x64xf32>
    %cst_185 = arith.constant 1.000000e+00 : f32
    %628 = vector.broadcast %cst_185 : f32 to vector<8x64xf32>
    %629 = arith.addf %628, %627 : vector<8x64xf32>
    %630 = arith.divf %628, %629 : vector<8x64xf32>
    %631 = vector.extract_strided_slice %624 {offsets = [0, 64], sizes = [8, 64], strides = [1, 1]} : vector<8x128xf32> to vector<8x64xf32>
    %632 = arith.subf %631, %607 : vector<8x64xf32>
    %633 = arith.mulf %630, %632 : vector<8x64xf32>
    %634 = arith.addf %607, %633 : vector<8x64xf32>
    %635 = arith.addf %593, %607 : vector<8x64xf32>
    %636 = arith.addf %635, %622 : vector<8x64xf32>
    %637 = arith.addf %636, %634 : vector<8x64xf32>
    %cst_186 = arith.constant 2.500000e-01 : f32
    %638 = vector.broadcast %cst_186 : f32 to vector<8x64xf32>
    %639 = arith.mulf %637, %638 : vector<8x64xf32>
    %640 = arith.index_cast %564 : i32 to index
    %c0_187 = arith.constant 0 : index
    %641 = vector.load %arg11[%640, %c0_187] : memref<64x64xf32, #tpu.memory_space<vmem>>, vector<8x64xf32>
    tpu.vector_store %arg11[%640, %c0_187], %639 {strides = array<i32>} : memref<64x64xf32, #tpu.memory_space<vmem>>, vector<8x64xf32>,
    %c8_i32_188 = arith.constant 8 : i32
    %c0_189 = arith.constant 0 : index
    %c0_190 = arith.constant 0 : index
    %642 = vector.load %arg9[%c0_189, %c0_190] : memref<8x64xf32, #tpu.memory_space<vmem>>, vector<8x64xf32>
    tpu.vector_store %arg9[%c0_189, %c0_190], %639 {strides = array<i32>} : memref<8x64xf32, #tpu.memory_space<vmem>>, vector<8x64xf32>,
    %c0_191 = arith.constant 0 : index
    %c0_192 = arith.constant 0 : index
    %643 = vector.load %arg11[%c0_191, %c0_192] : memref<64x64xf32, #tpu.memory_space<vmem>>, vector<64x64xf32>
    %c0_193 = arith.constant 0 : index
    %c0_194 = arith.constant 0 : index
    %644 = vector.load %arg5[%c0_193, %c0_194] : memref<64x256xf32, #tpu.memory_space<vmem>>, vector<64x256xf32>
    %cst_195 = arith.constant dense<0.000000e+00> : vector<64x256xf32>
    %645 = tpu.matmul %643, %644, %cst_195 {dimension_numbers = #tpu.dot_dimension_numbers<[1], [0], [0], [1], [0, 0, 1, 1], [], []>} : vector<64x64xf32>, vector<64x256xf32>, vector<64x256xf32> -> vector<64x256xf32>
    %c0_196 = arith.constant 0 : index
    %c0_197 = arith.constant 0 : index
    %646 = vector.load %arg6[%c0_196, %c0_197] : memref<1x256xf32, #tpu.memory_space<vmem>>, vector<1x256xf32>
    %647 = vector.broadcast %646 : vector<1x256xf32> to vector<64x256xf32>
    %648 = arith.addf %645, %647 : vector<64x256xf32>
    %649 = vector.extract_strided_slice %648 {offsets = [0, 0], sizes = [64, 128], strides = [1, 1]} : vector<64x256xf32> to vector<64x128xf32>
    %cst_198 = arith.constant dense<0xFF800000> : vector<64xf32>
    %650 = vector.multi_reduction <maximumf>, %649, %cst_198 [1] : vector<64x128xf32> to vector<64xf32>
    %651 = vector.shape_cast %650 : vector<64xf32> to vector<64x1xf32>
    %652 = vector.broadcast %651 : vector<64x1xf32> to vector<64x128xf32>
    %653 = arith.subf %649, %652 : vector<64x128xf32>
    %654 = math.exp %653 : vector<64x128xf32>
    %cst_199 = arith.constant dense<0.000000e+00> : vector<64xf32>
    %655 = vector.multi_reduction <add>, %654, %cst_199 [1] : vector<64x128xf32> to vector<64xf32>
    %656 = vector.shape_cast %655 : vector<64xf32> to vector<64x1xf32>
    %657 = math.log %656 : vector<64x1xf32>
    %658 = vector.broadcast %657 : vector<64x1xf32> to vector<64x128xf32>
    %659 = arith.subf %653, %658 : vector<64x128xf32>
    %c0_200 = arith.constant 0 : index
    %c0_201 = arith.constant 0 : index
    %660 = vector.load %arg7[%c0_200, %c0_201] : memref<64x128xf32, #tpu.memory_space<vmem>>, vector<64x128xf32>
    tpu.vector_store %arg7[%c0_200, %c0_201], %659 {strides = array<i32>} : memref<64x128xf32, #tpu.memory_space<vmem>>, vector<64x128xf32>,
    %661 = vector.extract_strided_slice %648 {offsets = [0, 128], sizes = [64, 128], strides = [1, 1]} : vector<64x256xf32> to vector<64x128xf32>
    %cst_202 = arith.constant dense<0xFF800000> : vector<64xf32>
    %662 = vector.multi_reduction <maximumf>, %661, %cst_202 [1] : vector<64x128xf32> to vector<64xf32>
    %663 = vector.shape_cast %662 : vector<64xf32> to vector<64x1xf32>
    %664 = vector.broadcast %663 : vector<64x1xf32> to vector<64x128xf32>
    %665 = arith.subf %661, %664 : vector<64x128xf32>
    %666 = math.exp %665 : vector<64x128xf32>
    %cst_203 = arith.constant dense<0.000000e+00> : vector<64xf32>
    %667 = vector.multi_reduction <add>, %666, %cst_203 [1] : vector<64x128xf32> to vector<64xf32>
    %668 = vector.shape_cast %667 : vector<64xf32> to vector<64x1xf32>
    %669 = math.log %668 : vector<64x1xf32>
    %670 = vector.broadcast %669 : vector<64x1xf32> to vector<64x128xf32>
    %671 = arith.subf %665, %670 : vector<64x128xf32>
    %c0_204 = arith.constant 0 : index
    %c0_205 = arith.constant 0 : index
    %672 = vector.load %arg8[%c0_204, %c0_205] : memref<64x128xf32, #tpu.memory_space<vmem>>, vector<64x128xf32>
    tpu.vector_store %arg8[%c0_204, %c0_205], %671 {strides = array<i32>} : memref<64x128xf32, #tpu.memory_space<vmem>>, vector<64x128xf32>,
    return
  }
}

</mosaic_0001>

<bundles_post_ra>
// kernel: rnn_model_forward.1
= control target key start
LH: loop header
LB: loop body
LE: loop exit
PB: predicated region body
PF: predicated region fallthrough
CT: control target
= control target key end

     0   :  { %15 = vsyncpa [#allocation5], 0  ;;  %s6671_s0 = inlined_call_operand.vmem [shape: s32[64,1], index: 0, kind: input, shape index: {}]   ;;  %s6672_s1 = inlined_call_operand.vmem [shape: f32[8,64], index: 1, kind: input, shape index: {}]   ;;  %s6673_s2 = inlined_call_operand.hbm [shape: f32[128,128], index: 2, kind: input, shape index: {}]   ;;  %s6674_s3 = inlined_call_operand.vmem [shape: f32[64,128], index: 3, kind: input, shape index: {}]   ;;  %s6675_s4 = inlined_call_operand.hbm [shape: f32[64,512], index: 4, kind: input, shape index: {}]   ;;  %s6676_s5 = inlined_call_operand.hbm [shape: f32[64,256], index: 5, kind: input, shape index: {}]   ;;  %s6677_s6 = inlined_call_operand.vmem [shape: f32[1,256], index: 6, kind: input, shape index: {}]   ;;  %s6678_s7 = inlined_call_operand.hbm [shape: f32[64,128], index: 7, kind: output, shape index: {0}]   ;;  %s6679_s8 = inlined_call_operand.vmem [shape: f32[64,128], index: 8, kind: output, shape index: {1}]   ;;  %s6680_s9 = inlined_call_operand.hbm [shape: f32[8,64], index: 9, kind: output, shape index: {2}]  }
   0x1   :  { %16 = vsyncpa [#allocation8], 0 }
   0x2   :  { %17 = vsyncpa [#allocation6], 0 }
   0x3   :  { %18 = vsyncpa [#allocation12], 0  ;;  %s5714_s30 = smov [#allocation7]   ;;  %s5596_s13 = scalar_lea.hbm %s6675_s4, 4096 }
   0x4   :  { %s42_s10 = sshll.u32 %s5714_s30, 4  ;;  %p5597_p0 = scmp.ne.s32.totalorder %s6675_s4, %s5596_s13  ;;  %s43_s10 = int_to_ptr.vmem [resolvable:$true] %s42_s10 }
   0x5   :  { %p5600_p1 = scmp.lt.u32.totalorder %s5596_s13, %s6675_s4 }
   0x7   :  { %p5602_p2 = pnand %p5600_p1, %p5597_p0 }
   0x9   :  { %5605 = shalt.err (!%p5602_p2)
}
   0xa   :  { %s5606_s18 = scalar_lea.vmem %s43_s10, 4096  ;;  %p5611_p4 = scmp.lt.s32.totalorder %s43_s10, %s43_s10 }
   0xb   :  { %p5607_p3 = scmp.ne.s32.totalorder %s43_s10, %s5606_s18  ;;  %p5612_p5 = scmp.lt.s32.totalorder %s5606_s18, %s5606_s18 }
   0xd   :  { %p5613_p6 = por %p5612_p5, %p5611_p4 }
   0xf   :  { %p5614_p7 = pnand %p5613_p6, %p5607_p3 }
  0x11   :  { %5617 = shalt.err (!%p5614_p7)
}
  0x12   :  { %s5715_s19 = smov 512   ;;  %s5716_s20 = smov 32  }
  0x13   :  { %48 = dma.hbm_to_vmem [thread:$0]  %s6675_s4, 4096, %s43_s10, [#allocation8], %s5715_s19, %s5715_s19, %s5716_s20  }
  0x14   :  { %s5717_s23 = smov [#allocation4]   ;;  %s5618_s27 = scalar_lea.hbm %s6673_s2, 2048 }
  0x15   :  { %s28_s24 = sshll.u32 %s5717_s23, 4  ;;  %p5619_p8 = scmp.ne.s32.totalorder %s6673_s2, %s5618_s27  ;;  %s29_s24 = int_to_ptr.vmem [resolvable:$true] %s28_s24 }
  0x16   :  { %p5622_p9 = scmp.lt.u32.totalorder %s5618_s27, %s6673_s2 }
  0x18   :  { %p5624_p10 = pnand %p5622_p9, %p5619_p8 }
  0x1a   :  { %5627 = shalt.err (!%p5624_p10)
}
  0x1b   :  { %s5628_s12 = scalar_lea.vmem %s29_s24, 2048  ;;  %p5633_p12 = scmp.lt.s32.totalorder %s29_s24, %s29_s24 }
  0x1c   :  { %p5629_p11 = scmp.ne.s32.totalorder %s29_s24, %s5628_s12  ;;  %p5634_p13 = scmp.lt.s32.totalorder %s5628_s12, %s5628_s12 }
  0x1e   :  { %p5635_p0 = por %p5634_p13, %p5633_p12 }
  0x20   :  { %p5636_p1 = pnand %p5635_p0, %p5629_p11 }
  0x22   :  { %5639 = shalt.err (!%p5636_p1)
}
  0x23   :  { %s5718_s4 = smov 128   ;;  %s5719_s10 = smov 8  }
  0x24   :  { %34 = dma.hbm_to_vmem [thread:$0]  %s6673_s2, 2048, %s29_s24, [#allocation5], %s5718_s4, %s5718_s4, %s5719_s10  }
  0x25   :  { %s5720_s15 = smov [#allocation9]   ;;  %s5640_s19 = scalar_lea.hbm %s6676_s5, 2048 }
  0x26   :  { %s54_s16 = sshll.u32 %s5720_s15, 4  ;;  %p5641_p2 = scmp.ne.s32.totalorder %s6676_s5, %s5640_s19  ;;  %s55_s16 = int_to_ptr.vmem [resolvable:$true] %s54_s16 }
  0x27   :  { %p5644_p3 = scmp.lt.u32.totalorder %s5640_s19, %s6676_s5 }
  0x29   :  { %p5646_p4 = pnand %p5644_p3, %p5641_p2 }
  0x2b   :  { %5649 = shalt.err (!%p5646_p4)
}
  0x2c   :  { %s5650_s25 = scalar_lea.vmem %s55_s16, 2048  ;;  %p5655_p6 = scmp.lt.s32.totalorder %s55_s16, %s55_s16 }
  0x2d   :  { %p5651_p5 = scmp.ne.s32.totalorder %s55_s16, %s5650_s25  ;;  %p5656_p7 = scmp.lt.s32.totalorder %s5650_s25, %s5650_s25 }
  0x2f   :  { %p5657_p8 = por %p5656_p7, %p5655_p6 }
  0x31   :  { %p5658_p9 = pnand %p5657_p8, %p5651_p5 }
  0x33   :  { %5661 = shalt.err (!%p5658_p9)
}
  0x34   :  { %s5721_s2 = smov 256   ;;  %s5722_s24 = smov 16  }
  0x35   :  { %60 = dma.hbm_to_vmem [thread:$0]  %s6676_s5, 2048, %s55_s16, [#allocation8], %s5721_s2, %s5721_s2, %s5722_s24  }
  0x36   :  { %5706 = dma.done.wait [#allocation5], 2048  }
  0x37   :  { %5707 = vsyncadd [#allocation5], 4294965248 }
  0x38   :  { %5708 = dma.done.wait [#allocation8], 6144  }
  0x39   :  { %5709 = vsyncadd [#allocation8], 4294961152  ;;  %v5723_v0 = vmov 0   ;;  %v5724_v1 = vmov 0.0|0.0   ;;  %v72_v2 = vld [vmem:[%s6671_s0] sm:$0xff]  ;;  %v131_v4 = vld [vmem:[#allocation4 + $0x8] sm:$0xff]  ;;  %v80_v42 = vlaneseq }
  0x3a   :  { %5338 = vset.pattern.permute.xlu0 %v5723_v0  ;;  %4889 = vmatprep.subr.bf16.mxu1 %v5724_v1  ;;  %v130_v3 = vld [vmem:[#allocation4] sm:$0xff]  ;;  %v132_v5 = vld [vmem:[#allocation4 + $0x10] sm:$0xff]  ;;  %v133_v6 = vld [vmem:[#allocation4 + $0x18] sm:$0xff]  ;;  %vm5725_vm0 = vmmov 0   ;;  %v5726_v18 = vmov 0.0   ;;  %s5727_s2 = smov 64  }
  0x3b   :  { %5339 = vset.pattern.permute.xlu1 %v5723_v0  ;;  %83 = vperm.xlu0 %5338, %v72_v2   ;;  %v73_v7 = vld [vmem:[%s6671_s0 + $0x8] sm:$0xff]  ;;  %v4857_v8 = vpack.c.bf16 %v131_v4, %v130_v3  ;;  %v4861_v9 = vpack.c.bf16 %v133_v6, %v132_v5  ;;  %v134_v10 = vld [vmem:[#allocation4 + $0x20] sm:$0xff]  ;;  %v263_v15 = vld [vmem:[%s6674_s3 + $0x10] sm:$0xff]  ;;  %vm269_vm1 = vcmask 523264   ;;  %v5882_v43 = vand.u32 127, %v80_v42  ;;  %s5729_s18 = smov [#allocation11]  }
  0x3c   :  { %v135_v11 = vld [vmem:[#allocation4 + $0x28] sm:$0xff]  ;;  %v261_v12 = vld [vmem:[%s6674_s3] sm:$0xff]  ;;  %v264_v16 = vld [vmem:[%s6674_s3 + $0x18] sm:$0xff]  ;;  %4417 = vmatprep.mubr.msk.f32.mxu1 %vm5725_vm0, %v5726_v18  ;;  %v5728_v45 = vmov 1.0  }
  0x3d   :  { %4858 = vmatprep.subr.bf16.mxu0 %v4857_v8  ;;  %v262_v13 = vld [vmem:[%s6674_s3 + $0x8] sm:$0xff]  ;;  %v4865_v17 = vpack.c.bf16 %v135_v11, %v134_v10  ;;  %v136_v19 = vld [vmem:[#allocation4 + $0x30] sm:$0xff]  ;;  %v137_v20 = vld [vmem:[#allocation4 + $0x38] sm:$0xff]  ;;  %v5844_v21 = vpack.c.bf16 %v264_v16, %v263_v15 }
  0x3e   :  { %4860 = vmatpush3.bf16.msra.mxu0 %v4857_v8  ;;  %v5833_v14 = vpack.c.bf16 %v262_v13, %v261_v12  ;;  %v265_v22 = vld [vmem:[%s6674_s3 + $0x20] sm:$0xff]  ;;  %v266_v23 = vld [vmem:[%s6674_s3 + $0x28] sm:$0xff]  ;;  %v4869_v25 = vpack.c.bf16 %v137_v20, %v136_v19  ;;  %v267_v29 = vld [vmem:[%s6674_s3 + $0x30] sm:$0xff] }
  0x3f   :  { %86 = vperm.xlu0 %5338, %v73_v7   ;;  %4862 = vmatprep.subr.bf16.mxu0 %v4861_v9  ;;  %v5856_v24 = vld [vmem:[%s6672_s1] sm:$0xff]  ;;  %v139_v27 = vld [vmem:[#allocation4 + $0x48] sm:$0xff]  ;;  %v5861_v28 = vpack.c.bf16 %v266_v23, %v265_v22  ;;  %v268_v30 = vld [vmem:[%s6674_s3 + $0x38] sm:$0xff] }
  0x40   :  { %4891 = vmatpush3.bf16.msra.mxu1 %v5833_v14  ;;  %351 = vrot.lane.b32.xlu1 %v5856_v24, %s5727_s2  ;;  %v138_v26 = vld [vmem:[#allocation4 + $0x40] sm:$0xff]  ;;  %v140_v32 = vld [vmem:[#allocation4 + $0x50] sm:$0xff]  ;;  %v141_v33 = vld [vmem:[#allocation4 + $0x58] sm:$0xff]  ;;  %v5871_v34 = vpack.c.bf16 %v268_v30, %v267_v29 }
  0x41   :  { %4892 = vmatprep.subr.bf16.mxu1 %v5724_v1  ;;  %v4873_v31 = vpack.c.bf16 %v139_v27, %v138_v26  ;;  %v4877_v35 = vpack.c.bf16 %v141_v33, %v140_v32  ;;  %v142_v36 = vld [vmem:[#allocation4 + $0x60] sm:$0xff]  ;;  %v143_v37 = vld [vmem:[#allocation4 + $0x68] sm:$0xff]  ;;  %v144_v39 = vld [vmem:[#allocation4 + $0x70] sm:$0xff] }
  0x42   :  { %4864 = vmatpush3.bf16.msra.mxu0 %v4861_v9  ;;  %v4881_v38 = vpack.c.bf16 %v143_v37, %v142_v36  ;;  %v145_v40 = vld [vmem:[#allocation4 + $0x78] sm:$0xff]  ;;  %v361_v49 = vld [vmem:[#allocation7] sm:$0xff]  ;;  %v460_v11 = vld [vmem:[#allocation7 + $0x10] sm:$0xff] }
  0x43   :  { %4866 = vmatprep.subr.bf16.mxu0 %v4865_v17  ;;  %v4885_v41 = vpack.c.bf16 %v145_v40, %v144_v39  ;;  %v362_v50 = vld [vmem:[#allocation7 + $0x20] sm:$0xff]  ;;  %v462_v12 = vld [vmem:[#allocation7 + $0x30] sm:$0xff]  ;;  %v459_v13 = vld [vmem:[#allocation7 + $0x8] sm:$0xff] }
  0x44   :  { %4894 = vmatpush3.bf16.msra.mxu1 %v5844_v21  ;;  %v363_v51 = vld [vmem:[#allocation7 + $0x40] sm:$0xff]  ;;  %v5895_v52 = vpack.c.bf16 %v362_v50, %v361_v49  ;;  %v5917_v15 = vpack.c.bf16 %v462_v12, %v460_v11  ;;  %v461_v16 = vld [vmem:[#allocation7 + $0x28] sm:$0xff]  ;;  %v466_v19 = vld [vmem:[#allocation7 + $0x70] sm:$0xff] }
  0x45   :  { %4895 = vmatprep.subr.bf16.mxu1 %v5724_v1  ;;  %v364_v53 = vld [vmem:[#allocation7 + $0x60] sm:$0xff]  ;;  %v5919_v20 = vpack.c.bf16 %v461_v16, %v459_v13  ;;  %v463_v23 = vld [vmem:[#allocation7 + $0x48] sm:$0xff]  ;;  %v470_v26 = vld [vmem:[#allocation7 + $0xb0] sm:$0xff] }
  0x46   :  { %4868 = vmatpush3.bf16.msra.mxu0 %v4865_v17  ;;  %v5898_v54 = vpack.c.bf16 %v364_v53, %v363_v51  ;;  %v365_v55 = vld [vmem:[#allocation7 + $0x80] sm:$0xff]  ;;  %v464_v17 = vld [vmem:[#allocation7 + $0x50] sm:$0xff]  ;;  %v467_v30 = vld [vmem:[#allocation7 + $0x88] sm:$0xff] }
  0x47   :  { %4870 = vmatprep.subr.bf16.mxu0 %v4869_v25  ;;  %v366_v56 = vld [vmem:[#allocation7 + $0xa0] sm:$0xff]  ;;  %v5921_v22 = vpack.c.bf16 %v466_v19, %v464_v17  ;;  %v472_v33 = vld [vmem:[#allocation7 + $0xd0] sm:$0xff]  ;;  %v471_v37 = vld [vmem:[#allocation7 + $0xc8] sm:$0xff] }
  0x48   :  { %4897 = vmatpush3.bf16.msra.mxu1 %v5861_v28  ;;  %v5902_v57 = vpack.c.bf16 %v366_v56, %v365_v55  ;;  %v367_v61 = vld [vmem:[#allocation7 + $0xc0] sm:$0xff]  ;;  %v74_v17 = vld [vmem:[%s6671_s0 + $0x10] sm:$0xff] }
  0x49   :  { %4898 = vmatprep.subr.bf16.mxu1 %v5724_v1  ;;  %v368_v62 = vld [vmem:[#allocation7 + $0xe0] sm:$0xff] }
  0x4a   :  { %4872 = vmatpush3.bf16.msra.mxu0 %v4869_v25  ;;  %v5909_v63 = vpack.c.bf16 %v368_v62, %v367_v61  ;;  %v468_v25 = vld [vmem:[#allocation7 + $0x90] sm:$0xff]  ;;  %v581_v61 = vld [vmem:[#allocation7 + $0x58] sm:$0xff]  ;;  %v76_v19 = vld [vmem:[%s6671_s0 + $0x20] sm:$0xff] }
  0x4b   :  { %4874 = vmatprep.subr.bf16.mxu0 %v4873_v31  ;;  %v5929_v29 = vpack.c.bf16 %v470_v26, %v468_v25 }
  0x4c   :  { %4900 = vmatpush3.bf16.msra.mxu1 %v5871_v34 }
  0x4d   :  { %4901 = vmatprep.subr.bf16.mxu1 %v5724_v1 }
  0x4e   :  { %4876 = vmatpush3.bf16.msra.mxu0 %v4873_v31  ;;  %v469_v31 = vld [vmem:[#allocation7 + $0xa8] sm:$0xff] }
  0x4f   :  { %4878 = vmatprep.subr.bf16.mxu0 %v4877_v35  ;;  %4418 = vmatmul.mubr.msk.f32.vlgmr.msra.gmra.mrb[0].mxu1 %vm269_vm1, %v5856_v24  ;;  %v5932_v32 = vpack.c.bf16 %v469_v31, %v467_v30 }
  0x50   :  { %4436 = vmatprep.mubr.msk.f32.mxu1 %vm5725_vm0, %v5726_v18  ;;  %4903 = vmatpush3.bf16.msra.mxu1 %v5895_v52 }
  0x51   :  { %4904 = vmatprep.subr.bf16.mxu1 %v5724_v1 }
  0x52   :  { %4880 = vmatpush3.bf16.msra.mxu0 %v4877_v35  ;;  %v474_v35 = vld [vmem:[#allocation7 + $0xf0] sm:$0xff] }
  0x53   :  { %4882 = vmatprep.subr.bf16.mxu0 %v4881_v38  ;;  %v5936_v36 = vpack.c.bf16 %v474_v35, %v472_v33 }
  0x54   :  { %4906 = vmatpush3.bf16.msra.mxu1 %v5898_v54 }
  0x55   :  { %4907 = vmatprep.subr.bf16.mxu1 %v5724_v1 }
  0x56   :  { %4884 = vmatpush3.bf16.msra.mxu0 %v4881_v38  ;;  %v473_v38 = vld [vmem:[#allocation7 + $0xe8] sm:$0xff] }
  0x57   :  { %4886 = vmatprep.subr.bf16.mxu0 %v4885_v41  ;;  %v5938_v40 = vpack.c.bf16 %v473_v38, %v471_v37 }
  0x58   :  { %4909 = vmatpush3.bf16.msra.mxu1 %v5902_v57 }
  0x59   :  { %4910 = vmatprep.subr.bf16.mxu1 %v5724_v1 }
  0x5a   :  { %4888 = vmatpush3.bf16.msra.mxu0 %v4885_v41 }
  0x5b   :  { %4941 = vmatprep.subr.bf16.mxu0 %v5724_v1 }
  0x5c   :  { %4912 = vmatpush3.bf16.msra.mxu1 %v5909_v63 }
  0x5d   :  { %4914 = vmatprep.subr.bf16.mxu1 %v5917_v15 }
  0xb2   :  { %v352_v0 = vpop.permute.xlu1 %351 }
  0xba   :  { %v84_v44 = vpop.permute.xlu0 %83 }
  0xbb   :  { %vm106_vm2 = vcmp.eq.s32.totalorder %v5882_v43, %v84_v44 }
  0xbc   :  { %4389 = vmatprep.mubr.msk.f32.mxu0 %vm106_vm2, %v5728_v45 }
  0xbe   :  { %v87_v46 = vpop.permute.xlu0 %86 }
  0xbf   :  { %vm107_vm3 = vcmp.eq.s32.totalorder %v5882_v43, %v87_v46 }
  0xc0   :  { %4390 = vmatmul.mubr.msk.f32.vlgmr.msra.gmra.mrb[0].mxu0 %vm107_vm3, %v5728_v45 }
  0xc1   :  { %4943 = vmatpush3.bf16.msra.mxu0 %v5833_v14 }
  0xc2   :  { %4944 = vmatprep.subr.bf16.mxu0 %v5724_v1 }
  0xc5   :  { %4946 = vmatpush3.bf16.msra.mxu0 %v5844_v21 }
  0xc6   :  { %4947 = vmatprep.subr.bf16.mxu0 %v5724_v1 }
  0xc9   :  { %4949 = vmatpush3.bf16.msra.mxu0 %v5861_v28 }
  0xca   :  { %4950 = vmatprep.subr.bf16.mxu0 %v5724_v1 }
  0xcd   :  { %4952 = vmatpush3.bf16.msra.mxu0 %v5871_v34 }
  0xce   :  { %4966 = vmatprep.subr.bf16.mxu0 %v5917_v15 }
 0x122   :  { %v339_v47 = vpop.f32.mrb[0].mxu1 }
 0x123   :  { %v4419_v48 = vpop.f32.mrb[1].mxu1 }
 0x193   :  { %v5907_v58 = vpop.f32.mrb[0].mxu0 }
 0x194   :  { %v212_v59 = vpop.f32.mrb[1].mxu0 }
 0x195   :  { %v343_v60 = vadd.f32 %v339_v47, %v212_v59  ;;  %v579_v59 = vld [vmem:[#allocation7 + $0x18] sm:$0xff] }
 0x197   :  { %5340 = vtanh.f32 %v343_v60  ;;  %v4038_v4 = vmul.f32 -1.442695, %v343_v60  ;;  %v580_v60 = vld [vmem:[#allocation7 + $0x38] sm:$0xff] }
 0x198   :  { %v5952_v62 = vpack.c.bf16 %v580_v60, %v579_v59 }
 0x199   :  { %5342 = vpow2.f32 %v4038_v4  ;;  %v584_v4 = vld [vmem:[#allocation7 + $0xb8] sm:$0xff] }
 0x1a1   :  { %v5341_v2 = vpop.eup %5340 }
 0x1a2   :  { %v354_v3 = vsub.f32 %v5341_v2, %v352_v0  ;;  %v582_v0 = vld [vmem:[#allocation7 + $0x78] sm:$0xff] }
 0x1a3   :  { %v5343_v5 = vpop.eup %5342  ;;  %v5955_v2 = vpack.c.bf16 %v582_v0, %v581_v61 }
 0x1a4   :  { %356 = vrot.lane.b32.xlu1 %v354_v3, %s5727_s2  ;;  %v347_v6 = vadd.f32 1.0, %v5343_v5  ;;  %v583_v3 = vld [vmem:[#allocation7 + $0x98] sm:$0xff] }
 0x1a5   :  { %v5959_v5 = vpack.c.bf16 %v584_v4, %v583_v3 }
 0x1a6   :  { %5344 = vrcp.f32 %v347_v6  ;;  %v585_v6 = vld [vmem:[#allocation7 + $0xd8] sm:$0xff] }
 0x1b0   :  { %v5345_v7 = vpop.eup %5344 }
 0x216   :  { %v357_v8 = vpop.permute.xlu1 %356 }
 0x217   :  { %v359_v9 = vmul.f32 %v5345_v7, %v357_v8  ;;  %v586_v7 = vld [vmem:[#allocation7 + $0xf8] sm:$0xff] }
 0x218   :  { %v5964_v8 = vpack.c.bf16 %v586_v7, %v585_v6 }
 0x219   :  { %v360_v10 = vadd.f32 %v359_v9, %v5856_v24  ;;  %v465_v24 = vld [vmem:[#allocation7 + $0x68] sm:$0xff] }
 0x21a   :  { %v5926_v27 = vpack.c.bf16 %v465_v24, %v463_v23  ;;  %v78_v24 = vld [vmem:[%s6671_s0 + $0x30] sm:$0xff] }
 0x21b   :  { %449 = vrot.lane.b32.xlu0 %v360_v10, %s5727_s2  ;;  %4437 = vmatmul.mubr.msk.f32.vlgmr.msra.gmra.mrb[2].mxu1 %vm269_vm1, %v360_v10 }
 0x21c   :  { %542 = vmatprep.mubr.f32.mxu1 %v5726_v18  ;;  %4916 = vmatpush1.bf16.msra.mxu1 %v5919_v20 }
 0x21d   :  { %4918 = vmatprep.subr.bf16.mxu1 %v5921_v22 }
 0x220   :  { %4920 = vmatpush1.bf16.msra.mxu1 %v5926_v27 }
 0x221   :  { %4922 = vmatprep.subr.bf16.mxu1 %v5929_v29 }
 0x224   :  { %4924 = vmatpush1.bf16.msra.mxu1 %v5932_v32 }
 0x225   :  { %4926 = vmatprep.subr.bf16.mxu1 %v5936_v36 }
 0x228   :  { %4928 = vmatpush1.bf16.msra.mxu1 %v5938_v40 }
 0x229   :  { %4929 = vmatprep.subr.bf16.mxu1 %v5724_v1 }
 0x28d   :  { %v450_v46 = vpop.permute.xlu0 %449 }
 0x2ee   :  { %v438_v39 = vpop.f32.mrb[2].mxu1 }
 0x2ef   :  { %5346 = vtanh.f32 %v438_v39  ;;  %v4438_v41 = vpop.f32.mrb[3].mxu1  ;;  %v4040_v48 = vmul.f32 -1.442695, %v438_v39 }
 0x2f1   :  { %5348 = vpow2.f32 %v4040_v48 }
 0x2f9   :  { %v5347_v44 = vpop.eup %5346 }
 0x2fa   :  { %v452_v47 = vsub.f32 %v5347_v44, %v450_v46  ;;  %v75_v44 = vld [vmem:[%s6671_s0 + $0x18] sm:$0xff]  ;;  %v77_v46 = vld [vmem:[%s6671_s0 + $0x28] sm:$0xff] }
 0x2fb   :  { %v5349_v49 = vpop.eup %5348 }
 0x2fc   :  { %454 = vrot.lane.b32.xlu1 %v452_v47, %s5727_s2  ;;  %v445_v50 = vadd.f32 1.0, %v5349_v49  ;;  %v79_v47 = vld [vmem:[%s6671_s0 + $0x38] sm:$0xff]  ;;  %s4005_s0 = sshll.u32 %s5729_s18, 4  ;;  %s4006_s0 = int_to_ptr.vmem [resolvable:$true] %s4005_s0 }
 0x2fd   :  { %s5662_s19 = scalar_lea.vmem %s4006_s0, 128  ;;  %p5667_p11 = scmp.lt.s32.totalorder %s4006_s0, %s4006_s0 }
 0x2fe   :  { %5350 = vrcp.f32 %v445_v50  ;;  %p5663_p10 = scmp.ne.s32.totalorder %s4006_s0, %s5662_s19  ;;  %p5668_p12 = scmp.lt.s32.totalorder %s5662_s19, %s5662_s19 }
 0x300   :  { %p5669_p13 = por %p5668_p12, %p5667_p11 }
 0x302   :  { %p5670_p0 = pnand %p5669_p13, %p5663_p10 }
 0x308   :  { %v5351_v51 = vpop.eup %5350 }
 0x36e   :  { %v455_v53 = vpop.permute.xlu1 %454 }
 0x36f   :  { %v457_v55 = vmul.f32 %v5351_v51, %v455_v53 }
 0x371   :  { %v5944_v56 = vadd.f32 %v457_v55, %v360_v10 }
 0x373   :  { %556 = vrot.lane.b32.xlu0 %v5944_v56, %s5727_s2  ;;  %4041 = vmatmul.mubr.msk.f32.vlgmr.msra.gmra.mrb[4].mxu1 %vm269_vm1, %v5944_v56 }
 0x374   :  { %4455 = vmatprep.mubr.msk.f32.mxu1 %vm5725_vm0, %v5726_v18  ;;  %4931 = vmatpush3.bf16.msra.mxu1 %v5952_v62 }
 0x375   :  { %4932 = vmatprep.subr.bf16.mxu1 %v5724_v1 }
 0x378   :  { %4934 = vmatpush3.bf16.msra.mxu1 %v5955_v2 }
 0x379   :  { %4935 = vmatprep.subr.bf16.mxu1 %v5724_v1 }
 0x37c   :  { %4937 = vmatpush3.bf16.msra.mxu1 %v5959_v5 }
 0x37d   :  { %4938 = vmatprep.subr.bf16.mxu1 %v5724_v1 }
 0x380   :  { %4940 = vmatpush3.bf16.msra.mxu1 %v5964_v8 }
 0x381   :  { %4953 = vmatprep.subr.bf16.mxu1 %v5724_v1 }
 0x3e5   :  { %v557_v12 = vpop.permute.xlu0 %556 }
 0x446   :  { %v544_v9 = vpop.f32.mrb[4].mxu1 }
 0x447   :  { %v555_v10 = vmax.f32 %v544_v9, 0.0  ;;  %v546_v11 = vpop.f32.mrb[5].mxu1  ;;  %v4042_v31 = vmul.f32 -1.442695, %v544_v9 }
 0x448   :  { %v4043_v13 = vmul.f32 -1.442695, %v546_v11 }
 0x449   :  { %v559_v16 = vsub.f32 %v555_v10, %v557_v12 }
 0x44a   :  { %5352 = vpow2.f32 %v4043_v13 }
 0x44b   :  { %561 = vrot.lane.b32.xlu1 %v559_v16, %s5727_s2 }
 0x44f   :  { %89 = vperm.xlu1 %5339, %v74_v17  }
 0x453   :  { %95 = vperm.xlu1 %5339, %v76_v19  }
 0x454   :  { %v5353_v23 = vpop.eup %5352 }
 0x455   :  { %v569_v25 = vadd.f32 1.0, %v5353_v23 }
 0x457   :  { %5354 = vrcp.f32 %v569_v25  ;;  %101 = vperm.xlu1 %5339, %v78_v24  }
 0x458   :  { %5356 = vpow2.f32 %v4042_v31 }
 0x461   :  { %v5355_v26 = vpop.eup %5354 }
 0x462   :  { %v572_v30 = vsub.f32 %v5355_v26, %v557_v12  ;;  %v5357_v33 = vpop.eup %5356 }
 0x463   :  { %v552_v35 = vadd.f32 1.0, %v5357_v33 }
 0x464   :  { %574 = vrot.lane.b32.xlu1 %v572_v30, %s5727_s2 }
 0x465   :  { %5358 = vrcp.f32 %v552_v35 }
 0x46f   :  { %v5359_v37 = vpop.eup %5358 }
 0x4bd   :  { %v562_v38 = vpop.permute.xlu1 %561 }
 0x4be   :  { %v564_v39 = vmul.f32 %v5359_v37, %v562_v38 }
 0x4c0   :  { %v565_v41 = vadd.f32 %v564_v39, %v5944_v56 }
 0x4c2   :  { %666 = vrot.lane.b32.xlu0 %v565_v41, %s5727_s2  ;;  %4456 = vmatmul.mubr.msk.f32.vlgmr.msra.gmra.mrb[6].mxu1 %vm269_vm1, %v565_v41 }
 0x4c3   :  { %4955 = vmatpush3.bf16.msra.mxu1 %v5895_v52  ;;  %4493 = vmatprep.mubr.msk.f32.mxu1 %vm5725_vm0, %v5726_v18 }
 0x4c4   :  { %4956 = vmatprep.subr.bf16.mxu1 %v5724_v1 }
 0x4c6   :  { %92 = vperm.xlu0 %5338, %v75_v44  }
 0x4c7   :  { %4958 = vmatpush3.bf16.msra.mxu1 %v5898_v54 }
 0x4c8   :  { %4959 = vmatprep.subr.bf16.mxu1 %v5724_v1 }
 0x4ca   :  { %98 = vperm.xlu0 %5338, %v77_v46  }
 0x4cb   :  { %4961 = vmatpush3.bf16.msra.mxu1 %v5902_v57 }
 0x4cc   :  { %4962 = vmatprep.subr.bf16.mxu1 %v5724_v1 }
 0x4ce   :  { %v90_v48 = vpop.permute.xlu1 %89  ;;  %104 = vperm.xlu0 %5338, %v79_v47  }
 0x4cf   :  { %vm108_vm4 = vcmp.eq.s32.totalorder %v5882_v43, %v90_v48  ;;  %4964 = vmatpush3.bf16.msra.mxu1 %v5909_v63 }
 0x4d0   :  { %4392 = vmatprep.mubr.msk.f32.mxu0 %vm108_vm4, %v5728_v45  ;;  %4981 = vmatprep.subr.bf16.mxu1 %v5724_v1 }
 0x4d2   :  { %v96_v50 = vpop.permute.xlu1 %95 }
 0x4d3   :  { %vm110_vm5 = vcmp.eq.s32.totalorder %v5882_v43, %v96_v50 }
 0x4d6   :  { %v102_v53 = vpop.permute.xlu1 %101 }
 0x4d7   :  { %vm112_vm7 = vcmp.eq.s32.totalorder %v5882_v43, %v102_v53 }
 0x4da   :  { %v575_v7 = vpop.permute.xlu1 %574 }
 0x4db   :  { %v577_v9 = vmul.f32 %v5355_v26, %v575_v7 }
 0x4dd   :  { %v578_v10 = vadd.f32 %v577_v9, %v5944_v56 }
 0x534   :  { %v667_v49 = vpop.permute.xlu0 %666 }
 0x545   :  { %v93_v51 = vpop.permute.xlu0 %92 }
 0x546   :  { %vm109_vm6 = vcmp.eq.s32.totalorder %v5882_v43, %v93_v51 }
 0x547   :  { %4393 = vmatmul.mubr.msk.f32.gmra.mrb[2].mxu0 %vm109_vm6, %v5728_v45 }
 0x548   :  { %4395 = vmatprep.mubr.msk.f32.mxu0 %vm110_vm5, %v5728_v45 }
 0x549   :  { %v99_v55 = vpop.permute.xlu0 %98 }
 0x54a   :  { %vm111_vm8 = vcmp.eq.s32.totalorder %v5882_v43, %v99_v55 }
 0x54b   :  { %4396 = vmatmul.mubr.msk.f32.gmra.mrb[4].mxu0 %vm111_vm8, %v5728_v45 }
 0x54c   :  { %4398 = vmatprep.mubr.msk.f32.mxu0 %vm112_vm7, %v5728_v45 }
 0x54d   :  { %v105_v59 = vpop.permute.xlu0 %104 }
 0x54e   :  { %vm113_vm9 = vcmp.eq.s32.totalorder %v5882_v43, %v105_v59 }
 0x54f   :  { %4399 = vmatmul.mubr.msk.f32.gmra.mrb[6].mxu0 %vm113_vm9, %v5728_v45  ;;  %v676_v45 = vadd.f32 %v565_v41, %v5944_v56 }
 0x550   :  { %4474 = vmatprep.mubr.msk.f32.mxu0 %vm5725_vm0, %v5726_v18 }
 0x551   :  { %v677_v13 = vadd.f32 %v676_v45, %v578_v10 }
 0x595   :  { %v656_v60 = vpop.f32.mrb[6].mxu1 }
 0x596   :  { %v669_v61 = vsub.f32 %v656_v60, %v667_v49  ;;  %v4457_v0 = vpop.f32.mrb[7].mxu1  ;;  %v4045_v3 = vmul.f32 -1.442695, %v656_v60 }
 0x598   :  { %671 = vrot.lane.b32.xlu0 %v669_v61, %s5727_s2  ;;  %5360 = vpow2.f32 %v4045_v3 }
 0x5a2   :  { %v5361_v4 = vpop.eup %5360 }
 0x5a3   :  { %v663_v6 = vadd.f32 1.0, %v5361_v4 }
 0x5a5   :  { %5362 = vrcp.f32 %v663_v6 }
 0x5af   :  { %v5363_v43 = vpop.eup %5362 }
 0x60a   :  { %v672_v11 = vpop.permute.xlu0 %671 }
 0x60b   :  { %v674_v12 = vmul.f32 %v5363_v43, %v672_v11 }
 0x60d   :  { %v675_v16 = vadd.f32 %v674_v12, %v565_v41 }
 0x60f   :  { %v678_v17 = vadd.f32 %v677_v13, %v675_v16 }
 0x611   :  { %v679_v19 = vmul.f32 0.25, %v678_v17 }
 0x613   :  { %680 = vst.msk [vmem:[#allocation3] sm:$0xff] %vm269_vm1, %v679_v19  ;;  %772 = vrot.lane.b32.xlu1 %v679_v19, %s5727_s2  ;;  %4475 = vmatmul.mubr.msk.f32.vlgmr.msra.gmra.mrb[8].mxu0 %vm269_vm1, %v679_v19 }
 0x614   :  { %4968 = vmatpush1.bf16.msra.mxu0 %v5919_v20  ;;  %963 = vmatprep.mubr.f32.mxu0 %v5726_v18 }
 0x615   :  { %4970 = vmatprep.subr.bf16.mxu0 %v5921_v22 }
 0x618   :  { %4972 = vmatpush1.bf16.msra.mxu0 %v5926_v27 }
 0x619   :  { %4974 = vmatprep.subr.bf16.mxu0 %v5929_v29 }
 0x61a   :  { %v6026_v56 = vpop.f32.mrb[2].mxu0 }
 0x61b   :  { %v6028_v23 = vpop.f32.mrb[3].mxu0 }
 0x61c   :  { %4976 = vmatpush1.bf16.msra.mxu0 %v5932_v32 }
 0x61d   :  { %4978 = vmatprep.subr.bf16.mxu0 %v5936_v36 }
 0x61e   :  { %v6032_v24 = vpop.f32.mrb[4].mxu0 }
 0x61f   :  { %v6034_v25 = vpop.f32.mrb[5].mxu0 }
 0x620   :  { %4980 = vmatpush1.bf16.msra.mxu0 %v5938_v40 }
 0x621   :  { %4993 = vmatprep.subr.bf16.mxu0 %v5724_v1 }
 0x622   :  { %v6038_v26 = vpop.f32.mrb[6].mxu0 }
 0x623   :  { %v6040_v30 = vpop.f32.mrb[7].mxu0 }
 0x685   :  { %v773_v38 = vpop.permute.xlu1 %772 }
 0x6e6   :  { %v760_v31 = vpop.f32.mrb[8].mxu0 }
 0x6e7   :  { %v764_v33 = vadd.f32 %v5907_v58, %v760_v31  ;;  %v4476_v35 = vpop.f32.mrb[9].mxu0 }
 0x6e9   :  { %5364 = vtanh.f32 %v764_v33  ;;  %v4047_v41 = vmul.f32 -1.442695, %v764_v33 }
 0x6eb   :  { %5366 = vpow2.f32 %v4047_v41 }
 0x6f3   :  { %v5365_v37 = vpop.eup %5364 }
 0x6f4   :  { %v775_v39 = vsub.f32 %v5365_v37, %v773_v38 }
 0x6f5   :  { %v5367_v44 = vpop.eup %5366 }
 0x6f6   :  { %777 = vrot.lane.b32.xlu0 %v775_v39, %s5727_s2  ;;  %v768_v46 = vadd.f32 1.0, %v5367_v44 }
 0x6f8   :  { %5368 = vrcp.f32 %v768_v46 }
 0x702   :  { %v5369_v47 = vpop.eup %5368 }
 0x768   :  { %v778_v48 = vpop.permute.xlu0 %777 }
 0x769   :  { %v780_v49 = vmul.f32 %v5369_v47, %v778_v48 }
 0x76b   :  { %v781_v50 = vadd.f32 %v780_v49, %v679_v19 }
 0x76d   :  { %870 = vrot.lane.b32.xlu1 %v781_v50, %s5727_s2  ;;  %4494 = vmatmul.mubr.msk.f32.vlgmr.msra.gmra.mrb[8].mxu1 %vm269_vm1, %v781_v50 }
 0x76e   :  { %4983 = vmatpush3.bf16.msra.mxu1 %v5952_v62  ;;  %4512 = vmatprep.mubr.msk.f32.mxu1 %vm5725_vm0, %v5726_v18 }
 0x76f   :  { %4984 = vmatprep.subr.bf16.mxu1 %v5724_v1 }
 0x772   :  { %4986 = vmatpush3.bf16.msra.mxu1 %v5955_v2 }
 0x773   :  { %4987 = vmatprep.subr.bf16.mxu1 %v5724_v1 }
 0x776   :  { %4989 = vmatpush3.bf16.msra.mxu1 %v5959_v5 }
 0x777   :  { %4990 = vmatprep.subr.bf16.mxu1 %v5724_v1 }
 0x77a   :  { %4992 = vmatpush3.bf16.msra.mxu1 %v5964_v8 }
 0x77b   :  { %5005 = vmatprep.subr.bf16.mxu1 %v5724_v1 }
 0x7df   :  { %v871_v55 = vpop.permute.xlu1 %870 }
 0x840   :  { %v859_v58 = vpop.f32.mrb[8].mxu1 }
 0x841   :  { %5370 = vtanh.f32 %v859_v58  ;;  %v4495_v51 = vpop.f32.mrb[9].mxu1  ;;  %v4049_v60 = vmul.f32 -1.442695, %v859_v58 }
 0x843   :  { %5372 = vpow2.f32 %v4049_v60 }
 0x84b   :  { %v5371_v53 = vpop.eup %5370 }
 0x84c   :  { %v873_v59 = vsub.f32 %v5371_v53, %v871_v55 }
 0x84d   :  { %v5373_v61 = vpop.eup %5372 }
 0x84e   :  { %875 = vrot.lane.b32.xlu0 %v873_v59, %s5727_s2  ;;  %v866_v0 = vadd.f32 1.0, %v5373_v61 }
 0x850   :  { %5374 = vrcp.f32 %v866_v0 }
 0x85a   :  { %v5375_v3 = vpop.eup %5374 }
 0x8c0   :  { %v876_v4 = vpop.permute.xlu0 %875 }
 0x8c1   :  { %v878_v6 = vmul.f32 %v5375_v3, %v876_v4 }
 0x8c3   :  { %v879_v7 = vadd.f32 %v878_v6, %v781_v50 }
 0x8c5   :  { %977 = vrot.lane.b32.xlu1 %v879_v7, %s5727_s2  ;;  %4050 = vmatmul.mubr.msk.f32.vlgmr.msra.gmra.mrb[10].mxu0 %vm269_vm1, %v879_v7 }
 0x8c6   :  { %4995 = vmatpush3.bf16.msra.mxu0 %v5833_v14  ;;  %4531 = vmatprep.mubr.msk.f32.mxu0 %vm5725_vm0, %v5726_v18 }
 0x8c7   :  { %4996 = vmatprep.subr.bf16.mxu0 %v5724_v1 }
 0x8ca   :  { %4998 = vmatpush3.bf16.msra.mxu0 %v5844_v21 }
 0x8cb   :  { %4999 = vmatprep.subr.bf16.mxu0 %v5724_v1 }
 0x8ce   :  { %5001 = vmatpush3.bf16.msra.mxu0 %v5861_v28 }
 0x8cf   :  { %5002 = vmatprep.subr.bf16.mxu0 %v5724_v1 }
 0x8d2   :  { %5004 = vmatpush3.bf16.msra.mxu0 %v5871_v34 }
 0x8d3   :  { %5018 = vmatprep.subr.bf16.mxu0 %v5917_v15 }
 0x937   :  { %v978_v43 = vpop.permute.xlu1 %977 }
 0x998   :  { %v965_v9 = vpop.f32.mrb[10].mxu0 }
 0x999   :  { %v976_v10 = vmax.f32 %v965_v9, 0.0  ;;  %v967_v14 = vpop.f32.mrb[11].mxu0  ;;  %v4051_v16 = vmul.f32 -1.442695, %v965_v9 }
 0x99a   :  { %v4052_v11 = vmul.f32 -1.442695, %v967_v14 }
 0x99b   :  { %v980_v45 = vsub.f32 %v976_v10, %v978_v43 }
 0x99c   :  { %5376 = vpow2.f32 %v4052_v11 }
 0x99d   :  { %982 = vrot.lane.b32.xlu0 %v980_v45, %s5727_s2 }
 0x9a6   :  { %v5377_v21 = vpop.eup %5376 }
 0x9a7   :  { %v990_v12 = vadd.f32 1.0, %v5377_v21 }
 0x9a9   :  { %5378 = vrcp.f32 %v990_v12 }
 0x9aa   :  { %5380 = vpow2.f32 %v4051_v16 }
 0x9b3   :  { %v5379_v13 = vpop.eup %5378 }
 0x9b4   :  { %v993_v28 = vsub.f32 %v5379_v13, %v978_v43  ;;  %v5381_v34 = vpop.eup %5380 }
 0x9b5   :  { %v973_v15 = vadd.f32 1.0, %v5381_v34 }
 0x9b6   :  { %995 = vrot.lane.b32.xlu0 %v993_v28, %s5727_s2 }
 0x9b7   :  { %5382 = vrcp.f32 %v973_v15 }
 0x9c1   :  { %v5383_v17 = vpop.eup %5382 }
 0xa0f   :  { %v983_v19 = vpop.permute.xlu0 %982 }
 0xa10   :  { %v985_v31 = vmul.f32 %v5383_v17, %v983_v19 }
 0xa12   :  { %v986_v33 = vadd.f32 %v985_v31, %v879_v7 }
 0xa14   :  { %1087 = vrot.lane.b32.xlu1 %v986_v33, %s5727_s2  ;;  %4513 = vmatmul.mubr.msk.f32.vlgmr.msra.gmra.mrb[10].mxu1 %vm269_vm1, %v986_v33  ;;  %v1097_v49 = vadd.f32 %v986_v33, %v879_v7 }
 0xa15   :  { %5007 = vmatpush3.bf16.msra.mxu1 %v5895_v52  ;;  %4550 = vmatprep.mubr.msk.f32.mxu1 %vm5725_vm0, %v5726_v18 }
 0xa16   :  { %5008 = vmatprep.subr.bf16.mxu1 %v5724_v1 }
 0xa19   :  { %5010 = vmatpush3.bf16.msra.mxu1 %v5898_v54 }
 0xa1a   :  { %5011 = vmatprep.subr.bf16.mxu1 %v5724_v1 }
 0xa1d   :  { %5013 = vmatpush3.bf16.msra.mxu1 %v5902_v57 }
 0xa1e   :  { %5014 = vmatprep.subr.bf16.mxu1 %v5724_v1 }
 0xa21   :  { %5016 = vmatpush3.bf16.msra.mxu1 %v5909_v63 }
 0xa22   :  { %5033 = vmatprep.subr.bf16.mxu1 %v5724_v1 }
 0xa28   :  { %v996_v44 = vpop.permute.xlu0 %995 }
 0xa29   :  { %v998_v46 = vmul.f32 %v5379_v13, %v996_v44 }
 0xa2b   :  { %v999_v57 = vadd.f32 %v998_v46, %v879_v7  ;;  %v1530_v46 = vld [vmem:[%s6674_s3 + $0x18] sm:$0xff] }
 0xa2d   :  { %v1098_v50 = vadd.f32 %v1097_v49, %v999_v57 }
 0xa86   :  { %v1088_v35 = vpop.permute.xlu1 %1087 }
 0xae7   :  { %v1077_v37 = vpop.f32.mrb[10].mxu1 }
 0xae8   :  { %v1090_v52 = vsub.f32 %v1077_v37, %v1088_v35  ;;  %v4514_v38 = vpop.f32.mrb[11].mxu1  ;;  %v4054_v39 = vmul.f32 -1.442695, %v1077_v37 }
 0xaea   :  { %1092 = vrot.lane.b32.xlu1 %v1090_v52, %s5727_s2  ;;  %5384 = vpow2.f32 %v4054_v39  ;;  %v1527_v39 = vld [vmem:[%s6674_s3] sm:$0xff] }
 0xaf4   :  { %v5385_v41 = vpop.eup %5384 }
 0xaf5   :  { %v1084_v54 = vadd.f32 1.0, %v5385_v41  ;;  %v1528_v41 = vld [vmem:[%s6674_s3 + $0x8] sm:$0xff] }
 0xaf6   :  { %v6135_v44 = vpack.c.bf16 %v1528_v41, %v1527_v39  ;;  %v1724_v39 = vld [vmem:[#allocation7 + $0x8] sm:$0xff] }
 0xaf7   :  { %5386 = vrcp.f32 %v1084_v54  ;;  %v1529_v54 = vld [vmem:[%s6674_s3 + $0x10] sm:$0xff] }
 0xaf8   :  { %v6141_v57 = vpack.c.bf16 %v1530_v46, %v1529_v54  ;;  %v1726_v54 = vld [vmem:[#allocation7 + $0x28] sm:$0xff]  ;;  %v1729_v46 = vld [vmem:[#allocation7 + $0x50] sm:$0xff] }
 0xb01   :  { %v5387_v47 = vpop.eup %5386 }
 0xb5c   :  { %v1093_v48 = vpop.permute.xlu1 %1092 }
 0xb5d   :  { %v1095_v63 = vmul.f32 %v5387_v47, %v1093_v48  ;;  %v1531_v47 = vld [vmem:[%s6674_s3 + $0x20] sm:$0xff]  ;;  %v1532_v48 = vld [vmem:[%s6674_s3 + $0x28] sm:$0xff] }
 0xb5e   :  { %v6152_v49 = vpack.c.bf16 %v1532_v48, %v1531_v47  ;;  %v1731_v47 = vld [vmem:[#allocation7 + $0x70] sm:$0xff]  ;;  %v6196_v48 = vpack.c.bf16 %v1726_v54, %v1724_v39 }
 0xb5f   :  { %v1096_v58 = vadd.f32 %v1095_v63, %v986_v33  ;;  %v1533_v63 = vld [vmem:[%s6674_s3 + $0x30] sm:$0xff] }
 0xb61   :  { %v1099_v51 = vadd.f32 %v1098_v50, %v1096_v58  ;;  %v1534_v50 = vld [vmem:[%s6674_s3 + $0x38] sm:$0xff] }
 0xb62   :  { %v6162_v58 = vpack.c.bf16 %v1534_v50, %v1533_v63  ;;  %v6198_v63 = vpack.c.bf16 %v1731_v47, %v1729_v46  ;;  %v1728_v50 = vld [vmem:[#allocation7 + $0x48] sm:$0xff] }
 0xb63   :  { %v1100_v53 = vmul.f32 0.25, %v1099_v51 }
 0xb65   :  { %1102 = vst.msk [vmem:[#allocation3 + $0x8] sm:$0xff] %vm269_vm1, %v1100_v53  ;;  %1194 = vrot.lane.b32.xlu0 %v1100_v53, %s5727_s2  ;;  %4532 = vmatmul.mubr.msk.f32.vlgmr.msra.gmra.mrb[12].mxu0 %vm269_vm1, %v1100_v53 }
 0xb66   :  { %5020 = vmatpush1.bf16.msra.mxu0 %v5919_v20  ;;  %1385 = vmatprep.mubr.f32.mxu0 %v5726_v18 }
 0xb67   :  { %5022 = vmatprep.subr.bf16.mxu0 %v5921_v22 }
 0xb6a   :  { %5024 = vmatpush1.bf16.msra.mxu0 %v5926_v27 }
 0xb6b   :  { %5026 = vmatprep.subr.bf16.mxu0 %v5929_v29 }
 0xb6e   :  { %5028 = vmatpush1.bf16.msra.mxu0 %v5932_v32 }
 0xb6f   :  { %5030 = vmatprep.subr.bf16.mxu0 %v5936_v36 }
 0xb72   :  { %5032 = vmatpush1.bf16.msra.mxu0 %v5938_v40 }
 0xb73   :  { %5045 = vmatprep.subr.bf16.mxu0 %v5724_v1 }
 0xbd7   :  { %v1195_v61 = vpop.permute.xlu0 %1194 }
 0xc38   :  { %v1182_v55 = vpop.f32.mrb[12].mxu0 }
 0xc39   :  { %v1186_v59 = vadd.f32 %v1182_v55, %v6028_v23  ;;  %v4533_v20 = vpop.f32.mrb[13].mxu0 }
 0xc3b   :  { %5388 = vtanh.f32 %v1186_v59  ;;  %v4056_v27 = vmul.f32 -1.442695, %v1186_v59 }
 0xc3d   :  { %5390 = vpow2.f32 %v4056_v27 }
 0xc45   :  { %v5389_v60 = vpop.eup %5388 }
 0xc46   :  { %v1197_v22 = vsub.f32 %v5389_v60, %v1195_v61 }
 0xc47   :  { %v5391_v29 = vpop.eup %5390 }
 0xc48   :  { %1199 = vrot.lane.b32.xlu1 %v1197_v22, %s5727_s2  ;;  %v1190_v32 = vadd.f32 1.0, %v5391_v29 }
 0xc4a   :  { %5392 = vrcp.f32 %v1190_v32 }
 0xc54   :  { %v5393_v36 = vpop.eup %5392 }
 0xcba   :  { %v1200_v0 = vpop.permute.xlu1 %1199 }
 0xcbb   :  { %v1202_v40 = vmul.f32 %v5393_v36, %v1200_v0 }
 0xcbd   :  { %v1203_v3 = vadd.f32 %v1202_v40, %v1100_v53 }
 0xcbf   :  { %1292 = vrot.lane.b32.xlu0 %v1203_v3, %s5727_s2  ;;  %4551 = vmatmul.mubr.msk.f32.vlgmr.msra.gmra.mrb[12].mxu1 %vm269_vm1, %v1203_v3 }
 0xcc0   :  { %5035 = vmatpush3.bf16.msra.mxu1 %v5952_v62  ;;  %4569 = vmatprep.mubr.msk.f32.mxu1 %vm5725_vm0, %v5726_v18 }
 0xcc1   :  { %5036 = vmatprep.subr.bf16.mxu1 %v5724_v1 }
 0xcc4   :  { %5038 = vmatpush3.bf16.msra.mxu1 %v5955_v2 }
 0xcc5   :  { %5039 = vmatprep.subr.bf16.mxu1 %v5724_v1 }
 0xcc8   :  { %5041 = vmatpush3.bf16.msra.mxu1 %v5959_v5 }
 0xcc9   :  { %5042 = vmatprep.subr.bf16.mxu1 %v5724_v1 }
 0xccc   :  { %5044 = vmatpush3.bf16.msra.mxu1 %v5964_v8 }
 0xccd   :  { %5057 = vmatprep.subr.bf16.mxu1 %v5724_v1 }
 0xd31   :  { %v1293_v6 = vpop.permute.xlu0 %1292 }
 0xd92   :  { %v1281_v23 = vpop.f32.mrb[12].mxu1 }
 0xd93   :  { %5394 = vtanh.f32 %v1281_v23  ;;  %v4552_v62 = vpop.f32.mrb[13].mxu1  ;;  %v4058_v9 = vmul.f32 -1.442695, %v1281_v23 }
 0xd95   :  { %5396 = vpow2.f32 %v4058_v9  ;;  %v1628_v9 = vld [vmem:[#allocation7 + $0x40] sm:$0xff] }
 0xd9d   :  { %v5395_v4 = vpop.eup %5394 }
 0xd9e   :  { %v1295_v7 = vsub.f32 %v5395_v4, %v1293_v6  ;;  %v1626_v6 = vld [vmem:[#allocation7] sm:$0xff] }
 0xd9f   :  { %v5397_v2 = vpop.eup %5396 }
 0xda0   :  { %1297 = vrot.lane.b32.xlu1 %v1295_v7, %s5727_s2  ;;  %v1288_v10 = vadd.f32 1.0, %v5397_v2  ;;  %v1627_v7 = vld [vmem:[#allocation7 + $0x20] sm:$0xff] }
 0xda1   :  { %v6172_v2 = vpack.c.bf16 %v1627_v7, %v1626_v6 }
 0xda2   :  { %5398 = vrcp.f32 %v1288_v10  ;;  %v1629_v10 = vld [vmem:[#allocation7 + $0x60] sm:$0xff] }
 0xdac   :  { %v5399_v5 = vpop.eup %5398 }
 0xe12   :  { %v1298_v14 = vpop.permute.xlu1 %1297 }
 0xe13   :  { %v1300_v43 = vmul.f32 %v5399_v5, %v1298_v14  ;;  %v6175_v5 = vpack.c.bf16 %v1629_v10, %v1628_v9  ;;  %v1630_v14 = vld [vmem:[#allocation7 + $0x80] sm:$0xff] }
 0xe15   :  { %v6111_v11 = vadd.f32 %v1300_v43, %v1203_v3  ;;  %v1631_v43 = vld [vmem:[#allocation7 + $0xa0] sm:$0xff] }
 0xe17   :  { %1399 = vrot.lane.b32.xlu0 %v6111_v11, %s5727_s2  ;;  %4059 = vmatmul.mubr.msk.f32.vlgmr.msra.gmra.mrb[14].mxu0 %vm269_vm1, %v6111_v11 }
 0xe18   :  { %4588 = vmatprep.mubr.msk.f32.mxu0 %vm5725_vm0, %v5726_v18  ;;  %5047 = vmatpush3.bf16.msra.mxu0 %v6135_v44 }
 0xe19   :  { %5048 = vmatprep.subr.bf16.mxu0 %v5724_v1 }
 0xe1c   :  { %5050 = vmatpush3.bf16.msra.mxu0 %v6141_v57 }
 0xe1d   :  { %5051 = vmatprep.subr.bf16.mxu0 %v5724_v1 }
 0xe20   :  { %5053 = vmatpush3.bf16.msra.mxu0 %v6152_v49 }
 0xe21   :  { %5054 = vmatprep.subr.bf16.mxu0 %v5724_v1 }
 0xe24   :  { %5056 = vmatpush3.bf16.msra.mxu0 %v6162_v58 }
 0xe89   :  { %v1400_v12 = vpop.permute.xlu0 %1399 }
 0xeea   :  { %v1387_v8 = vpop.f32.mrb[14].mxu0 }
 0xeeb   :  { %v1398_v45 = vmax.f32 %v1387_v8, 0.0  ;;  %v1389_v21 = vpop.f32.mrb[15].mxu0  ;;  %v4060_v19 = vmul.f32 -1.442695, %v1387_v8 }
 0xeec   :  { %v4061_v13 = vmul.f32 -1.442695, %v1389_v21 }
 0xeed   :  { %v1402_v28 = vsub.f32 %v1398_v45, %v1400_v12 }
 0xeee   :  { %5400 = vpow2.f32 %v4061_v13  ;;  %v1633_v13 = vld [vmem:[#allocation7 + $0xe0] sm:$0xff] }
 0xeef   :  { %1404 = vrot.lane.b32.xlu1 %v1402_v28, %s5727_s2 }
 0xef8   :  { %v5401_v16 = vpop.eup %5400 }
 0xef9   :  { %v1412_v34 = vadd.f32 1.0, %v5401_v16 }
 0xefb   :  { %5402 = vrcp.f32 %v1412_v34 }
 0xefc   :  { %5404 = vpow2.f32 %v4060_v19 }
 0xf05   :  { %v5403_v15 = vpop.eup %5402 }
 0xf06   :  { %v1415_v17 = vsub.f32 %v5403_v15, %v1400_v12  ;;  %v5405_v31 = vpop.eup %5404  ;;  %v1632_v12 = vld [vmem:[#allocation7 + $0xc0] sm:$0xff] }
 0xf07   :  { %v1395_v33 = vadd.f32 1.0, %v5405_v31  ;;  %v6185_v28 = vpack.c.bf16 %v1633_v13, %v1632_v12  ;;  %v1845_v12 = vld [vmem:[#allocation7 + $0x38] sm:$0xff] }
 0xf08   :  { %1417 = vrot.lane.b32.xlu1 %v1415_v17, %s5727_s2  ;;  %v1846_v13 = vld [vmem:[#allocation7 + $0x58] sm:$0xff] }
 0xf09   :  { %5406 = vrcp.f32 %v1395_v33 }
 0xf13   :  { %v5407_v35 = vpop.eup %5406 }
 0xf61   :  { %v1405_v37 = vpop.permute.xlu1 %1404 }
 0xf62   :  { %v1407_v52 = vmul.f32 %v5407_v35, %v1405_v37 }
 0xf64   :  { %v1408_v38 = vadd.f32 %v1407_v52, %v6111_v11  ;;  %v1725_v52 = vld [vmem:[#allocation7 + $0x10] sm:$0xff] }
 0xf66   :  { %1509 = vrot.lane.b32.xlu0 %v1408_v38, %s5727_s2  ;;  %4570 = vmatmul.mubr.msk.f32.vlgmr.msra.gmra.mrb[14].mxu1 %vm269_vm1, %v1408_v38  ;;  %v1519_v0 = vadd.f32 %v1408_v38, %v6111_v11 }
 0xf67   :  { %4607 = vmatprep.mubr.msk.f32.mxu1 %vm5725_vm0, %v5726_v18  ;;  %5059 = vmatpush3.bf16.msra.mxu1 %v6172_v2 }
 0xf68   :  { %5060 = vmatprep.subr.bf16.mxu1 %v5724_v1 }
 0xf6b   :  { %5062 = vmatpush3.bf16.msra.mxu1 %v6175_v5 }
 0xf6c   :  { %5063 = vmatprep.subr.bf16.mxu1 %v5724_v1 }
 0xf7a   :  { %v1418_v22 = vpop.permute.xlu1 %1417 }
 0xf7b   :  { %v1420_v27 = vmul.f32 %v5403_v15, %v1418_v22 }
 0xf7d   :  { %v1421_v29 = vadd.f32 %v1420_v27, %v6111_v11  ;;  %v6179_v11 = vpack.c.bf16 %v1631_v43, %v1630_v14  ;;  %v1737_v27 = vld [vmem:[#allocation7 + $0xd0] sm:$0xff] }
 0xf7f   :  { %v1520_v3 = vadd.f32 %v1519_v0, %v1421_v29  ;;  %5065 = vmatpush3.bf16.msra.mxu1 %v6179_v11  ;;  %v1739_v29 = vld [vmem:[#allocation7 + $0xf0] sm:$0xff]  ;;  %v1738_v0 = vld [vmem:[#allocation7 + $0xe8] sm:$0xff] }
 0xf80   :  { %5066 = vmatprep.subr.bf16.mxu1 %v5724_v1 }
 0xf83   :  { %5068 = vmatpush3.bf16.msra.mxu1 %v6185_v28 }
 0xf84   :  { %5085 = vmatprep.subr.bf16.mxu1 %v5724_v1 }
 0xfd8   :  { %v1510_v51 = vpop.permute.xlu0 %1509 }
0x1039   :  { %v1499_v53 = vpop.f32.mrb[14].mxu1 }
0x103a   :  { %v1512_v55 = vsub.f32 %v1499_v53, %v1510_v51  ;;  %v4571_v59 = vpop.f32.mrb[15].mxu1  ;;  %v4063_v20 = vmul.f32 -1.442695, %v1499_v53  ;;  %v1730_v51 = vld [vmem:[#allocation7 + $0x68] sm:$0xff]  ;;  %v1733_v53 = vld [vmem:[#allocation7 + $0x90] sm:$0xff] }
0x103b   :  { %v6202_v59 = vpack.c.bf16 %v1730_v51, %v1728_v50 }
0x103c   :  { %1514 = vrot.lane.b32.xlu0 %v1512_v55, %s5727_s2  ;;  %5408 = vpow2.f32 %v4063_v20  ;;  %v1735_v55 = vld [vmem:[#allocation7 + $0xb0] sm:$0xff] }
0x103d   :  { %v6205_v20 = vpack.c.bf16 %v1735_v55, %v1733_v53 }
0x1046   :  { %v5409_v60 = vpop.eup %5408 }
0x1047   :  { %v1506_v61 = vadd.f32 1.0, %v5409_v60  ;;  %v1732_v60 = vld [vmem:[#allocation7 + $0x88] sm:$0xff] }
0x1049   :  { %5410 = vrcp.f32 %v1506_v61  ;;  %v1734_v61 = vld [vmem:[#allocation7 + $0xa8] sm:$0xff] }
0x104a   :  { %v6208_v22 = vpack.c.bf16 %v1734_v61, %v1732_v60 }
0x1053   :  { %v5411_v32 = vpop.eup %5410 }
0x10ae   :  { %v1515_v36 = vpop.permute.xlu0 %1514 }
0x10af   :  { %v1517_v40 = vmul.f32 %v5411_v32, %v1515_v36  ;;  %v6212_v32 = vpack.c.bf16 %v1739_v29, %v1737_v27  ;;  %v1736_v36 = vld [vmem:[#allocation7 + $0xc8] sm:$0xff] }
0x10b1   :  { %v1518_v23 = vadd.f32 %v1517_v40, %v1408_v38  ;;  %v1727_v38 = vld [vmem:[#allocation7 + $0x30] sm:$0xff] }
0x10b2   :  { %v6194_v41 = vpack.c.bf16 %v1727_v38, %v1725_v52 }
0x10b3   :  { %v1521_v62 = vadd.f32 %v1520_v3, %v1518_v23  ;;  %v6214_v3 = vpack.c.bf16 %v1738_v0, %v1736_v36 }
0x10b4   :  { %5070 = vmatprep.subr.bf16.mxu0 %v6194_v41 }
0x10b5   :  { %v1522_v4 = vmul.f32 0.25, %v1521_v62 }
0x10b7   :  { %1524 = vst.msk [vmem:[#allocation3 + $0x10] sm:$0xff] %vm269_vm1, %v1522_v4  ;;  %1616 = vrot.lane.b32.xlu1 %v1522_v4, %s5727_s2  ;;  %4589 = vmatmul.mubr.msk.f32.vlgmr.msra.gmra.mrb[16].mxu0 %vm269_vm1, %v1522_v4 }
0x10b8   :  { %1807 = vmatprep.mubr.f32.mxu0 %v5726_v18  ;;  %5072 = vmatpush1.bf16.msra.mxu0 %v6196_v48 }
0x10b9   :  { %5074 = vmatprep.subr.bf16.mxu0 %v6198_v63 }
0x10bc   :  { %5076 = vmatpush1.bf16.msra.mxu0 %v6202_v59 }
0x10bd   :  { %5078 = vmatprep.subr.bf16.mxu0 %v6205_v20 }
0x10c0   :  { %5080 = vmatpush1.bf16.msra.mxu0 %v6208_v22 }
0x10c1   :  { %5082 = vmatprep.subr.bf16.mxu0 %v6212_v32 }
0x10c4   :  { %5084 = vmatpush1.bf16.msra.mxu0 %v6214_v3 }
0x10c5   :  { %5097 = vmatprep.subr.bf16.mxu0 %v5724_v1 }
0x1129   :  { %v1617_v34 = vpop.permute.xlu1 %1616 }
0x118a   :  { %v1604_v8 = vpop.f32.mrb[16].mxu0 }
0x118b   :  { %v1608_v45 = vadd.f32 %v6026_v56, %v1604_v8  ;;  %v4590_v21 = vpop.f32.mrb[17].mxu0 }
0x118c   :  { %v1844_v21 = vld [vmem:[#allocation7 + $0x18] sm:$0xff] }
0x118d   :  { %5412 = vtanh.f32 %v1608_v45  ;;  %v4065_v17 = vmul.f32 -1.442695, %v1608_v45 }
0x118f   :  { %5414 = vpow2.f32 %v4065_v17  ;;  %v1848_v17 = vld [vmem:[#allocation7 + $0x98] sm:$0xff] }
0x1197   :  { %v5413_v16 = vpop.eup %5412 }
0x1198   :  { %v1619_v15 = vsub.f32 %v5413_v16, %v1617_v34  ;;  %v6236_v16 = vpack.c.bf16 %v1845_v12, %v1844_v21  ;;  %v1847_v34 = vld [vmem:[#allocation7 + $0x78] sm:$0xff] }
0x1199   :  { %v5415_v19 = vpop.eup %5414 }
0x119a   :  { %1621 = vrot.lane.b32.xlu0 %v1619_v15, %s5727_s2  ;;  %v1612_v31 = vadd.f32 1.0, %v5415_v19  ;;  %v6239_v15 = vpack.c.bf16 %v1847_v34, %v1846_v13  ;;  %v1849_v19 = vld [vmem:[#allocation7 + $0xb8] sm:$0xff] }
0x119c   :  { %5416 = vrcp.f32 %v1612_v31  ;;  %v6243_v31 = vpack.c.bf16 %v1849_v19, %v1848_v17 }
0x11a6   :  { %v5417_v56 = vpop.eup %5416 }
0x120c   :  { %v1622_v33 = vpop.permute.xlu0 %1621 }
0x120d   :  { %v1624_v35 = vmul.f32 %v5417_v56, %v1622_v33  ;;  %v1850_v56 = vld [vmem:[#allocation7 + $0xd8] sm:$0xff] }
0x120e   :  { %v1851_v33 = vld [vmem:[#allocation7 + $0xf8] sm:$0xff] }
0x120f   :  { %v1625_v37 = vadd.f32 %v1624_v35, %v1522_v4  ;;  %v6248_v35 = vpack.c.bf16 %v1851_v33, %v1850_v56 }
0x1211   :  { %1714 = vrot.lane.b32.xlu1 %v1625_v37, %s5727_s2  ;;  %4608 = vmatmul.mubr.msk.f32.vlgmr.msra.gmra.mrb[16].mxu1 %vm269_vm1, %v1625_v37 }
0x1212   :  { %4626 = vmatprep.mubr.msk.f32.mxu1 %vm5725_vm0, %v5726_v18  ;;  %5087 = vmatpush3.bf16.msra.mxu1 %v6236_v16 }
0x1213   :  { %5088 = vmatprep.subr.bf16.mxu1 %v5724_v1 }
0x1216   :  { %5090 = vmatpush3.bf16.msra.mxu1 %v6239_v15 }
0x1217   :  { %5091 = vmatprep.subr.bf16.mxu1 %v5724_v1 }
0x121a   :  { %5093 = vmatpush3.bf16.msra.mxu1 %v6243_v31 }
0x121b   :  { %5094 = vmatprep.subr.bf16.mxu1 %v5724_v1 }
0x121e   :  { %5096 = vmatpush3.bf16.msra.mxu1 %v6248_v35 }
0x121f   :  { %5109 = vmatprep.subr.bf16.mxu1 %v5724_v1 }
0x1283   :  { %v1715_v4 = vpop.permute.xlu1 %1714 }
0x12e4   :  { %v1703_v40 = vpop.f32.mrb[16].mxu1 }
0x12e5   :  { %5418 = vtanh.f32 %v1703_v40  ;;  %v4609_v23 = vpop.f32.mrb[17].mxu1  ;;  %v4067_v7 = vmul.f32 -1.442695, %v1703_v40 }
0x12e7   :  { %5420 = vpow2.f32 %v4067_v7 }
0x12ef   :  { %v5419_v62 = vpop.eup %5418 }
0x12f0   :  { %v1717_v6 = vsub.f32 %v5419_v62, %v1715_v4 }
0x12f1   :  { %v5421_v9 = vpop.eup %5420 }
0x12f2   :  { %1719 = vrot.lane.b32.xlu0 %v1717_v6, %s5727_s2  ;;  %v1710_v10 = vadd.f32 1.0, %v5421_v9 }
0x12f4   :  { %5422 = vrcp.f32 %v1710_v10 }
0x12fe   :  { %v5423_v14 = vpop.eup %5422 }
0x1364   :  { %v1720_v43 = vpop.permute.xlu0 %1719 }
0x1365   :  { %v1722_v8 = vmul.f32 %v5423_v14, %v1720_v43 }
0x1367   :  { %v6220_v45 = vadd.f32 %v1722_v8, %v1625_v37 }
0x1369   :  { %1821 = vrot.lane.b32.xlu1 %v6220_v45, %s5727_s2  ;;  %4068 = vmatmul.mubr.msk.f32.vlgmr.msra.gmra.mrb[18].mxu0 %vm269_vm1, %v6220_v45 }
0x136a   :  { %5099 = vmatpush3.bf16.msra.mxu0 %v6135_v44  ;;  %4645 = vmatprep.mubr.msk.f32.mxu0 %vm5725_vm0, %v5726_v18 }
0x136b   :  { %5100 = vmatprep.subr.bf16.mxu0 %v5724_v1 }
0x136e   :  { %5102 = vmatpush3.bf16.msra.mxu0 %v6141_v57 }
0x136f   :  { %5103 = vmatprep.subr.bf16.mxu0 %v5724_v1 }
0x1372   :  { %5105 = vmatpush3.bf16.msra.mxu0 %v6152_v49 }
0x1373   :  { %5106 = vmatprep.subr.bf16.mxu0 %v5724_v1 }
0x1376   :  { %5108 = vmatpush3.bf16.msra.mxu0 %v6162_v58 }
0x1377   :  { %5122 = vmatprep.subr.bf16.mxu0 %v6194_v41 }
0x13db   :  { %v1822_v39 = vpop.permute.xlu1 %1821 }
0x143c   :  { %v1809_v37 = vpop.f32.mrb[18].mxu0 }
0x143d   :  { %v1820_v52 = vmax.f32 %v1809_v37, 0.0  ;;  %v1811_v38 = vpop.f32.mrb[19].mxu0  ;;  %v4069_v55 = vmul.f32 -1.442695, %v1809_v37 }
0x143e   :  { %v4070_v54 = vmul.f32 -1.442695, %v1811_v38 }
0x143f   :  { %v1824_v46 = vsub.f32 %v1820_v52, %v1822_v39 }
0x1440   :  { %5424 = vpow2.f32 %v4070_v54 }
0x1441   :  { %1826 = vrot.lane.b32.xlu0 %v1824_v46, %s5727_s2 }
0x144a   :  { %v5425_v47 = vpop.eup %5424 }
0x144b   :  { %v1834_v50 = vadd.f32 1.0, %v5425_v47 }
0x144d   :  { %5426 = vrcp.f32 %v1834_v50 }
0x144e   :  { %5428 = vpow2.f32 %v4069_v55 }
0x1457   :  { %v5427_v51 = vpop.eup %5426 }
0x1458   :  { %v1837_v53 = vsub.f32 %v5427_v51, %v1822_v39  ;;  %v5429_v60 = vpop.eup %5428 }
0x1459   :  { %v1817_v61 = vadd.f32 1.0, %v5429_v60 }
0x145a   :  { %1839 = vrot.lane.b32.xlu0 %v1837_v53, %s5727_s2 }
0x145b   :  { %5430 = vrcp.f32 %v1817_v61 }
0x1465   :  { %v5431_v27 = vpop.eup %5430 }
0x14b3   :  { %v1827_v29 = vpop.permute.xlu0 %1826 }
0x14b4   :  { %v1829_v36 = vmul.f32 %v5431_v27, %v1827_v29 }
0x14b6   :  { %v1830_v0 = vadd.f32 %v1829_v36, %v6220_v45 }
0x14b8   :  { %1931 = vrot.lane.b32.xlu1 %v1830_v0, %s5727_s2  ;;  %4627 = vmatmul.mubr.msk.f32.vlgmr.msra.gmra.mrb[18].mxu1 %vm269_vm1, %v1830_v0  ;;  %v1941_v12 = vadd.f32 %v1830_v0, %v6220_v45 }
0x14b9   :  { %5111 = vmatpush3.bf16.msra.mxu1 %v6172_v2  ;;  %4664 = vmatprep.mubr.msk.f32.mxu1 %vm5725_vm0, %v5726_v18 }
0x14ba   :  { %5112 = vmatprep.subr.bf16.mxu1 %v5724_v1 }
0x14bd   :  { %5114 = vmatpush3.bf16.msra.mxu1 %v6175_v5 }
0x14be   :  { %5115 = vmatprep.subr.bf16.mxu1 %v5724_v1 }
0x14c1   :  { %5117 = vmatpush3.bf16.msra.mxu1 %v6179_v11 }
0x14c2   :  { %5118 = vmatprep.subr.bf16.mxu1 %v5724_v1 }
0x14c5   :  { %5120 = vmatpush3.bf16.msra.mxu1 %v6185_v28 }
0x14c6   :  { %5137 = vmatprep.subr.bf16.mxu1 %v5724_v1 }
0x14cc   :  { %v1840_v10 = vpop.permute.xlu0 %1839 }
0x14cd   :  { %v1842_v14 = vmul.f32 %v5427_v51, %v1840_v10 }
0x14cf   :  { %v1843_v43 = vadd.f32 %v1842_v14, %v6220_v45 }
0x14d1   :  { %v1942_v34 = vadd.f32 %v1941_v12, %v1843_v43 }
0x152a   :  { %v1932_v40 = vpop.permute.xlu1 %1931 }
0x158b   :  { %v1921_v23 = vpop.f32.mrb[18].mxu1 }
0x158c   :  { %v1934_v62 = vsub.f32 %v1921_v23, %v1932_v40  ;;  %v4628_v4 = vpop.f32.mrb[19].mxu1  ;;  %v4072_v6 = vmul.f32 -1.442695, %v1921_v23 }
0x158e   :  { %1936 = vrot.lane.b32.xlu1 %v1934_v62, %s5727_s2  ;;  %5432 = vpow2.f32 %v4072_v6 }
0x1598   :  { %v5433_v7 = vpop.eup %5432 }
0x1599   :  { %v1928_v9 = vadd.f32 1.0, %v5433_v7 }
0x159b   :  { %5434 = vrcp.f32 %v1928_v9 }
0x15a5   :  { %v5435_v8 = vpop.eup %5434 }
0x1600   :  { %v1937_v21 = vpop.permute.xlu1 %1936 }
0x1601   :  { %v1939_v13 = vmul.f32 %v5435_v8, %v1937_v21 }
0x1603   :  { %v1940_v17 = vadd.f32 %v1939_v13, %v1830_v0 }
0x1605   :  { %v1943_v19 = vadd.f32 %v1942_v34, %v1940_v17 }
0x1607   :  { %v1944_v56 = vmul.f32 0.25, %v1943_v19 }
0x1609   :  { %1946 = vst.msk [vmem:[#allocation3 + $0x18] sm:$0xff] %vm269_vm1, %v1944_v56  ;;  %2038 = vrot.lane.b32.xlu0 %v1944_v56, %s5727_s2  ;;  %4646 = vmatmul.mubr.msk.f32.vlgmr.msra.gmra.mrb[20].mxu0 %vm269_vm1, %v1944_v56 }
0x160a   :  { %5124 = vmatpush1.bf16.msra.mxu0 %v6196_v48  ;;  %2229 = vmatprep.mubr.f32.mxu0 %v5726_v18 }
0x160b   :  { %5126 = vmatprep.subr.bf16.mxu0 %v6198_v63 }
0x160e   :  { %5128 = vmatpush1.bf16.msra.mxu0 %v6202_v59 }
0x160f   :  { %5130 = vmatprep.subr.bf16.mxu0 %v6205_v20 }
0x1612   :  { %5132 = vmatpush1.bf16.msra.mxu0 %v6208_v22 }
0x1613   :  { %5134 = vmatprep.subr.bf16.mxu0 %v6212_v32 }
0x1616   :  { %5136 = vmatpush1.bf16.msra.mxu0 %v6214_v3 }
0x1617   :  { %5149 = vmatprep.subr.bf16.mxu0 %v5724_v1 }
0x167b   :  { %v2039_v38 = vpop.permute.xlu0 %2038 }
0x16dc   :  { %v2026_v45 = vpop.f32.mrb[20].mxu0 }
0x16dd   :  { %v2030_v33 = vadd.f32 %v2026_v45, %v6034_v25  ;;  %v4647_v37 = vpop.f32.mrb[21].mxu0 }
0x16df   :  { %5436 = vtanh.f32 %v2030_v33  ;;  %v4074_v54 = vmul.f32 -1.442695, %v2030_v33 }
0x16e1   :  { %5438 = vpow2.f32 %v4074_v54 }
0x16e9   :  { %v5437_v52 = vpop.eup %5436 }
0x16ea   :  { %v2041_v39 = vsub.f32 %v5437_v52, %v2039_v38 }
0x16eb   :  { %v5439_v46 = vpop.eup %5438 }
0x16ec   :  { %2043 = vrot.lane.b32.xlu1 %v2041_v39, %s5727_s2  ;;  %v2034_v47 = vadd.f32 1.0, %v5439_v46 }
0x16ee   :  { %5440 = vrcp.f32 %v2034_v47 }
0x16f8   :  { %v5441_v50 = vpop.eup %5440 }
0x175e   :  { %v2044_v51 = vpop.permute.xlu1 %2043 }
0x175f   :  { %v2046_v53 = vmul.f32 %v5441_v50, %v2044_v51 }
0x1761   :  { %v2047_v55 = vadd.f32 %v2046_v53, %v1944_v56 }
0x1763   :  { %2136 = vrot.lane.b32.xlu0 %v2047_v55, %s5727_s2  ;;  %4665 = vmatmul.mubr.msk.f32.vlgmr.msra.gmra.mrb[20].mxu1 %vm269_vm1, %v2047_v55 }
0x1764   :  { %5139 = vmatpush3.bf16.msra.mxu1 %v6236_v16  ;;  %4683 = vmatprep.mubr.msk.f32.mxu1 %vm5725_vm0, %v5726_v18 }
0x1765   :  { %5140 = vmatprep.subr.bf16.mxu1 %v5724_v1 }
0x1768   :  { %5142 = vmatpush3.bf16.msra.mxu1 %v6239_v15 }
0x1769   :  { %5143 = vmatprep.subr.bf16.mxu1 %v5724_v1 }
0x176c   :  { %5145 = vmatpush3.bf16.msra.mxu1 %v6243_v31 }
0x176d   :  { %5146 = vmatprep.subr.bf16.mxu1 %v5724_v1 }
0x1770   :  { %5148 = vmatpush3.bf16.msra.mxu1 %v6248_v35 }
0x1771   :  { %5161 = vmatprep.subr.bf16.mxu1 %v5724_v1 }
0x17d5   :  { %v2137_v27 = vpop.permute.xlu0 %2136 }
0x1836   :  { %v2125_v25 = vpop.f32.mrb[20].mxu1 }
0x1837   :  { %5442 = vtanh.f32 %v2125_v25  ;;  %v4666_v60 = vpop.f32.mrb[21].mxu1  ;;  %v4076_v36 = vmul.f32 -1.442695, %v2125_v25 }
0x1839   :  { %5444 = vpow2.f32 %v4076_v36 }
0x1841   :  { %v5443_v61 = vpop.eup %5442 }
0x1842   :  { %v2139_v29 = vsub.f32 %v5443_v61, %v2137_v27 }
0x1843   :  { %v5445_v0 = vpop.eup %5444 }
0x1844   :  { %2141 = vrot.lane.b32.xlu1 %v2139_v29, %s5727_s2  ;;  %v2132_v40 = vadd.f32 1.0, %v5445_v0 }
0x1846   :  { %5446 = vrcp.f32 %v2132_v40 }
0x1850   :  { %v5447_v23 = vpop.eup %5446 }
0x18b6   :  { %v2142_v62 = vpop.permute.xlu1 %2141 }
0x18b7   :  { %v2144_v4 = vmul.f32 %v5447_v23, %v2142_v62 }
0x18b9   :  { %v2145_v6 = vadd.f32 %v2144_v4, %v2047_v55 }
0x18bb   :  { %2243 = vrot.lane.b32.xlu0 %v2145_v6, %s5727_s2  ;;  %4077 = vmatmul.mubr.msk.f32.vlgmr.msra.gmra.mrb[22].mxu0 %vm269_vm1, %v2145_v6 }
0x18bc   :  { %5151 = vmatpush3.bf16.msra.mxu0 %v6135_v44  ;;  %4702 = vmatprep.mubr.msk.f32.mxu0 %vm5725_vm0, %v5726_v18 }
0x18bd   :  { %5152 = vmatprep.subr.bf16.mxu0 %v5724_v1 }
0x18c0   :  { %5154 = vmatpush3.bf16.msra.mxu0 %v6141_v57 }
0x18c1   :  { %5155 = vmatprep.subr.bf16.mxu0 %v5724_v1 }
0x18c4   :  { %5157 = vmatpush3.bf16.msra.mxu0 %v6152_v49 }
0x18c5   :  { %5158 = vmatprep.subr.bf16.mxu0 %v5724_v1 }
0x18c8   :  { %5160 = vmatpush3.bf16.msra.mxu0 %v6162_v58 }
0x18c9   :  { %5174 = vmatprep.subr.bf16.mxu0 %v6194_v41 }
0x192d   :  { %v2244_v14 = vpop.permute.xlu0 %2243 }
0x198e   :  { %v2231_v7 = vpop.f32.mrb[22].mxu0 }
0x198f   :  { %v2242_v9 = vmax.f32 %v2231_v7, 0.0  ;;  %v2233_v10 = vpop.f32.mrb[23].mxu0  ;;  %v4078_v17 = vmul.f32 -1.442695, %v2231_v7 }
0x1990   :  { %v4079_v43 = vmul.f32 -1.442695, %v2233_v10 }
0x1991   :  { %v2246_v8 = vsub.f32 %v2242_v9, %v2244_v14 }
0x1992   :  { %5448 = vpow2.f32 %v4079_v43 }
0x1993   :  { %2248 = vrot.lane.b32.xlu1 %v2246_v8, %s5727_s2 }
0x199c   :  { %v5449_v21 = vpop.eup %5448 }
0x199d   :  { %v2256_v12 = vadd.f32 1.0, %v5449_v21 }
0x199f   :  { %5450 = vrcp.f32 %v2256_v12 }
0x19a0   :  { %5452 = vpow2.f32 %v4078_v17 }
0x19a9   :  { %v5451_v13 = vpop.eup %5450 }
0x19aa   :  { %v2259_v34 = vsub.f32 %v5451_v13, %v2244_v14  ;;  %v5453_v19 = vpop.eup %5452 }
0x19ab   :  { %v2239_v56 = vadd.f32 1.0, %v5453_v19 }
0x19ac   :  { %2261 = vrot.lane.b32.xlu1 %v2259_v34, %s5727_s2 }
0x19ad   :  { %5454 = vrcp.f32 %v2239_v56 }
0x19b7   :  { %v5455_v45 = vpop.eup %5454 }
0x1a05   :  { %v2249_v33 = vpop.permute.xlu1 %2248 }
0x1a06   :  { %v2251_v37 = vmul.f32 %v5455_v45, %v2249_v33 }
0x1a08   :  { %v2252_v52 = vadd.f32 %v2251_v37, %v2145_v6 }
0x1a0a   :  { %2353 = vrot.lane.b32.xlu0 %v2252_v52, %s5727_s2  ;;  %4684 = vmatmul.mubr.msk.f32.vlgmr.msra.gmra.mrb[22].mxu1 %vm269_vm1, %v2252_v52  ;;  %v2363_v27 = vadd.f32 %v2252_v52, %v2145_v6 }
0x1a0b   :  { %5163 = vmatpush3.bf16.msra.mxu1 %v6172_v2  ;;  %4721 = vmatprep.mubr.msk.f32.mxu1 %vm5725_vm0, %v5726_v18 }
0x1a0c   :  { %5164 = vmatprep.subr.bf16.mxu1 %v5724_v1 }
0x1a0f   :  { %5166 = vmatpush3.bf16.msra.mxu1 %v6175_v5 }
0x1a10   :  { %5167 = vmatprep.subr.bf16.mxu1 %v5724_v1 }
0x1a13   :  { %5169 = vmatpush3.bf16.msra.mxu1 %v6179_v11 }
0x1a14   :  { %5170 = vmatprep.subr.bf16.mxu1 %v5724_v1 }
0x1a17   :  { %5172 = vmatpush3.bf16.msra.mxu1 %v6185_v28 }
0x1a18   :  { %5189 = vmatprep.subr.bf16.mxu1 %v5724_v1 }
0x1a1e   :  { %v2262_v53 = vpop.permute.xlu1 %2261 }
0x1a1f   :  { %v2264_v55 = vmul.f32 %v5451_v13, %v2262_v53 }
0x1a21   :  { %v2265_v25 = vadd.f32 %v2264_v55, %v2145_v6 }
0x1a23   :  { %v2364_v36 = vadd.f32 %v2363_v27, %v2265_v25 }
0x1a7c   :  { %v2354_v38 = vpop.permute.xlu0 %2353 }
0x1add   :  { %v2343_v39 = vpop.f32.mrb[22].mxu1 }
0x1ade   :  { %v2356_v54 = vsub.f32 %v2343_v39, %v2354_v38  ;;  %v4685_v46 = vpop.f32.mrb[23].mxu1  ;;  %v4081_v47 = vmul.f32 -1.442695, %v2343_v39 }
0x1ae0   :  { %2358 = vrot.lane.b32.xlu0 %v2356_v54, %s5727_s2  ;;  %5456 = vpow2.f32 %v4081_v47 }
0x1aea   :  { %v5457_v50 = vpop.eup %5456 }
0x1aeb   :  { %v2350_v51 = vadd.f32 1.0, %v5457_v50 }
0x1aed   :  { %5458 = vrcp.f32 %v2350_v51 }
0x1af7   :  { %v5459_v60 = vpop.eup %5458 }
0x1b52   :  { %v2359_v61 = vpop.permute.xlu0 %2358 }
0x1b53   :  { %v2361_v29 = vmul.f32 %v5459_v60, %v2359_v61 }
0x1b55   :  { %v2362_v0 = vadd.f32 %v2361_v29, %v2252_v52 }
0x1b57   :  { %v2365_v40 = vadd.f32 %v2364_v36, %v2362_v0 }
0x1b59   :  { %v2366_v23 = vmul.f32 0.25, %v2365_v40 }
0x1b5b   :  { %2368 = vst.msk [vmem:[#allocation3 + $0x20] sm:$0xff] %vm269_vm1, %v2366_v23  ;;  %2460 = vrot.lane.b32.xlu1 %v2366_v23, %s5727_s2  ;;  %4703 = vmatmul.mubr.msk.f32.vlgmr.msra.gmra.mrb[24].mxu0 %vm269_vm1, %v2366_v23 }
0x1b5c   :  { %5176 = vmatpush1.bf16.msra.mxu0 %v6196_v48  ;;  %2651 = vmatprep.mubr.f32.mxu0 %v5726_v18 }
0x1b5d   :  { %5178 = vmatprep.subr.bf16.mxu0 %v6198_v63 }
0x1b60   :  { %5180 = vmatpush1.bf16.msra.mxu0 %v6202_v59 }
0x1b61   :  { %5182 = vmatprep.subr.bf16.mxu0 %v6205_v20 }
0x1b64   :  { %5184 = vmatpush1.bf16.msra.mxu0 %v6208_v22 }
0x1b65   :  { %5186 = vmatprep.subr.bf16.mxu0 %v6212_v32 }
0x1b68   :  { %5188 = vmatpush1.bf16.msra.mxu0 %v6214_v3 }
0x1b69   :  { %5201 = vmatprep.subr.bf16.mxu0 %v5724_v1 }
0x1bcd   :  { %v2461_v9 = vpop.permute.xlu1 %2460 }
0x1c2e   :  { %v2448_v62 = vpop.f32.mrb[24].mxu0 }
0x1c2f   :  { %v2452_v4 = vadd.f32 %v6032_v24, %v2448_v62  ;;  %v4704_v6 = vpop.f32.mrb[25].mxu0 }
0x1c31   :  { %5460 = vtanh.f32 %v2452_v4  ;;  %v4083_v14 = vmul.f32 -1.442695, %v2452_v4 }
0x1c33   :  { %5462 = vpow2.f32 %v4083_v14 }
0x1c3b   :  { %v5461_v7 = vpop.eup %5460 }
0x1c3c   :  { %v2463_v10 = vsub.f32 %v5461_v7, %v2461_v9 }
0x1c3d   :  { %v5463_v43 = vpop.eup %5462 }
0x1c3e   :  { %2465 = vrot.lane.b32.xlu0 %v2463_v10, %s5727_s2  ;;  %v2456_v8 = vadd.f32 1.0, %v5463_v43 }
0x1c40   :  { %5464 = vrcp.f32 %v2456_v8 }
0x1c4a   :  { %v5465_v21 = vpop.eup %5464 }
0x1cb0   :  { %v2466_v12 = vpop.permute.xlu0 %2465 }
0x1cb1   :  { %v2468_v13 = vmul.f32 %v5465_v21, %v2466_v12 }
0x1cb3   :  { %v2469_v34 = vadd.f32 %v2468_v13, %v2366_v23 }
0x1cb5   :  { %2558 = vrot.lane.b32.xlu1 %v2469_v34, %s5727_s2  ;;  %4722 = vmatmul.mubr.msk.f32.vlgmr.msra.gmra.mrb[24].mxu1 %vm269_vm1, %v2469_v34 }
0x1cb6   :  { %5191 = vmatpush3.bf16.msra.mxu1 %v6236_v16  ;;  %4740 = vmatprep.mubr.msk.f32.mxu1 %vm5725_vm0, %v5726_v18 }
0x1cb7   :  { %5192 = vmatprep.subr.bf16.mxu1 %v5724_v1 }
0x1cba   :  { %5194 = vmatpush3.bf16.msra.mxu1 %v6239_v15 }
0x1cbb   :  { %5195 = vmatprep.subr.bf16.mxu1 %v5724_v1 }
0x1cbe   :  { %5197 = vmatpush3.bf16.msra.mxu1 %v6243_v31 }
0x1cbf   :  { %5198 = vmatprep.subr.bf16.mxu1 %v5724_v1 }
0x1cc2   :  { %5200 = vmatpush3.bf16.msra.mxu1 %v6248_v35 }
0x1cc3   :  { %5213 = vmatprep.subr.bf16.mxu1 %v5724_v1 }
0x1d27   :  { %v2559_v56 = vpop.permute.xlu1 %2558 }
0x1d88   :  { %v2547_v24 = vpop.f32.mrb[24].mxu1 }
0x1d89   :  { %5466 = vtanh.f32 %v2547_v24  ;;  %v4723_v17 = vpop.f32.mrb[25].mxu1  ;;  %v4085_v33 = vmul.f32 -1.442695, %v2547_v24 }
0x1d8b   :  { %5468 = vpow2.f32 %v4085_v33 }
0x1d93   :  { %v5467_v19 = vpop.eup %5466 }
0x1d94   :  { %v2561_v45 = vsub.f32 %v5467_v19, %v2559_v56 }
0x1d95   :  { %v5469_v37 = vpop.eup %5468 }
0x1d96   :  { %2563 = vrot.lane.b32.xlu0 %v2561_v45, %s5727_s2  ;;  %v2554_v52 = vadd.f32 1.0, %v5469_v37 }
0x1d98   :  { %5470 = vrcp.f32 %v2554_v52 }
0x1da2   :  { %v5471_v38 = vpop.eup %5470 }
0x1e08   :  { %v2564_v39 = vpop.permute.xlu0 %2563 }
0x1e09   :  { %v2566_v54 = vmul.f32 %v5471_v38, %v2564_v39 }
0x1e0b   :  { %v2567_v46 = vadd.f32 %v2566_v54, %v2469_v34 }
0x1e0d   :  { %2665 = vrot.lane.b32.xlu1 %v2567_v46, %s5727_s2  ;;  %4086 = vmatmul.mubr.msk.f32.vlgmr.msra.gmra.mrb[26].mxu0 %vm269_vm1, %v2567_v46 }
0x1e0e   :  { %5203 = vmatpush3.bf16.msra.mxu0 %v6135_v44  ;;  %4759 = vmatprep.mubr.msk.f32.mxu0 %vm5725_vm0, %v5726_v18 }
0x1e0f   :  { %5204 = vmatprep.subr.bf16.mxu0 %v5724_v1 }
0x1e12   :  { %5206 = vmatpush3.bf16.msra.mxu0 %v6141_v57 }
0x1e13   :  { %5207 = vmatprep.subr.bf16.mxu0 %v5724_v1 }
0x1e16   :  { %5209 = vmatpush3.bf16.msra.mxu0 %v6152_v49 }
0x1e17   :  { %5210 = vmatprep.subr.bf16.mxu0 %v5724_v1 }
0x1e1a   :  { %5212 = vmatpush3.bf16.msra.mxu0 %v6162_v58 }
0x1e1b   :  { %5226 = vmatprep.subr.bf16.mxu0 %v6194_v41 }
0x1e7f   :  { %v2666_v51 = vpop.permute.xlu1 %2665 }
0x1ee0   :  { %v2653_v47 = vpop.f32.mrb[26].mxu0 }
0x1ee1   :  { %v2664_v50 = vmax.f32 %v2653_v47, 0.0  ;;  %v2655_v44 = vpop.f32.mrb[27].mxu0  ;;  %v4087_v61 = vmul.f32 -1.442695, %v2653_v47 }
0x1ee2   :  { %v4088_v53 = vmul.f32 -1.442695, %v2655_v44 }
0x1ee3   :  { %v2668_v55 = vsub.f32 %v2664_v50, %v2666_v51 }
0x1ee4   :  { %5472 = vpow2.f32 %v4088_v53 }
0x1ee5   :  { %2670 = vrot.lane.b32.xlu0 %v2668_v55, %s5727_s2 }
0x1eee   :  { %v5473_v57 = vpop.eup %5472 }
0x1eef   :  { %v2678_v25 = vadd.f32 1.0, %v5473_v57 }
0x1ef1   :  { %5474 = vrcp.f32 %v2678_v25 }
0x1ef2   :  { %5476 = vpow2.f32 %v4087_v61 }
0x1efb   :  { %v5475_v60 = vpop.eup %5474 }
0x1efc   :  { %v2681_v49 = vsub.f32 %v5475_v60, %v2666_v51  ;;  %v5477_v58 = vpop.eup %5476 }
0x1efd   :  { %v2661_v41 = vadd.f32 1.0, %v5477_v58 }
0x1efe   :  { %2683 = vrot.lane.b32.xlu0 %v2681_v49, %s5727_s2 }
0x1eff   :  { %5478 = vrcp.f32 %v2661_v41 }
0x1f09   :  { %v5479_v27 = vpop.eup %5478 }
0x1f57   :  { %v2671_v29 = vpop.permute.xlu0 %2670 }
0x1f58   :  { %v2673_v36 = vmul.f32 %v5479_v27, %v2671_v29 }
0x1f5a   :  { %v2674_v0 = vadd.f32 %v2673_v36, %v2567_v46 }
0x1f5c   :  { %2775 = vrot.lane.b32.xlu1 %v2674_v0, %s5727_s2  ;;  %4741 = vmatmul.mubr.msk.f32.vlgmr.msra.gmra.mrb[26].mxu1 %vm269_vm1, %v2674_v0  ;;  %v2785_v43 = vadd.f32 %v2674_v0, %v2567_v46 }
0x1f5d   :  { %5215 = vmatpush3.bf16.msra.mxu1 %v6172_v2  ;;  %4778 = vmatprep.mubr.msk.f32.mxu1 %vm5725_vm0, %v5726_v18 }
0x1f5e   :  { %5216 = vmatprep.subr.bf16.mxu1 %v5724_v1 }
0x1f61   :  { %5218 = vmatpush3.bf16.msra.mxu1 %v6175_v5 }
0x1f62   :  { %5219 = vmatprep.subr.bf16.mxu1 %v5724_v1 }
0x1f65   :  { %5221 = vmatpush3.bf16.msra.mxu1 %v6179_v11 }
0x1f66   :  { %5222 = vmatprep.subr.bf16.mxu1 %v5724_v1 }
0x1f69   :  { %5224 = vmatpush3.bf16.msra.mxu1 %v6185_v28 }
0x1f6a   :  { %5241 = vmatprep.subr.bf16.mxu1 %v5724_v1 }
0x1f70   :  { %v2684_v7 = vpop.permute.xlu0 %2683 }
0x1f71   :  { %v2686_v9 = vmul.f32 %v5475_v60, %v2684_v7  ;;  %v3220_v7 = vld [vmem:[%s6674_s3 + $0x28] sm:$0xff] }
0x1f73   :  { %v2687_v11 = vadd.f32 %v2686_v9, %v2567_v46 }
0x1f75   :  { %v2786_v8 = vadd.f32 %v2785_v43, %v2687_v11  ;;  %v3221_v11 = vld [vmem:[%s6674_s3 + $0x30] sm:$0xff] }
0x1fce   :  { %v2776_v40 = vpop.permute.xlu1 %2775 }
0x202f   :  { %v2765_v23 = vpop.f32.mrb[26].mxu1 }
0x2030   :  { %v2778_v2 = vsub.f32 %v2765_v23, %v2776_v40  ;;  %v4742_v62 = vpop.f32.mrb[27].mxu1  ;;  %v4090_v4 = vmul.f32 -1.442695, %v2765_v23  ;;  %v3215_v40 = vld [vmem:[%s6674_s3] sm:$0xff]  ;;  %v3216_v23 = vld [vmem:[%s6674_s3 + $0x8] sm:$0xff] }
0x2031   :  { %v5254_v62 = vpack.c.bf16 %v3216_v23, %v3215_v40  ;;  %v3419_v40 = vld [vmem:[#allocation7 + $0x70] sm:$0xff] }
0x2032   :  { %2780 = vrot.lane.b32.xlu1 %v2778_v2, %s5727_s2  ;;  %5480 = vpow2.f32 %v4090_v4  ;;  %v3217_v2 = vld [vmem:[%s6674_s3 + $0x10] sm:$0xff]  ;;  %v3218_v4 = vld [vmem:[%s6674_s3 + $0x18] sm:$0xff] }
0x203c   :  { %v5481_v6 = vpop.eup %5480 }
0x203d   :  { %v2772_v5 = vadd.f32 1.0, %v5481_v6  ;;  %v5257_v6 = vpack.c.bf16 %v3218_v4, %v3217_v2  ;;  %v3418_v4 = vld [vmem:[#allocation7 + $0x68] sm:$0xff] }
0x203f   :  { %5482 = vrcp.f32 %v2772_v5  ;;  %v3219_v5 = vld [vmem:[%s6674_s3 + $0x20] sm:$0xff] }
0x2040   :  { %v5260_v9 = vpack.c.bf16 %v3220_v7, %v3219_v5  ;;  %v3423_v5 = vld [vmem:[#allocation7 + $0xb0] sm:$0xff] }
0x2049   :  { %v5483_v10 = vpop.eup %5482 }
0x20a4   :  { %v2781_v14 = vpop.permute.xlu1 %2780 }
0x20a5   :  { %v2783_v28 = vmul.f32 %v5483_v10, %v2781_v14  ;;  %v3222_v10 = vld [vmem:[%s6674_s3 + $0x38] sm:$0xff] }
0x20a6   :  { %v5263_v14 = vpack.c.bf16 %v3222_v10, %v3221_v11  ;;  %v3420_v11 = vld [vmem:[#allocation7 + $0x88] sm:$0xff] }
0x20a7   :  { %v2784_v21 = vadd.f32 %v2783_v28, %v2674_v0  ;;  %v3422_v10 = vld [vmem:[#allocation7 + $0xa8] sm:$0xff] }
0x20a9   :  { %v2787_v12 = vadd.f32 %v2786_v8, %v2784_v21 }
0x20ab   :  { %v2788_v13 = vmul.f32 0.25, %v2787_v12 }
0x20ad   :  { %2790 = vst.msk [vmem:[#allocation3 + $0x28] sm:$0xff] %vm269_vm1, %v2788_v13  ;;  %2882 = vrot.lane.b32.xlu0 %v2788_v13, %s5727_s2  ;;  %4760 = vmatmul.mubr.msk.f32.vlgmr.msra.gmra.mrb[28].mxu0 %vm269_vm1, %v2788_v13 }
0x20ae   :  { %5228 = vmatpush1.bf16.msra.mxu0 %v6196_v48  ;;  %3073 = vmatprep.mubr.f32.mxu0 %v5726_v18 }
0x20af   :  { %5230 = vmatprep.subr.bf16.mxu0 %v6198_v63 }
0x20b2   :  { %5232 = vmatpush1.bf16.msra.mxu0 %v6202_v59 }
0x20b3   :  { %5234 = vmatprep.subr.bf16.mxu0 %v6205_v20 }
0x20b6   :  { %5236 = vmatpush1.bf16.msra.mxu0 %v6208_v22 }
0x20b7   :  { %5238 = vmatprep.subr.bf16.mxu0 %v6212_v32 }
0x20ba   :  { %5240 = vmatpush1.bf16.msra.mxu0 %v6214_v3 }
0x20bb   :  { %5253 = vmatprep.subr.bf16.mxu0 %v5724_v1 }
0x211f   :  { %v2883_v19 = vpop.permute.xlu0 %2882 }
0x2180   :  { %v2870_v34 = vpop.f32.mrb[28].mxu0 }
0x2181   :  { %v2874_v24 = vadd.f32 %v2870_v34, %v6040_v30  ;;  %v4761_v48 = vpop.f32.mrb[29].mxu0 }
0x2183   :  { %5484 = vtanh.f32 %v2874_v24  ;;  %v4092_v59 = vmul.f32 -1.442695, %v2874_v24 }
0x2185   :  { %5486 = vpow2.f32 %v4092_v59 }
0x218d   :  { %v5485_v17 = vpop.eup %5484 }
0x218e   :  { %v2885_v63 = vsub.f32 %v5485_v17, %v2883_v19 }
0x218f   :  { %v5487_v20 = vpop.eup %5486 }
0x2190   :  { %2887 = vrot.lane.b32.xlu1 %v2885_v63, %s5727_s2  ;;  %v2878_v22 = vadd.f32 1.0, %v5487_v20 }
0x2192   :  { %5488 = vrcp.f32 %v2878_v22 }
0x219c   :  { %v5489_v32 = vpop.eup %5488 }
0x2202   :  { %v2888_v56 = vpop.permute.xlu1 %2887 }
0x2203   :  { %v2890_v3 = vmul.f32 %v5489_v32, %v2888_v56 }
0x2205   :  { %v2891_v45 = vadd.f32 %v2890_v3, %v2788_v13 }
0x2207   :  { %2980 = vrot.lane.b32.xlu0 %v2891_v45, %s5727_s2  ;;  %4779 = vmatmul.mubr.msk.f32.vlgmr.msra.gmra.mrb[28].mxu1 %vm269_vm1, %v2891_v45 }
0x2208   :  { %5243 = vmatpush3.bf16.msra.mxu1 %v6236_v16  ;;  %4797 = vmatprep.mubr.msk.f32.mxu1 %vm5725_vm0, %v5726_v18 }
0x2209   :  { %5244 = vmatprep.subr.bf16.mxu1 %v5724_v1 }
0x220c   :  { %5246 = vmatpush3.bf16.msra.mxu1 %v6239_v15 }
0x220d   :  { %5247 = vmatprep.subr.bf16.mxu1 %v5724_v1 }
0x2210   :  { %5249 = vmatpush3.bf16.msra.mxu1 %v6243_v31 }
0x2211   :  { %5250 = vmatprep.subr.bf16.mxu1 %v5724_v1 }
0x2214   :  { %5252 = vmatpush3.bf16.msra.mxu1 %v6248_v35 }
0x2215   :  { %5265 = vmatprep.subr.bf16.mxu1 %v5724_v1 }
0x2279   :  { %v2981_v37 = vpop.permute.xlu0 %2980 }
0x22da   :  { %v2969_v30 = vpop.f32.mrb[28].mxu1 }
0x22db   :  { %5490 = vtanh.f32 %v2969_v30  ;;  %v4780_v16 = vpop.f32.mrb[29].mxu1  ;;  %v4094_v38 = vmul.f32 -1.442695, %v2969_v30  ;;  %v3315_v30 = vld [vmem:[#allocation7 + $0x20] sm:$0xff] }
0x22dc   :  { %v3316_v16 = vld [vmem:[#allocation7 + $0x40] sm:$0xff] }
0x22dd   :  { %5492 = vpow2.f32 %v4094_v38  ;;  %v3318_v38 = vld [vmem:[#allocation7 + $0x80] sm:$0xff] }
0x22e5   :  { %v5491_v33 = vpop.eup %5490 }
0x22e6   :  { %v2983_v52 = vsub.f32 %v5491_v33, %v2981_v37  ;;  %v3317_v37 = vld [vmem:[#allocation7 + $0x60] sm:$0xff] }
0x22e7   :  { %v5493_v15 = vpop.eup %5492 }
0x22e8   :  { %2985 = vrot.lane.b32.xlu1 %v2983_v52, %s5727_s2  ;;  %v2976_v39 = vadd.f32 1.0, %v5493_v15  ;;  %v5269_v52 = vpack.c.bf16 %v3317_v37, %v3316_v16  ;;  %v3319_v15 = vld [vmem:[#allocation7 + $0xa0] sm:$0xff]  ;;  %v3651_v37 = vld [vmem:[#allocation9 + $0x38] sm:$0xff] }
0x22ea   :  { %5494 = vrcp.f32 %v2976_v39  ;;  %v5272_v39 = vpack.c.bf16 %v3319_v15, %v3318_v38 }
0x22f4   :  { %v5495_v31 = vpop.eup %5494 }
0x235a   :  { %v2986_v54 = vpop.permute.xlu1 %2985 }
0x235b   :  { %v2988_v46 = vmul.f32 %v5495_v31, %v2986_v54 }
0x235d   :  { %v6405_v47 = vadd.f32 %v2988_v46, %v2891_v45  ;;  %v3314_v45 = vld [vmem:[#allocation7] sm:$0xff] }
0x235e   :  { %v5266_v33 = vpack.c.bf16 %v3315_v30, %v3314_v45  ;;  %v3646_v45 = vld [vmem:[#allocation9 + $0x10] sm:$0xff] }
0x235f   :  { %3087 = vrot.lane.b32.xlu0 %v6405_v47, %s5727_s2  ;;  %4095 = vmatmul.mubr.msk.f32.vlgmr.msra.gmra.mrb[30].mxu0 %vm269_vm1, %v6405_v47 }
0x2360   :  { %4816 = vmatprep.mubr.msk.f32.mxu0 %vm5725_vm0, %v5726_v18  ;;  %5255 = vmatpush3.bf16.msra.mxu0 %v5254_v62  ;;  %v3416_v62 = vld [vmem:[#allocation7 + $0x48] sm:$0xff] }
0x2361   :  { %5256 = vmatprep.subr.bf16.mxu0 %v5724_v1  ;;  %v5283_v7 = vpack.c.bf16 %v3418_v4, %v3416_v62  ;;  %v3535_v4 = vld [vmem:[#allocation7 + $0x78] sm:$0xff] }
0x2364   :  { %5258 = vmatpush3.bf16.msra.mxu0 %v5257_v6  ;;  %v3421_v6 = vld [vmem:[#allocation7 + $0x90] sm:$0xff] }
0x2365   :  { %5259 = vmatprep.subr.bf16.mxu0 %v5724_v1 }
0x2368   :  { %5261 = vmatpush3.bf16.msra.mxu0 %v5260_v9  ;;  %v5285_v9 = vpack.c.bf16 %v3423_v5, %v3421_v6  ;;  %v3536_v5 = vld [vmem:[#allocation7 + $0x98] sm:$0xff] }
0x2369   :  { %5262 = vmatprep.subr.bf16.mxu0 %v5724_v1 }
0x236c   :  { %5264 = vmatpush3.bf16.msra.mxu0 %v5263_v14  ;;  %v3425_v14 = vld [vmem:[#allocation7 + $0xd0] sm:$0xff] }
0x23d1   :  { %v3088_v51 = vpop.permute.xlu0 %3087 }
0x2432   :  { %v3075_v35 = vpop.f32.mrb[30].mxu0 }
0x2433   :  { %v3086_v50 = vmax.f32 %v3075_v35, 0.0  ;;  %v3077_v44 = vpop.f32.mrb[31].mxu0  ;;  %v4096_v61 = vmul.f32 -1.442695, %v3075_v35  ;;  %v3321_v35 = vld [vmem:[#allocation7 + $0xe0] sm:$0xff] }
0x2434   :  { %v4097_v53 = vmul.f32 -1.442695, %v3077_v44 }
0x2435   :  { %v3090_v55 = vsub.f32 %v3086_v50, %v3088_v51 }
0x2436   :  { %5496 = vpow2.f32 %v4097_v53 }
0x2437   :  { %3092 = vrot.lane.b32.xlu1 %v3090_v55, %s5727_s2 }
0x2440   :  { %v5497_v57 = vpop.eup %5496 }
0x2441   :  { %v3100_v25 = vadd.f32 1.0, %v5497_v57 }
0x2443   :  { %5498 = vrcp.f32 %v3100_v25 }
0x2444   :  { %5500 = vpow2.f32 %v4096_v61 }
0x244d   :  { %v5499_v60 = vpop.eup %5498 }
0x244e   :  { %v3103_v49 = vsub.f32 %v5499_v60, %v3088_v51  ;;  %v5501_v58 = vpop.eup %5500 }
0x244f   :  { %v3083_v41 = vadd.f32 1.0, %v5501_v58  ;;  %v3413_v58 = vld [vmem:[#allocation7 + $0x10] sm:$0xff] }
0x2450   :  { %3105 = vrot.lane.b32.xlu1 %v3103_v49, %s5727_s2 }
0x2451   :  { %5502 = vrcp.f32 %v3083_v41  ;;  %v3415_v41 = vld [vmem:[#allocation7 + $0x30] sm:$0xff] }
0x245b   :  { %v5503_v27 = vpop.eup %5502 }
0x24a9   :  { %v3093_v29 = vpop.permute.xlu1 %3092 }
0x24aa   :  { %v3095_v36 = vmul.f32 %v5503_v27, %v3093_v29  ;;  %v3412_v27 = vld [vmem:[#allocation7 + $0x8] sm:$0xff]  ;;  %v5277_v29 = vpack.c.bf16 %v3415_v41, %v3413_v58  ;;  %v3638_v41 = vld [vmem:[#allocation3 + $0x10] sm:$0xff] }
0x24ab   :  { %v3637_v58 = vld [vmem:[#allocation3 + $0x8] sm:$0xff] }
0x24ac   :  { %v3096_v0 = vadd.f32 %v3095_v36, %v6405_v47  ;;  %v3414_v36 = vld [vmem:[#allocation7 + $0x28] sm:$0xff]  ;;  %5278 = vmatprep.subr.bf16.mxu0 %v5277_v29  ;;  %v3640_v29 = vld [vmem:[#allocation3 + $0x20] sm:$0xff] }
0x24ad   :  { %v5279_v23 = vpack.c.bf16 %v3414_v36, %v3412_v27  ;;  %v3639_v27 = vld [vmem:[#allocation3 + $0x18] sm:$0xff]  ;;  %v3641_v36 = vld [vmem:[#allocation3 + $0x28] sm:$0xff] }
0x24ae   :  { %3197 = vrot.lane.b32.xlu0 %v3096_v0, %s5727_s2  ;;  %4798 = vmatmul.mubr.msk.f32.vlgmr.msra.gmra.mrb[30].mxu1 %vm269_vm1, %v3096_v0  ;;  %v3207_v59 = vadd.f32 %v3096_v0, %v6405_v47 }
0x24af   :  { %4835 = vmatprep.mubr.msk.f32.mxu1 %vm5725_vm0, %v5726_v18  ;;  %5267 = vmatpush3.bf16.msra.mxu1 %v5266_v33  ;;  %v3649_v33 = vld [vmem:[#allocation9 + $0x28] sm:$0xff] }
0x24b0   :  { %5268 = vmatprep.subr.bf16.mxu1 %v5724_v1 }
0x24b3   :  { %5270 = vmatpush3.bf16.msra.mxu1 %v5269_v52 }
0x24b4   :  { %5271 = vmatprep.subr.bf16.mxu1 %v5724_v1 }
0x24b7   :  { %5273 = vmatpush3.bf16.msra.mxu1 %v5272_v39  ;;  %v5309_v39 = vpack.c.bf16 %v3651_v37, %v3649_v33  ;;  %v3663_v37 = vshrl.u32 %v80_v42, 7 }
0x24b8   :  { %5274 = vmatprep.subr.bf16.mxu1 %v5724_v1 }
0x24c2   :  { %v3106_v24 = vpop.permute.xlu1 %3105 }
0x24c3   :  { %v3108_v48 = vmul.f32 %v5499_v60, %v3106_v24 }
0x24c5   :  { %v3109_v17 = vadd.f32 %v3108_v48, %v6405_v47  ;;  %v3320_v47 = vld [vmem:[#allocation7 + $0xc0] sm:$0xff]  ;;  %v3645_v48 = vld [vmem:[#allocation9 + $0x8] sm:$0xff] }
0x24c6   :  { %v5275_v50 = vpack.c.bf16 %v3321_v35, %v3320_v47  ;;  %v3655_v47 = vld [vmem:[#allocation9 + $0x58] sm:$0xff] }
0x24c7   :  { %v3208_v22 = vadd.f32 %v3207_v59, %v3109_v17  ;;  %v3647_v17 = vld [vmem:[#allocation9 + $0x18] sm:$0xff] }
0x24c8   :  { %5276 = vmatpush3.bf16.msra.mxu1 %v5275_v50 }
0x24c9   :  { %5293 = vmatprep.subr.bf16.mxu1 %v5724_v1 }
0x2520   :  { %v3198_v43 = vpop.permute.xlu0 %3197 }
0x2581   :  { %v3187_v28 = vpop.f32.mrb[30].mxu1 }
0x2582   :  { %v3200_v8 = vsub.f32 %v3187_v28, %v3198_v43  ;;  %v4799_v21 = vpop.f32.mrb[31].mxu1  ;;  %v4099_v12 = vmul.f32 -1.442695, %v3187_v28  ;;  %v3427_v43 = vld [vmem:[#allocation7 + $0xf0] sm:$0xff]  ;;  %v5287_v28 = vpack.c.bf16 %v3422_v10, %v3420_v11  ;;  %v3538_v11 = vld [vmem:[#allocation7 + $0xd8] sm:$0xff] }
0x2583   :  { %v3424_v21 = vld [vmem:[#allocation7 + $0xc8] sm:$0xff] }
0x2584   :  { %3202 = vrot.lane.b32.xlu0 %v3200_v8, %s5727_s2  ;;  %5504 = vpow2.f32 %v4099_v12  ;;  %v5289_v8 = vpack.c.bf16 %v3427_v43, %v3425_v14  ;;  %v3426_v12 = vld [vmem:[#allocation7 + $0xe8] sm:$0xff] }
0x258e   :  { %v5505_v13 = vpop.eup %5504 }
0x258f   :  { %v3194_v34 = vadd.f32 1.0, %v5505_v13  ;;  %v5291_v13 = vpack.c.bf16 %v3426_v12, %v3424_v21 }
0x2591   :  { %5506 = vrcp.f32 %v3194_v34 }
0x259b   :  { %v5507_v19 = vpop.eup %5506 }
0x25f6   :  { %v3203_v63 = vpop.permute.xlu0 %3202 }
0x25f7   :  { %v3205_v20 = vmul.f32 %v5507_v19, %v3203_v63  ;;  %v5305_v19 = vpack.c.bf16 %v3647_v17, %v3645_v48 }
0x25f9   :  { %v3206_v32 = vadd.f32 %v3205_v20, %v3096_v0  ;;  %v3417_v0 = vld [vmem:[#allocation7 + $0x50] sm:$0xff] }
0x25fa   :  { %v5281_v2 = vpack.c.bf16 %v3419_v40, %v3417_v0  ;;  %v3532_v40 = vld [vmem:[#allocation7 + $0x18] sm:$0xff] }
0x25fb   :  { %v3209_v56 = vadd.f32 %v3208_v22, %v3206_v32 }
0x25fd   :  { %v3210_v3 = vmul.f32 0.25, %v3209_v56 }
0x25ff   :  { %3212 = vst.msk [vmem:[#allocation3 + $0x30] sm:$0xff] %vm269_vm1, %v3210_v3  ;;  %3304 = vrot.lane.b32.xlu1 %v3210_v3, %s5727_s2  ;;  %4817 = vmatmul.mubr.msk.f32.vlgmr.msra.gmra.mrb[32].mxu0 %vm269_vm1, %v3210_v3 }
0x2600   :  { %3495 = vmatprep.mubr.f32.mxu0 %v5726_v18  ;;  %5280 = vmatpush1.bf16.msra.mxu0 %v5279_v23  ;;  %v3533_v23 = vld [vmem:[#allocation7 + $0x38] sm:$0xff] }
0x2601   :  { %5282 = vmatprep.subr.bf16.mxu0 %v5281_v2  ;;  %v3534_v2 = vld [vmem:[#allocation7 + $0x58] sm:$0xff]  ;;  %v5294_v62 = vpack.c.bf16 %v3533_v23, %v3532_v40 }
0x2602   :  { %v5297_v6 = vpack.c.bf16 %v3535_v4, %v3534_v2 }
0x2604   :  { %5284 = vmatpush1.bf16.msra.mxu0 %v5283_v7  ;;  %v3537_v7 = vld [vmem:[#allocation7 + $0xb8] sm:$0xff] }
0x2605   :  { %5286 = vmatprep.subr.bf16.mxu0 %v5285_v9  ;;  %v5300_v9 = vpack.c.bf16 %v3537_v7, %v3536_v5 }
0x2606   :  { %v3642_v0 = vld [vmem:[#allocation3 + $0x30] sm:$0xff] }
0x2608   :  { %5288 = vmatpush1.bf16.msra.mxu0 %v5287_v28 }
0x2609   :  { %5290 = vmatprep.subr.bf16.mxu0 %v5289_v8 }
0x260c   :  { %5292 = vmatpush1.bf16.msra.mxu0 %v5291_v13 }
0x260d   :  { %5306 = vmatprep.subr.bf16.mxu0 %v5305_v19 }
0x2671   :  { %v3305_v51 = vpop.permute.xlu1 %3304 }
0x26d2   :  { %v3292_v31 = vpop.f32.mrb[32].mxu0 }
0x26d3   :  { %v3296_v54 = vadd.f32 %v6038_v26, %v3292_v31  ;;  %v4818_v46 = vpop.f32.mrb[33].mxu0  ;;  %v3648_v31 = vld [vmem:[#allocation9 + $0x20] sm:$0xff] }
0x26d4   :  { %v3653_v46 = vld [vmem:[#allocation9 + $0x48] sm:$0xff] }
0x26d5   :  { %5508 = vtanh.f32 %v3296_v54  ;;  %v4101_v55 = vmul.f32 -1.442695, %v3296_v54  ;;  %v3650_v54 = vld [vmem:[#allocation9 + $0x30] sm:$0xff]  ;;  %v5313_v50 = vpack.c.bf16 %v3655_v47, %v3653_v46  ;;  %v3668_v47 = vsub.s32 1, %v3663_v37 }
0x26d6   :  { %v5311_v35 = vpack.c.bf16 %v3650_v54, %v3648_v31 }
0x26d7   :  { %5510 = vpow2.f32 %v4101_v55  ;;  %v3659_v55 = vld [vmem:[#allocation9 + $0x78] sm:$0xff] }
0x26df   :  { %v5509_v44 = vpop.eup %5508 }
0x26e0   :  { %v3307_v53 = vsub.f32 %v5509_v44, %v3305_v51  ;;  %v3652_v44 = vld [vmem:[#allocation9 + $0x40] sm:$0xff]  ;;  %v3654_v51 = vld [vmem:[#allocation9 + $0x50] sm:$0xff] }
0x26e1   :  { %v5511_v57 = vpop.eup %5510 }
0x26e2   :  { %3309 = vrot.lane.b32.xlu0 %v3307_v53, %s5727_s2  ;;  %v3300_v25 = vadd.f32 1.0, %v5511_v57  ;;  %v3657_v53 = vld [vmem:[#allocation9 + $0x68] sm:$0xff]  ;;  %v5315_v57 = vpack.c.bf16 %v3654_v51, %v3652_v44 }
0x26e4   :  { %5512 = vrcp.f32 %v3300_v25  ;;  %v5317_v25 = vpack.c.bf16 %v3659_v55, %v3657_v53 }
0x26ee   :  { %v5513_v60 = vpop.eup %5512 }
0x2754   :  { %v3310_v26 = vpop.permute.xlu0 %3309 }
0x2755   :  { %v3312_v49 = vmul.f32 %v5513_v60, %v3310_v26  ;;  %v3656_v60 = vld [vmem:[#allocation9 + $0x60] sm:$0xff]  ;;  %v3658_v26 = vld [vmem:[#allocation9 + $0x70] sm:$0xff] }
0x2757   :  { %v3313_v61 = vadd.f32 %v3312_v49, %v3210_v3  ;;  %v3644_v3 = vld [vmem:[#allocation9] sm:$0xff]  ;;  %v5319_v49 = vpack.c.bf16 %v3658_v26, %v3656_v60 }
0x2758   :  { %v5307_v38 = vpack.c.bf16 %v3646_v45, %v3644_v3 }
0x2759   :  { %3402 = vrot.lane.b32.xlu1 %v3313_v61, %s5727_s2  ;;  %4836 = vmatmul.mubr.msk.f32.vlgmr.msra.gmra.mrb[32].mxu1 %vm269_vm1, %v3313_v61 }
0x275a   :  { %4854 = vmatprep.mubr.msk.f32.mxu1 %vm5725_vm0, %v5726_v18  ;;  %5295 = vmatpush3.bf16.msra.mxu1 %v5294_v62 }
0x275b   :  { %5296 = vmatprep.subr.bf16.mxu1 %v5724_v1 }
0x275e   :  { %5298 = vmatpush3.bf16.msra.mxu1 %v5297_v6 }
0x275f   :  { %5299 = vmatprep.subr.bf16.mxu1 %v5724_v1 }
0x2762   :  { %5301 = vmatpush3.bf16.msra.mxu1 %v5300_v9 }
0x2763   :  { %5302 = vmatprep.subr.bf16.mxu1 %v5724_v1 }
0x27cb   :  { %v3403_v59 = vpop.permute.xlu1 %3402 }
0x282c   :  { %v3391_v34 = vpop.f32.mrb[32].mxu1 }
0x282d   :  { %5514 = vtanh.f32 %v3391_v34  ;;  %v4837_v24 = vpop.f32.mrb[33].mxu1  ;;  %v4103_v22 = vmul.f32 -1.442695, %v3391_v34 }
0x282f   :  { %5516 = vpow2.f32 %v4103_v22 }
0x2837   :  { %v5515_v63 = vpop.eup %5514 }
0x2838   :  { %v3405_v20 = vsub.f32 %v5515_v63, %v3403_v59 }
0x2839   :  { %v5517_v32 = vpop.eup %5516 }
0x283a   :  { %3407 = vrot.lane.b32.xlu0 %v3405_v20, %s5727_s2  ;;  %v3398_v56 = vadd.f32 1.0, %v5517_v32 }
0x283c   :  { %5518 = vrcp.f32 %v3398_v56 }
0x2846   :  { %v5519_v30 = vpop.eup %5518 }
0x28ac   :  { %v3408_v16 = vpop.permute.xlu0 %3407 }
0x28ad   :  { %v3410_v52 = vmul.f32 %v5519_v30, %v3408_v16 }
0x28af   :  { %v6465_v15 = vadd.f32 %v3410_v52, %v3313_v61  ;;  %v3636_v61 = vld [vmem:[#allocation3] sm:$0xff]  ;;  %v3664_v52 = vsub.s32 0, %v3663_v37 }
0x28b1   :  { %3509 = vrot.lane.b32.xlu1 %v6465_v15, %s5727_s2  ;;  %4104 = vmatmul.mubr.msk.f32.vlgmr.msra.gmra.mrb[34].mxu0 %vm269_vm1, %v6465_v15 }
0x28b2   :  { %5308 = vmatpush1.bf16.msra.mxu0 %v5307_v38  ;;  %3760 = vmatprep.mubr.f32.mxu0 %v5726_v18  ;;  %v3660_v38 = vld [vmem:[%s6677_s6] sm:$0x3] }
0x28b3   :  { %5310 = vmatprep.subr.bf16.mxu0 %v5309_v39  ;;  %v6498_v39 = vrot.slane %v3660_v38, %v3664_v52 }
0x28b6   :  { %5312 = vmatpush1.bf16.msra.mxu0 %v5311_v35  ;;  %v6509_v35 = vrot.slane %v3660_v38, %v3668_v47 }
0x28b7   :  { %5314 = vmatprep.subr.bf16.mxu0 %v5313_v50 }
0x28ba   :  { %5316 = vmatpush1.bf16.msra.mxu0 %v5315_v57 }
0x28bb   :  { %5318 = vmatprep.subr.bf16.mxu0 %v5317_v25 }
0x28be   :  { %5320 = vmatpush1.bf16.msra.mxu0 %v5319_v49 }
0x28c1   :  { %4109 = vmatmul.mubr.msk.f32.vlgmr.msra.gmra.mrb[36].mxu0 %vm269_vm1, %v3636_v61 }
0x28c2   :  { %3766 = vmatprep.mubr.f32.mxu0 %v5726_v18 }
0x28c5   :  { %4110 = vmatmul.mubr.msk.f32.gmra.mrb[38].mxu0 %vm269_vm1, %v3637_v58 }
0x28c6   :  { %3772 = vmatprep.mubr.f32.mxu0 %v5726_v18 }
0x28c9   :  { %4111 = vmatmul.mubr.msk.f32.gmra.mrb[40].mxu0 %vm269_vm1, %v3638_v41 }
0x28ca   :  { %3778 = vmatprep.mubr.f32.mxu0 %v5726_v18 }
0x28cd   :  { %4112 = vmatmul.mubr.msk.f32.gmra.mrb[42].mxu0 %vm269_vm1, %v3639_v27 }
0x28ce   :  { %3784 = vmatprep.mubr.f32.mxu0 %v5726_v18 }
0x28d1   :  { %4113 = vmatmul.mubr.msk.f32.gmra.mrb[44].mxu0 %vm269_vm1, %v3640_v29 }
0x28d2   :  { %3790 = vmatprep.mubr.f32.mxu0 %v5726_v18 }
0x28d5   :  { %4114 = vmatmul.mubr.msk.f32.gmra.mrb[46].mxu0 %vm269_vm1, %v3641_v36 }
0x28d6   :  { %3796 = vmatprep.mubr.f32.mxu0 %v5726_v18 }
0x28d9   :  { %4115 = vmatmul.mubr.msk.f32.gmra.mrb[48].mxu0 %vm269_vm1, %v3642_v0 }
0x28da   :  { %3802 = vmatprep.mubr.f32.mxu0 %v5726_v18  ;;  %v3539_v18 = vld [vmem:[#allocation7 + $0xf8] sm:$0xff] }
0x28db   :  { %v5303_v10 = vpack.c.bf16 %v3539_v18, %v3538_v11 }
0x28dd   :  { %5304 = vmatpush3.bf16.msra.mxu1 %v5303_v10 }
0x2923   :  { %v3510_v8 = vpop.permute.xlu1 %3509 }
0x2984   :  { %v3497_v14 = vpop.f32.mrb[34].mxu0 }
0x2985   :  { %v3508_v43 = vmax.f32 %v3497_v14, 0.0  ;;  %v3499_v28 = vpop.f32.mrb[35].mxu0  ;;  %v4105_v53 = vmul.f32 -1.442695, %v3497_v14 }
0x2986   :  { %v4106_v21 = vmul.f32 -1.442695, %v3499_v28 }
0x2987   :  { %v3512_v12 = vsub.f32 %v3508_v43, %v3510_v8 }
0x2988   :  { %5520 = vpow2.f32 %v4106_v21 }
0x2989   :  { %3514 = vrot.lane.b32.xlu0 %v3512_v12, %s5727_s2 }
0x2992   :  { %v5521_v13 = vpop.eup %5520 }
0x2993   :  { %v3522_v34 = vadd.f32 1.0, %v5521_v13 }
0x2994   :  { %v3762_v24 = vpop.f32.mrb[36].mxu0 }
0x2995   :  { %5522 = vrcp.f32 %v3522_v34  ;;  %v3764_v48 = vpop.f32.mrb[37].mxu0  ;;  %v3763_v31 = vadd.f32 %v3762_v24, %v6498_v39 }
0x2996   :  { %5524 = vpow2.f32 %v4105_v53  ;;  %v3765_v62 = vadd.f32 %v3764_v48, %v6509_v35 }
0x2998   :  { %v3768_v17 = vpop.f32.mrb[38].mxu0 }
0x2999   :  { %v3770_v1 = vpop.f32.mrb[39].mxu0  ;;  %v6529_v29 = vadd.f32 %v3768_v17, %v6498_v39 }
0x299a   :  { %v6513_v50 = vadd.f32 %v3770_v1, %v6509_v35 }
0x299c   :  { %v3774_v19 = vpop.f32.mrb[40].mxu0 }
0x299d   :  { %v3776_v63 = vpop.f32.mrb[41].mxu0  ;;  %v3775_v54 = vadd.f32 %v3774_v19, %v6498_v39 }
0x299e   :  { %v3777_v7 = vadd.f32 %v3776_v63, %v6509_v35 }
0x299f   :  { %v6490_v59 = vpop.eup %5522 }
0x29a0   :  { %v3780_v20 = vpop.f32.mrb[42].mxu0  ;;  %v3525_v22 = vsub.f32 %v6490_v59, %v3510_v8  ;;  %v5525_v55 = vpop.eup %5524 }
0x29a1   :  { %v3782_v32 = vpop.f32.mrb[43].mxu0  ;;  %v6503_v46 = vadd.f32 %v3780_v20, %v6498_v39  ;;  %v3505_v57 = vadd.f32 1.0, %v5525_v55 }
0x29a2   :  { %3527 = vrot.lane.b32.xlu0 %v3525_v22, %s5727_s2  ;;  %v6517_v44 = vadd.f32 %v3782_v32, %v6509_v35 }
0x29a3   :  { %5526 = vrcp.f32 %v3505_v57 }
0x29a4   :  { %v3786_v56 = vpop.f32.mrb[44].mxu0 }
0x29a5   :  { %v3788_v3 = vpop.f32.mrb[45].mxu0  ;;  %v3787_v0 = vadd.f32 %v3786_v56, %v6498_v39 }
0x29a6   :  { %v3789_v11 = vadd.f32 %v3788_v3, %v6509_v35 }
0x29a8   :  { %v3792_v45 = vpop.f32.mrb[46].mxu0 }
0x29a9   :  { %v3794_v30 = vpop.f32.mrb[47].mxu0  ;;  %v6507_v42 = vadd.f32 %v3792_v45, %v6498_v39 }
0x29aa   :  { %v6521_v51 = vadd.f32 %v3794_v30, %v6509_v35 }
0x29ac   :  { %v3798_v16 = vpop.f32.mrb[48].mxu0 }
0x29ad   :  { %v3800_v33 = vpop.f32.mrb[49].mxu0  ;;  %v5527_v25 = vpop.eup %5526  ;;  %v3799_v23 = vadd.f32 %v3798_v16, %v6498_v39 }
0x29ae   :  { %v3801_v18 = vadd.f32 %v3800_v33, %v6509_v35 }
0x29c1   :  { %3809 = vmax.xlane.f32.xlu0 %v3763_v31 }
0x29c5   :  { %3813 = vmax.xlane.f32.xlu0 %v3775_v54 }
0x29c9   :  { %3815 = vmax.xlane.f32.xlu0 %v6503_v46 }
0x29cd   :  { %3819 = vmax.xlane.f32.xlu0 %v6507_v42 }
0x29d1   :  { %3899 = vmax.xlane.f32.xlu0 %v6513_v50 }
0x29d5   :  { %3903 = vmax.xlane.f32.xlu0 %v6517_v44 }
0x29d9   :  { %3907 = vmax.xlane.f32.xlu0 %v6521_v51 }
0x29fb   :  { %v3515_v60 = vpop.permute.xlu0 %3514 }
0x29fc   :  { %v3517_v26 = vmul.f32 %v5527_v25, %v3515_v60 }
0x29fe   :  { %v3518_v49 = vadd.f32 %v3517_v26, %v6465_v15 }
0x2a00   :  { %3619 = vrot.lane.b32.xlu1 %v3518_v49, %s5727_s2  ;;  %4855 = vmatmul.mubr.msk.f32.vlgmr.msra.gmra.mrb[34].mxu1 %vm269_vm1, %v3518_v49  ;;  %v3629_v24 = vadd.f32 %v3518_v49, %v6465_v15 }
0x2a14   :  { %v3528_v36 = vpop.permute.xlu0 %3527 }
0x2a15   :  { %v3530_v21 = vmul.f32 %v6490_v59, %v3528_v36 }
0x2a17   :  { %v3531_v12 = vadd.f32 %v3530_v21, %v6465_v15 }
0x2a19   :  { %v3630_v17 = vadd.f32 %v3629_v24, %v3531_v12 }
0x2a4e   :  { %v3810_v40 = vpop.xlane.xlu0 %3809 }
0x2a4f   :  { %v6534_v2 = vsub.f32 %v3763_v31, %v3810_v40 }
0x2a51   :  { %v3833_v6 = vmul.f32 1.442695, %v6534_v2 }
0x2a52   :  { %v3814_v4 = vpop.xlane.xlu0 %3813 }
0x2a53   :  { %v6538_v5 = vsub.f32 %v3775_v54, %v3814_v4  ;;  %5528 = vpow2.f32 %v3833_v6 }
0x2a55   :  { %v3837_v9 = vmul.f32 1.442695, %v6538_v5 }
0x2a56   :  { %v3816_v6 = vpop.xlane.xlu0 %3815 }
0x2a57   :  { %5530 = vpow2.f32 %v3837_v9 }
0x2a5d   :  { %v5529_v10 = vpop.eup %5528 }
0x2a61   :  { %v5531_v14 = vpop.eup %5530 }
0x2a72   :  { %v3620_v61 = vpop.permute.xlu1 %3619 }
0x2ad3   :  { %v3609_v58 = vpop.f32.mrb[34].mxu1 }
0x2ad4   :  { %v3622_v41 = vsub.f32 %v3609_v58, %v3620_v61  ;;  %v4856_v27 = vpop.f32.mrb[35].mxu1  ;;  %v4108_v43 = vmul.f32 -1.442695, %v3609_v58 }
0x2ad6   :  { %3624 = vrot.lane.b32.xlu1 %v3622_v41, %s5727_s2  ;;  %5532 = vpow2.f32 %v4108_v43 }
0x2ae0   :  { %v5533_v28 = vpop.eup %5532 }
0x2ae1   :  { %v3616_v8 = vadd.f32 1.0, %v5533_v28 }
0x2ae3   :  { %5534 = vrcp.f32 %v3616_v8 }
0x2aed   :  { %v5535_v13 = vpop.eup %5534 }
0x2afa   :  { %3811 = vmax.xlane.f32.xlu1 %v6529_v29 }
0x2afe   :  { %3817 = vmax.xlane.f32.xlu1 %v3787_v0 }
0x2b02   :  { %3821 = vmax.xlane.f32.xlu1 %v3799_v23 }
0x2b06   :  { %3897 = vmax.xlane.f32.xlu1 %v3765_v62 }
0x2b0a   :  { %3901 = vmax.xlane.f32.xlu1 %v3777_v7 }
0x2b0e   :  { %3905 = vmax.xlane.f32.xlu1 %v3789_v11 }
0x2b12   :  { %3909 = vmax.xlane.f32.xlu1 %v3801_v18 }
0x2b16   :  { %3849 = vadd.xlane.f32.xlu1 %v5529_v10 }
0x2b1a   :  { %3853 = vadd.xlane.f32.xlu1 %v5531_v14 }
0x2b48   :  { %v3625_v34 = vpop.permute.xlu1 %3624 }
0x2b49   :  { %v3627_v48 = vmul.f32 %v5535_v13, %v3625_v34 }
0x2b4b   :  { %v3628_v1 = vadd.f32 %v3627_v48, %v3518_v49 }
0x2b4d   :  { %v3631_v19 = vadd.f32 %v3630_v17, %v3628_v1 }
0x2b4f   :  { %v3632_v63 = vmul.f32 0.25, %v3631_v19 }
0x2b51   :  { %3634 = vst.msk [vmem:[#allocation3 + $0x38] sm:$0xff] %vm269_vm1, %v3632_v63  ;;  %3635 = vst.msk [vmem:[#allocation11] sm:$0xff] %vm269_vm1, %v3632_v63 }
0x2b58   :  { %v3643_v20 = vld [vmem:[#allocation3 + $0x38] sm:$0xff] }
0x2b59   :  { %4116 = vmatmul.mubr.msk.f32.gmra.mrb[50].mxu0 %vm269_vm1, %v3643_v20 }
0x2b87   :  { %v3812_v22 = vpop.xlane.xlu1 %3811 }
0x2b88   :  { %v6571_v9 = vsub.f32 %v6529_v29, %v3812_v22 }
0x2b8b   :  { %v3818_v59 = vpop.xlane.xlu1 %3817 }
0x2b8c   :  { %v6550_v32 = vsub.f32 %v3787_v0, %v3818_v59 }
0x2b8e   :  { %v3841_v56 = vmul.f32 1.442695, %v6550_v32 }
0x2b8f   :  { %v3822_v3 = vpop.xlane.xlu1 %3821 }
0x2b90   :  { %5536 = vpow2.f32 %v3841_v56  ;;  %v6553_v15 = vsub.f32 %v3799_v23, %v3822_v3 }
0x2b92   :  { %v3845_v45 = vmul.f32 1.442695, %v6553_v15 }
0x2b93   :  { %v3898_v30 = vpop.xlane.xlu1 %3897 }
0x2b94   :  { %5538 = vpow2.f32 %v3845_v45  ;;  %v6556_v16 = vsub.f32 %v3765_v62, %v3898_v30 }
0x2b96   :  { %v3921_v33 = vmul.f32 1.442695, %v6556_v16 }
0x2b97   :  { %v3902_v37 = vpop.xlane.xlu1 %3901 }
0x2b98   :  { %5540 = vpow2.f32 %v3921_v33  ;;  %v6559_v52 = vsub.f32 %v3777_v7, %v3902_v37  ;;  %v3820_v7 = vpop.xlane.xlu0 %3819 }
0x2b99   :  { %v6579_v43 = vsub.f32 %v6507_v42, %v3820_v7 }
0x2b9a   :  { %v5537_v38 = vpop.eup %5536  ;;  %v3925_v31 = vmul.f32 1.442695, %v6559_v52 }
0x2b9b   :  { %v3906_v54 = vpop.xlane.xlu1 %3905  ;;  %3857 = vadd.xlane.f32.xlu1 %v5537_v38  ;;  %v3843_v21 = vmul.f32 1.442695, %v6579_v43 }
0x2b9c   :  { %5542 = vpow2.f32 %v3925_v31  ;;  %v6562_v47 = vsub.f32 %v3789_v11, %v3906_v54  ;;  %v6574_v11 = vsub.f32 %v6503_v46, %v3816_v6  ;;  %v3900_v14 = vpop.xlane.xlu0 %3899 }
0x2b9d   :  { %v6587_v12 = vsub.f32 %v6513_v50, %v3900_v14 }
0x2b9e   :  { %v5539_v53 = vpop.eup %5538  ;;  %v3929_v55 = vmul.f32 1.442695, %v6562_v47 }
0x2b9f   :  { %v3910_v57 = vpop.xlane.xlu1 %3909  ;;  %3861 = vadd.xlane.f32.xlu1 %v5539_v53 }
0x2ba0   :  { %5544 = vpow2.f32 %v3929_v55  ;;  %v6565_v25 = vsub.f32 %v3801_v18, %v3910_v57  ;;  %v3835_v18 = vmul.f32 1.442695, %v6571_v9  ;;  %v3904_v46 = vpop.xlane.xlu0 %3903 }
0x2ba1   :  { %v6592_v24 = vsub.f32 %v6517_v44, %v3904_v46 }
0x2ba2   :  { %v5541_v60 = vpop.eup %5540  ;;  %v3933_v26 = vmul.f32 1.442695, %v6565_v25 }
0x2ba3   :  { %v3850_v49 = vpop.xlane.xlu1 %3849  ;;  %3937 = vadd.xlane.f32.xlu1 %v5541_v60 }
0x2ba4   :  { %5546 = vpow2.f32 %v3933_v26  ;;  %v3908_v1 = vpop.xlane.xlu0 %3907 }
0x2ba5   :  { %5548 = vlog2.f32 %v3850_v49  ;;  %v6597_v20 = vsub.f32 %v6521_v51, %v3908_v1 }
0x2ba6   :  { %v5543_v61 = vpop.eup %5542 }
0x2ba7   :  { %3941 = vadd.xlane.f32.xlu1 %v5543_v61  ;;  %v3854_v58 = vpop.xlane.xlu1 %3853 }
0x2ba8   :  { %5550 = vlog2.f32 %v3854_v58 }
0x2baa   :  { %v5545_v41 = vpop.eup %5544 }
0x2bab   :  { %3945 = vadd.xlane.f32.xlu1 %v5545_v41 }
0x2bae   :  { %v5547_v27 = vpop.eup %5546 }
0x2baf   :  { %v5549_v36 = vpop.eup %5548  ;;  %3949 = vadd.xlane.f32.xlu1 %v5547_v27 }
0x2bb0   :  { %v3866_v0 = vmul.f32 0.6931472, %v5549_v36 }
0x2bb2   :  { %v5551_v40 = vpop.eup %5550  ;;  %v3881_v23 = vsub.f32 %v6534_v2, %v3866_v0  ;;  %v3839_v2 = vmul.f32 1.442695, %v6574_v11 }
0x2bb3   :  { %v3870_v62 = vmul.f32 0.6931472, %v5551_v40 }
0x2bb4   :  { %3889 = vst [vmem:[#allocation10] sm:$0xff] %v3881_v23 }
0x2bb5   :  { %v3883_v4 = vsub.f32 %v6538_v5, %v3870_v62 }
0x2bb7   :  { %3891 = vst [vmem:[#allocation10 + $0x10] sm:$0xff] %v3883_v4 }
0x2c28   :  { %v3858_v10 = vpop.xlane.xlu1 %3857 }
0x2c29   :  { %5552 = vlog2.f32 %v3858_v10 }
0x2c2a   :  { %5554 = vpow2.f32 %v3835_v18 }
0x2c2c   :  { %v3804_v5 = vpop.f32.mrb[50].mxu0  ;;  %v3862_v28 = vpop.xlane.xlu1 %3861 }
0x2c2d   :  { %v6582_v8 = vadd.f32 %v3804_v5, %v6498_v39  ;;  %5556 = vlog2.f32 %v3862_v28  ;;  %v3806_v29 = vpop.f32.mrb[51].mxu0  ;;  %v3923_v39 = vmul.f32 1.442695, %v6587_v12 }
0x2c2e   :  { %5558 = vpow2.f32 %v3839_v2  ;;  %v3807_v42 = vadd.f32 %v3806_v29, %v6509_v35  ;;  %v3927_v35 = vmul.f32 1.442695, %v6592_v24 }
0x2c2f   :  { %3823 = vmax.xlane.f32.xlu0 %v6582_v8 }
0x2c30   :  { %v3938_v13 = vpop.xlane.xlu1 %3937 }
0x2c31   :  { %5560 = vlog2.f32 %v3938_v13 }
0x2c32   :  { %5562 = vpow2.f32 %v3843_v21 }
0x2c33   :  { %v5553_v34 = vpop.eup %5552  ;;  %3911 = vmax.xlane.f32.xlu0 %v3807_v42 }
0x2c34   :  { %v3874_v48 = vmul.f32 0.6931472, %v5553_v34  ;;  %v3942_v17 = vpop.xlane.xlu1 %3941  ;;  %v5555_v19 = vpop.eup %5554 }
0x2c35   :  { %5564 = vlog2.f32 %v3942_v17 }
0x2c36   :  { %v3885_v50 = vsub.f32 %v6550_v32, %v3874_v48  ;;  %5566 = vpow2.f32 %v3923_v39  ;;  %v3931_v32 = vmul.f32 1.442695, %v6597_v20 }
0x2c37   :  { %v5557_v63 = vpop.eup %5556  ;;  %3851 = vadd.xlane.f32.xlu0 %v5555_v19 }
0x2c38   :  { %3893 = vst [vmem:[#allocation10 + $0x20] sm:$0xff] %v3885_v50  ;;  %v3878_v22 = vmul.f32 0.6931472, %v5557_v63  ;;  %v3946_v59 = vpop.xlane.xlu1 %3945  ;;  %v5559_v44 = vpop.eup %5558 }
0x2c39   :  { %5568 = vlog2.f32 %v3946_v59 }
0x2c3a   :  { %v3887_v56 = vsub.f32 %v6553_v15, %v3878_v22  ;;  %5570 = vpow2.f32 %v3927_v35 }
0x2c3b   :  { %v5561_v3 = vpop.eup %5560  ;;  %3855 = vadd.xlane.f32.xlu0 %v5559_v44 }
0x2c3c   :  { %3895 = vst [vmem:[#allocation10 + $0x30] sm:$0xff] %v3887_v56  ;;  %v3954_v45 = vmul.f32 0.6931472, %v5561_v3  ;;  %v3950_v30 = vpop.xlane.xlu1 %3949  ;;  %v5563_v33 = vpop.eup %5562 }
0x2c3d   :  { %5572 = vlog2.f32 %v3950_v30 }
0x2c3e   :  { %v3969_v51 = vsub.f32 %v6556_v16, %v3954_v45  ;;  %5574 = vpow2.f32 %v3931_v32 }
0x2c3f   :  { %v5565_v37 = vpop.eup %5564  ;;  %3859 = vadd.xlane.f32.xlu0 %v5563_v33 }
0x2c40   :  { %3977 = vst [vmem:[%s6679_s8] sm:$0xff] %v3969_v51  ;;  %v3958_v15 = vmul.f32 0.6931472, %v5565_v37  ;;  %v5567_v38 = vpop.eup %5566 }
0x2c42   :  { %v3971_v31 = vsub.f32 %v6559_v52, %v3958_v15 }
0x2c43   :  { %v5569_v54 = vpop.eup %5568  ;;  %3939 = vadd.xlane.f32.xlu0 %v5567_v38 }
0x2c44   :  { %3979 = vst [vmem:[%s6679_s8 + $0x10] sm:$0xff] %v3971_v31  ;;  %v3962_v53 = vmul.f32 0.6931472, %v5569_v54  ;;  %v5571_v55 = vpop.eup %5570 }
0x2c46   :  { %v3973_v16 = vsub.f32 %v6562_v47, %v3962_v53 }
0x2c47   :  { %v5573_v57 = vpop.eup %5572  ;;  %3943 = vadd.xlane.f32.xlu0 %v5571_v55 }
0x2c48   :  { %3981 = vst [vmem:[%s6679_s8 + $0x20] sm:$0xff] %v3973_v16  ;;  %v3966_v60 = vmul.f32 0.6931472, %v5573_v57  ;;  %v5575_v26 = vpop.eup %5574 }
0x2c4a   :  { %v3975_v52 = vsub.f32 %v6565_v25, %v3966_v60 }
0x2c4b   :  { %3947 = vadd.xlane.f32.xlu0 %v5575_v26 }
0x2c4c   :  { %3983 = vst [vmem:[%s6679_s8 + $0x30] sm:$0xff] %v3975_v52 }
0x2cbc   :  { %v3824_v49 = vpop.xlane.xlu0 %3823 }
0x2cbd   :  { %v6618_v61 = vsub.f32 %v6582_v8, %v3824_v49 }
0x2cbf   :  { %v3847_v47 = vmul.f32 1.442695, %v6618_v61 }
0x2cc0   :  { %v3912_v58 = vpop.xlane.xlu0 %3911 }
0x2cc1   :  { %5576 = vpow2.f32 %v3847_v47  ;;  %v6621_v41 = vsub.f32 %v3807_v42, %v3912_v58 }
0x2cc3   :  { %v3935_v27 = vmul.f32 1.442695, %v6621_v41 }
0x2cc4   :  { %v3852_v36 = vpop.xlane.xlu0 %3851 }
0x2cc5   :  { %5578 = vpow2.f32 %v3935_v27 }
0x2cc6   :  { %5580 = vlog2.f32 %v3852_v36 }
0x2cc8   :  { %v3856_v25 = vpop.xlane.xlu0 %3855 }
0x2cc9   :  { %5582 = vlog2.f32 %v3856_v25 }
0x2ccb   :  { %v5577_v0 = vpop.eup %5576 }
0x2ccc   :  { %3863 = vadd.xlane.f32.xlu0 %v5577_v0  ;;  %v3860_v40 = vpop.xlane.xlu0 %3859 }
0x2ccd   :  { %5584 = vlog2.f32 %v3860_v40 }
0x2ccf   :  { %v5579_v23 = vpop.eup %5578 }
0x2cd0   :  { %v5581_v62 = vpop.eup %5580  ;;  %3951 = vadd.xlane.f32.xlu0 %v5579_v23  ;;  %v3940_v4 = vpop.xlane.xlu0 %3939 }
0x2cd1   :  { %v3868_v6 = vmul.f32 0.6931472, %v5581_v62  ;;  %5586 = vlog2.f32 %v3940_v4 }
0x2cd3   :  { %v5583_v7 = vpop.eup %5582  ;;  %v3882_v18 = vsub.f32 %v6571_v9, %v3868_v6 }
0x2cd4   :  { %v3872_v10 = vmul.f32 0.6931472, %v5583_v7  ;;  %v3944_v14 = vpop.xlane.xlu0 %3943 }
0x2cd5   :  { %3890 = vst [vmem:[#allocation10 + $0x8] sm:$0xff] %v3882_v18  ;;  %5588 = vlog2.f32 %v3944_v14 }
0x2cd6   :  { %v3884_v2 = vsub.f32 %v6574_v11, %v3872_v10 }
0x2cd7   :  { %v5585_v5 = vpop.eup %5584 }
0x2cd8   :  { %3892 = vst [vmem:[#allocation10 + $0x18] sm:$0xff] %v3884_v2  ;;  %v3876_v28 = vmul.f32 0.6931472, %v5585_v5  ;;  %v3948_v8 = vpop.xlane.xlu0 %3947 }
0x2cd9   :  { %5590 = vlog2.f32 %v3948_v8 }
0x2cda   :  { %v3886_v29 = vsub.f32 %v6579_v43, %v3876_v28 }
0x2cdb   :  { %v5587_v46 = vpop.eup %5586 }
0x2cdc   :  { %3894 = vst [vmem:[#allocation10 + $0x28] sm:$0xff] %v3886_v29  ;;  %v3956_v21 = vmul.f32 0.6931472, %v5587_v46 }
0x2cde   :  { %v3970_v13 = vsub.f32 %v6587_v12, %v3956_v21 }
0x2cdf   :  { %v5589_v42 = vpop.eup %5588 }
0x2ce0   :  { %3978 = vst [vmem:[%s6679_s8 + $0x8] sm:$0xff] %v3970_v13  ;;  %v3960_v9 = vmul.f32 0.6931472, %v5589_v42 }
0x2ce2   :  { %v3972_v11 = vsub.f32 %v6592_v24, %v3960_v9 }
0x2ce3   :  { %v5591_v34 = vpop.eup %5590 }
0x2ce4   :  { %3980 = vst [vmem:[%s6679_s8 + $0x18] sm:$0xff] %v3972_v11  ;;  %v3964_v39 = vmul.f32 0.6931472, %v5591_v34 }
0x2ce6   :  { %v3974_v43 = vsub.f32 %v6597_v20, %v3964_v39 }
0x2ce8   :  { %3982 = vst [vmem:[%s6679_s8 + $0x28] sm:$0xff] %v3974_v43 }
0x2ce9   :  { %5673 = shalt.err (!%p5670_p0)
}
0x2cea   :  { %s5674_s22 = scalar_lea.hbm %s6680_s9, 128 }
0x2ceb   :  { %p5675_p1 = scmp.ne.s32.totalorder %s6680_s9, %s5674_s22  ;;  %p5678_p2 = scmp.lt.u32.totalorder %s5674_s22, %s6680_s9 }
0x2ced   :  { %p5680_p3 = pnand %p5678_p2, %p5675_p1 }
0x2cef   :  { %5683 = shalt.err (!%p5680_p3)
}
0x2cf0   :  { %4008 = dma.vmem_to_hbm [thread:$0]  %s4006_s0, 128, %s6680_s9, [#allocation12]  }
0x2cf1   :  { %s5730_s6 = smov [#allocation10]  }
0x2cf2   :  { %s3990_s2 = sshll.u32 %s5730_s6, 4  ;;  %s3991_s2 = int_to_ptr.vmem [resolvable:$true] %s3990_s2 }
0x2cf3   :  { %s5684_s27 = scalar_lea.vmem %s3991_s2, 1024  ;;  %p5689_p5 = scmp.lt.s32.totalorder %s3991_s2, %s3991_s2 }
0x2cf4   :  { %p5685_p4 = scmp.ne.s32.totalorder %s3991_s2, %s5684_s27  ;;  %p5690_p6 = scmp.lt.s32.totalorder %s5684_s27, %s5684_s27 }
0x2cf6   :  { %p5691_p7 = por %p5690_p6, %p5689_p5 }
0x2cf8   :  { %p5692_p8 = pnand %p5691_p7, %p5685_p4 }
0x2d59   :  { %v3864_v12 = vpop.xlane.xlu0 %3863 }
0x2d5a   :  { %5592 = vlog2.f32 %v3864_v12 }
0x2d5d   :  { %v3952_v24 = vpop.xlane.xlu0 %3951 }
0x2d5e   :  { %5594 = vlog2.f32 %v3952_v24 }
0x2d64   :  { %v5593_v48 = vpop.eup %5592 }
0x2d65   :  { %v3880_v17 = vmul.f32 0.6931472, %v5593_v48 }
0x2d67   :  { %v3888_v1 = vsub.f32 %v6618_v61, %v3880_v17 }
0x2d68   :  { %v5595_v19 = vpop.eup %5594 }
0x2d69   :  { %3896 = vst [vmem:[#allocation10 + $0x38] sm:$0xff] %v3888_v1  ;;  %v3968_v50 = vmul.f32 0.6931472, %v5595_v19 }
0x2d6a   :  { %5695 = shalt.err (!%p5692_p8)
}
0x2d6b   :  { %s5696_s29 = scalar_lea.hbm %s6678_s7, 1024 }
0x2d6c   :  { %p5697_p9 = scmp.ne.s32.totalorder %s6678_s7, %s5696_s29  ;;  %p5700_p10 = scmp.lt.u32.totalorder %s5696_s29, %s6678_s7 }
0x2d6e   :  { %p5702_p11 = pnand %p5700_p10, %p5697_p9 }
0x2d70   :  { %5705 = shalt.err (!%p5702_p11)
}
0x2d71   :  { %3996 = dma.vmem_to_hbm [thread:$0]  %s3991_s2, 1024, %s6678_s7, [#allocation6], %s5718_s4, %s5718_s4, %s5719_s10   ;;  %v3976_v63 = vsub.f32 %v6621_v41, %v3968_v50 }
0x2d73   :  { %3984 = vst [vmem:[%s6679_s8 + $0x38] sm:$0xff] %v3976_v63 }
0x2d74   :  { %5710 = dma.done.wait [#allocation6], 1024  }
0x2d75   :  { %5711 = vsyncadd [#allocation6], 4294966272 }
0x2d76   :  { %5712 = dma.done.wait [#allocation12], 128  }
0x2d77   :  { %5713 = vsyncadd [#allocation12], 4294967168 }
0x2d78   :  { %4017 = vsyncpa [#allocation5], 1 }
0x2d79   :  { %4018 = vsyncpa [#allocation8], 1 }
0x2d7a   :  { %4019 = vsyncpa [#allocation6], 1 }
0x2d7b   :  { %4020 = vsyncpa [#allocation12], 1 }

</bundles_post_ra>
